<compile_context>
chip_gen: v5e
topology: v5e:2x2
jax: 0.10.0
libtpu: 0.0.40
codegen_flags: <defaults>
</compile_context>

<pallas_src>
import jax
import jax.numpy as jnp
from jax import lax
from jax.experimental import pallas as pl
from jax.experimental.pallas import tpu as pltpu

# ----------------------- deterministic small config -----------------------
BATCH = 2
HUMAN_NUM = 8                 # config_HA.sim.max_allowable_humans (power of 2)
LOOKBACK = 4
ROBOT_SIZE = LOOKBACK * 2     # robot_node feature size
SEQ_T = LOOKBACK + 1          # GRU sequence length
ROBOT_EMB = 32                # robot_embedding_size
HUMAN_EMB = 32                # human_embedding_size
HH_ATTN = 32                  # HHAttn_attn_size (GRU hidden / HH attention dim)
HH_HEADS = 2                  # HHAttn_num_heads
HEAD_DIM = HH_ATTN // HH_HEADS
FINAL_ATTN = 32               # final_attention_size
SHARED = 32                   # shared_latent_space
USE_TIME = False              # config_model.use_time

BH = BATCH * HUMAN_NUM        # 16 flattened human rows
assert HUMAN_NUM & (HUMAN_NUM - 1) == 0
assert FINAL_ATTN & (FINAL_ATTN - 1) == 0
LOG_HN = HUMAN_NUM.bit_length() - 1
LOG_FA = FINAL_ATTN.bit_length() - 1

F32 = jnp.float32
MM_DTYPE = jnp.bfloat16       # matmul input dtype (set to jnp.float32 on v5e if needed)

VMEM = pl.BlockSpec(memory_space=pltpu.MemorySpace.VMEM)
SMEM = pl.BlockSpec(memory_space=pltpu.MemorySpace.SMEM)

# --------- indices into the packed 32-lane weight / aux stacks ----------
I_ROBOT0, I_ROBOT1, I_ROBOT2 = 0, 1, 2
I_HHWO = 3
I_SPATIAL0 = 4                      # .. 8
I_FINAL0, I_FINAL1 = 9, 10
I_HHEMB0 = 11                       # .. 16
I_RFUR0 = 17                        # .. 18
I_COMB0A, I_COMB0B = 19, 20
I_COMB1 = 21                        # .. 24
N32 = 25

# w96 stack indices / a96 rows
I_WHH, I_WQKV = 0, 1
A_BIH, A_BHH, A_WIH0, A_WIH1, A_BQKV = 0, 1, 2, 3, 4

# per-Sequential (layer_norm, relu) flags — match the PyTorch module
ROBOT_TAIL_FLAGS = ((True, True), (True, False))
SPATIAL_FLAGS = ((True, True),) * 4 + ((False, False),)
HHEMB_FLAGS = ((False, True),) + ((True, True),) * 4 + ((False, False),)
RFURTHER_FLAGS = ((True, True), (False, True))
COMBINE_TAIL_FLAGS = ((True, True),) * 4


# ================================ kernel ===================================
def _fused_forward_kernel(robot_ref, xflat_ref, det_ref, valid_ref,
                          w32_ref, a32_ref, w96_ref, a96_ref,
                          wq64_ref, aq64_ref, wkv_ref, akv_ref, o_ref):
    f32 = F32
    B, HN, T, E, FA, hd = BATCH, HUMAN_NUM, SEQ_T, HH_ATTN, FINAL_ATTN, HEAD_DIM

    # ---------- helpers: bf16 matmul inputs, f32 accumulation / LN / softmax ----------
    def mm(x, w):
        return jnp.dot(x.astype(MM_DTYPE), w.astype(MM_DTYPE),
                       preferred_element_type=f32)

    def layer(x, wT, aux, ln, relu):
        y = mm(x, wT) + aux[0:1, :]
        if ln:
            mu = jnp.mean(y, axis=-1, keepdims=True)
            d = y - mu
            var = jnp.mean(d * d, axis=-1, keepdims=True)
            y = d * lax.rsqrt(var + 1e-5) * aux[1:2, :] + aux[2:3, :]
        if relu:
            y = jnp.maximum(y, 0.0)
        return y

    def mlp32(x, idx0, flags):
        for l, (ln, relu) in enumerate(flags):
            x = layer(x, w32_ref[idx0 + l], a32_ref[idx0 + l], ln, relu)
        return x

    def make_grp(n):
        # block-averaging matrix (n lanes, contiguous groups of 32) for grouped LayerNorm
        r = lax.broadcasted_iota(jnp.int32, (n, n), 0)
        c = lax.broadcasted_iota(jnp.int32, (n, n), 1)
        return jnp.where((r >> LOG_FA) == (c >> LOG_FA), 1.0 / FA, 0.0).astype(f32)

    def group_ln(y, grp, gamma, beta):                     # LN per 32-lane group (f32)
        mu = jnp.dot(y, grp, preferred_element_type=f32)
        d = y - mu
        var = jnp.dot(d * d, grp, preferred_element_type=f32)
        return d * lax.rsqrt(var + 1e-5) * gamma + beta

    def rh_embed(x, w_ref, a_ref, grp, width):
        # packed Linear -> groupLN -> ReLU -> Linear(block-diag) -> groupLN
        a1 = a_ref[0]                                      # (3, width)
        a2 = a_ref[1]
        y = mm(x, w_ref[0:32, :]) + a1[0:1, :]
        y = jnp.maximum(group_ln(y, grp, a1[1:2, :], a1[2:3, :]), 0.0)
        y = mm(y, w_ref[32:32 + width, :]) + a2[0:1, :]
        return group_ln(y, grp, a2[1:2, :], a2[2:3, :])

    det0 = det_ref[0]                                      # SMEM scalars
    det1 = det_ref[1]

    # ---------------- robot_linear ----------------
    rs = layer(robot_ref[...], w32_ref[I_ROBOT0, 0:ROBOT_SIZE, :],
               a32_ref[I_ROBOT0], True, True)
    robot_states = mlp32(rs, I_ROBOT1, ROBOT_TAIL_FLAGS)             # (B, 32)

    # ------------- human_gru_encoder (flat (B*HN, .), statically unrolled) -------------
    xflat = xflat_ref[...]                                           # (BH, T*2)
    valid_idx = valid_ref[...] - 1                                   # (BH, 1) int32
    w_hhT = w96_ref[I_WHH]                                           # (32, 96) bf16
    b_ih = a96_ref[A_BIH:A_BIH + 1, :]
    b_hh = a96_ref[A_BHH:A_BHH + 1, :]
    wih0 = a96_ref[A_WIH0:A_WIH0 + 1, :]                             # (1, 96) f32
    wih1 = a96_ref[A_WIH1:A_WIH1 + 1, :]
    h = jnp.zeros((BH, E), f32)
    sel = jnp.zeros((BH, E), f32)
    for t in range(T):
        x_t = xflat[:, 2 * t:2 * t + 2]                              # (BH, 2)
        gi = x_t[:, 0:1] * wih0 + x_t[:, 1:2] * wih1 + b_ih          # K=2 as VPU FMAs
        gh = mm(h, w_hhT) + b_hh                                     # (BH, 96)
        r_g = jax.nn.sigmoid(gi[:, 0:E] + gh[:, 0:E])
        z_g = jax.nn.sigmoid(gi[:, E:2 * E] + gh[:, E:2 * E])
        n_g = jnp.tanh(gi[:, 2 * E:3 * E] + r_g * gh[:, 2 * E:3 * E])
        h = (1.0 - z_g) * n_g + z_g * h
        take = valid_idx == t
        if t == T - 1:                 # PyTorch gather index -1 selects the LAST step
            take = take | (valid_idx < 0)
        sel = jnp.where(take, h, sel)
    se = sel                                                         # (BH, 32)

    # ------------- HumanHumanAttention (flattened, de-batched multi-head) -------------
    qkv = mm(se, w96_ref[I_WQKV]) + a96_ref[A_BQKV:A_BQKV + 1, :]    # (BH, 3E)
    ri = lax.broadcasted_iota(jnp.int32, (BH, BH), 0)
    ci = lax.broadcasted_iota(jnp.int32, (BH, BH), 1)
    cb = ci >> LOG_HN                                                # key batch id
    ch = ci & (HN - 1)                                               # key human id
    ok_hh = ((ri >> LOG_HN) == cb) & (ch < jnp.where(cb == 0, det0, det1))
    scale = 1.0 / float(hd) ** 0.5
    z = None
    for a in range(HH_HEADS):
        q_h = qkv[:, a * hd:(a + 1) * hd] * scale
        k_h = qkv[:, E + a * hd:E + (a + 1) * hd]
        v_h = qkv[:, 2 * E + a * hd:2 * E + (a + 1) * hd]
        s = lax.dot_general(q_h.astype(MM_DTYPE), k_h.astype(MM_DTYPE),
                            (((1,), (1,)), ((), ())),
                            preferred_element_type=f32)              # (BH, BH)
        s = jnp.where(ok_hh, s, -1e9)                                # finite mask
        s = s - jnp.max(s, axis=-1, keepdims=True)
        p = jnp.exp(s)
        p = p / jnp.sum(p, axis=-1, keepdims=True)                   # exact normalisation
        o_h = jnp.dot(p.astype(MM_DTYPE), v_h.astype(MM_DTYPE),
                      preferred_element_type=f32)                    # (BH, hd)
        c = mm(o_h, w32_ref[I_HHWO, a * hd:(a + 1) * hd, :])         # out_proj row-split
        z = c if z is None else z + c
    z = z + a32_ref[I_HHWO, 0:1, :]                                  # (BH, E)

    # ---------------- spatial_linear ----------------
    output_spatial = mlp32(z, I_SPATIAL0, SPATIAL_FLAGS)             # (BH, E)

    # ---------------- RobotHumanAttention ----------------
    grp64 = make_grp(2 * FA)
    grp128 = make_grp(4 * FA)
    Qr = rh_embed(robot_states, wq64_ref, aq64_ref, grp64, 2 * FA)   # (B, 2FA)
    KV = rh_embed(output_spatial, wkv_ref, akv_ref, grp128, 4 * FA)  # (BH, 4FA)=[K0|K1|V0|V1]

    ri2 = lax.broadcasted_iota(jnp.int32, (B, BH), 0)
    ci2 = lax.broadcasted_iota(jnp.int32, (B, BH), 1)
    ok_rh = ((ci2 >> LOG_HN) == ri2) & \
            ((ci2 & (HN - 1)) < jnp.where(ri2 == 0, det0, det1))
    temp = 1.0 / float(FA) ** 0.5
    hidden = None
    for a in range(2):
        q_a = Qr[:, a * FA:(a + 1) * FA]                             # (B, FA)
        k_a = KV[:, a * FA:(a + 1) * FA]                             # (BH, FA)
        v_a = KV[:, 2 * FA + a * FA:2 * FA + (a + 1) * FA]           # (BH, FA)
        s = lax.dot_general(q_a.astype(MM_DTYPE), k_a.astype(MM_DTYPE),
                            (((1,), (1,)), ((), ())),
                            preferred_element_type=f32) * temp       # (B, BH)
        s = jnp.where(ok_rh, s, -1e9)
        s = s - jnp.max(s, axis=-1, keepdims=True)
        p = jnp.exp(s)
        p = p / jnp.sum(p, axis=-1, keepdims=True)
        wv = jnp.dot(p.astype(MM_DTYPE), v_a.astype(MM_DTYPE),
                     preferred_element_type=f32)                     # (B, FA)
        c = mm(wv, w32_ref[I_FINAL0 + a])                            # final_attn_linear split
        hidden = c if hidden is None else hidden + c
    hidden = hidden + a32_ref[I_FINAL0, 0:1, :]                      # (B, FA)

    # ---------------- final embedding MLPs + combineMLP ----------------
    # TODO(synk): hhemb/rfurther could be lane-packed into one 64-wide pipeline, but their
    # LayerNorm positions differ per layer so the extra group-LN matmuls cancel the saving.
    hh_emb = mlp32(hidden, I_HHEMB0, HHEMB_FLAGS)                    # (B, 32)
    r_emb = mlp32(robot_states, I_RFUR0, RFURTHER_FLAGS)             # (B, 32)

    aux0 = a32_ref[I_COMB0A]
    y = mm(hh_emb, w32_ref[I_COMB0A]) + mm(r_emb, w32_ref[I_COMB0B]) + aux0[0:1, :]
    mu = jnp.mean(y, axis=-1, keepdims=True)
    d = y - mu
    var = jnp.mean(d * d, axis=-1, keepdims=True)
    y = jnp.maximum(d * lax.rsqrt(var + 1e-5) * aux0[1:2, :] + aux0[2:3, :], 0.0)
    y = mlp32(y, I_COMB1, COMBINE_TAIL_FLAGS)

    # TODO(synk): use_time branch (concat percent_episode) disabled (USE_TIME=False).
    o_ref[...] = y


# ============================ jitted wrapper ===============================
def _forward_impl(params, robot_node, spatial_edges, detected_human_num,
                  human_valid_history):
    xflat = spatial_edges.reshape(BH, SEQ_T * 2)                     # contiguous reshape only
    det = detected_human_num.astype(jnp.int32).reshape(BATCH)        # SMEM scalars
    valid = human_valid_history.astype(jnp.int32).reshape(BH, 1)
    return pl.pallas_call(
        _fused_forward_kernel,
        out_shape=jax.ShapeDtypeStruct((BATCH, SHARED), jnp.float32),
        in_specs=[VMEM, VMEM, SMEM, VMEM] + [VMEM] * 8,
        out_specs=VMEM,
    )(robot_node, xflat, det, valid,
      params['w32'], params['a32'], params['w96'], params['a96'],
      params['wq64'], params['aq64'], params['wkv128'], params['akv128'])


human_avoidance_forward = jax.jit(_forward_impl)


# ========================= parameter construction ==========================
class _KeyGen:
    def __init__(self, key):
        self.key = key

    def __call__(self):
        self.key, sub = jax.random.split(self.key)
        return sub


def _w(kg, din, dout):
    """torch-layout Linear weight (dout, din)."""
    return jax.random.normal(kg(), (dout, din), jnp.float32) / jnp.sqrt(jnp.float32(din))


def _aux(dout):
    """packed (3, dout): row0 = bias(0), row1 = LN gamma(1), row2 = LN beta(0)."""
    return jnp.stack([jnp.zeros((dout,), jnp.float32),
                      jnp.ones((dout,), jnp.float32),
                      jnp.zeros((dout,), jnp.float32)])


def _blockdiag(blocks):
    n, d = len(blocks), blocks[0].shape[0]
    out = jnp.zeros((n * d, n * d), jnp.float32)
    for i, b in enumerate(blocks):
        out = out.at[i * d:(i + 1) * d, i * d:(i + 1) * d].set(b)
    return out


def build_params(key):
    kg = _KeyGen(key)
    E, FA = HH_ATTN, FINAL_ATTN

    w32 = [jnp.zeros((32, 32), jnp.float32)] * N32
    a32 = [_aux(32)] * N32

    def set32(i, wT):
        w32[i] = wT
        a32[i] = _aux(32)

    # robot_linear (first layer 8->32 zero-padded to 32 input rows)
    w0 = _w(kg, ROBOT_SIZE, ROBOT_EMB)
    set32(I_ROBOT0, jnp.zeros((32, 32), jnp.float32).at[0:ROBOT_SIZE, :].set(w0.T))
    set32(I_ROBOT1, _w(kg, ROBOT_EMB, ROBOT_EMB).T)
    set32(I_ROBOT2, _w(kg, ROBOT_EMB, ROBOT_EMB).T)

    # GRU(2 -> E), PyTorch gate order (r, z, n); zero biases (demo init)
    w_ih = jax.random.normal(kg(), (3 * E, 2), jnp.float32) / jnp.sqrt(jnp.float32(E))
    w_hh = jax.random.normal(kg(), (3 * E, E), jnp.float32) / jnp.sqrt(jnp.float32(E))
    b_ih = jnp.zeros((3 * E,), jnp.float32)
    b_hh = jnp.zeros((3 * E,), jnp.float32)

    # HumanHumanAttention: q/k/v pre-linears composed with the MHA in_proj (both affine,
    # no nonlinearity between them in the PyTorch model)
    def _compose(W_m, b_m, W_pre, b_pre):
        return W_m @ W_pre, W_m @ b_pre + b_m

    zeros_e = jnp.zeros((E,), jnp.float32)
    Wq_c, bq_c = _compose(_w(kg, E, E), zeros_e, _w(kg, E, E), zeros_e)
    Wk_c, bk_c = _compose(_w(kg, E, E), zeros_e, _w(kg, E, E), zeros_e)
    Wv_c, bv_c = _compose(_w(kg, E, E), zeros_e, _w(kg, E, E), zeros_e)
    w_qkvT = jnp.concatenate([Wq_c.T, Wk_c.T, Wv_c.T], axis=1)       # (E, 3E)
    b_qkv = jnp.concatenate([bq_c, bk_c, bv_c])                      # (3E,)
    set32(I_HHWO, _w(kg, E, E).T)                                    # MHA out_proj

    # spatial_linear
    for l in range(5):
        set32(I_SPATIAL0 + l, _w(kg, E, E).T)

    # RobotHumanAttention embeddings: Q packed to 64 lanes, K&V packed to 128 lanes
    q_w1 = [_w(kg, ROBOT_EMB, FA) for _ in range(2)]
    q_w2 = [_w(kg, FA, FA) for _ in range(2)]
    k_w1 = [_w(kg, E, FA) for _ in range(2)]
    k_w2 = [_w(kg, FA, FA) for _ in range(2)]
    v_w1 = [_w(kg, E, FA) for _ in range(2)]
    v_w2 = [_w(kg, FA, FA) for _ in range(2)]
    wq64 = jnp.concatenate(
        [jnp.concatenate([q_w1[0].T, q_w1[1].T], axis=1),            # (32, 64)
         _blockdiag([q_w2[0].T, q_w2[1].T])], axis=0)                # -> (96, 64)
    aq64 = jnp.stack([_aux(2 * FA), _aux(2 * FA)])                   # (2, 3, 64)
    kv_w1 = k_w1 + v_w1                                              # order [K0, K1, V0, V1]
    kv_w2 = k_w2 + v_w2
    wkv = jnp.concatenate(
        [jnp.concatenate([p.T for p in kv_w1], axis=1),              # (32, 128)
         _blockdiag([p.T for p in kv_w2])], axis=0)                  # -> (160, 128)
    akv = jnp.stack([_aux(4 * FA), _aux(4 * FA)])                    # (2, 3, 128)

    # final_attn_linear(2FA -> FA) split so no concat is needed in-kernel
    w_f = _w(kg, 2 * FA, FA)                                         # (32, 64)
    set32(I_FINAL0, w_f[:, :FA].T)
    set32(I_FINAL1, w_f[:, FA:].T)

    # HHattenEmbedding (6 layers) and robot_further_embedding (2 layers)
    for l in range(6):
        set32(I_HHEMB0 + l, _w(kg, FINAL_ATTN if l == 0 else HUMAN_EMB, HUMAN_EMB).T)
    for l in range(2):
        set32(I_RFUR0 + l, _w(kg, ROBOT_EMB, ROBOT_EMB).T)

    # combineMLP: first layer (64 -> 32) split for the (HH_emb, robot_emb) concat
    w_c0 = _w(kg, ROBOT_EMB + HUMAN_EMB, SHARED)                     # (32, 64)
    set32(I_COMB0A, w_c0[:, :HUMAN_EMB].T)
    set32(I_COMB0B, w_c0[:, HUMAN_EMB:].T)
    for l in range(4):
        set32(I_COMB1 + l, _w(kg, SHARED, SHARED).T)

    # ---- pack the consolidated buffers ----
    return {
        'w32': jnp.stack(w32).astype(MM_DTYPE),                      # (25, 32, 32)
        'a32': jnp.stack(a32),                                       # (25, 3, 32) f32
        'w96': jnp.stack([w_hh.T, w_qkvT]).astype(MM_DTYPE),         # (2, 32, 96)
        'a96': jnp.stack([b_ih, b_hh, w_ih[:, 0], w_ih[:, 1], b_qkv]),  # (5, 96) f32
        'wq64': wq64.astype(MM_DTYPE),                               # (96, 64)
        'aq64': aq64,                                                # (2, 3, 64) f32
        'wkv128': wkv.astype(MM_DTYPE),                              # (160, 128)
        'akv128': akv,                                               # (2, 3, 128) f32
    }


# ================================== main ===================================
if __name__ == "__main__":
    key = jax.random.PRNGKey(0)
    kp, k1, k2, k3 = jax.random.split(key, 4)

    params = build_params(kp)

    robot_node = jax.random.normal(k1, (BATCH, ROBOT_SIZE), jnp.float32)
    spatial_edges = jax.random.normal(k2, (BATCH, HUMAN_NUM, SEQ_T * 2), jnp.float32)
    detected_human_num = jnp.array([3, HUMAN_NUM], dtype=jnp.int32)   # >= 1 per row
    human_valid_history = jax.random.randint(k3, (BATCH, HUMAN_NUM), 1, SEQ_T + 1)

    out = human_avoidance_forward(params, robot_node, spatial_edges,
                                  detected_human_num, human_valid_history)
    out = jax.block_until_ready(out)
    assert out.shape == (BATCH, SHARED)
    assert bool(jnp.all(jnp.isfinite(out)))
    print("KERNEL_OK")
</pallas_src>

<mosaic_0001>
module attributes {stable_mosaic.version = 11 : i64} {
  func.func @_fused_forward_kernel(%arg0: memref<2x8xf32, #tpu.memory_space<vmem>>, %arg1: memref<16x10xf32, #tpu.memory_space<vmem>>, %arg2: memref<2xi32, #tpu.memory_space<smem>>, %arg3: memref<16x1xi32, #tpu.memory_space<vmem>>, %arg4: memref<25x32x32xbf16, #tpu.memory_space<vmem>>, %arg5: memref<25x3x32xf32, #tpu.memory_space<vmem>>, %arg6: memref<2x32x96xbf16, #tpu.memory_space<vmem>>, %arg7: memref<5x96xf32, #tpu.memory_space<vmem>>, %arg8: memref<96x64xbf16, #tpu.memory_space<vmem>>, %arg9: memref<2x3x64xf32, #tpu.memory_space<vmem>>, %arg10: memref<160x128xbf16, #tpu.memory_space<vmem>>, %arg11: memref<2x3x128xf32, #tpu.memory_space<vmem>>, %arg12: memref<2x32xf32, #tpu.memory_space<vmem>>) attributes {dimension_semantics = [], scalar_prefetch = 0 : i64, scratch_operands = 0 : i64, tpu.core_type = #tpu.core_type<tc>} {
    %c0 = arith.constant 0 : index
    %0 = memref.load %arg2[%c0] : memref<2xi32, #tpu.memory_space<smem>>
    %c1 = arith.constant 1 : index
    %1 = memref.load %arg2[%c1] : memref<2xi32, #tpu.memory_space<smem>>
    %c0_0 = arith.constant 0 : index
    %c0_1 = arith.constant 0 : index
    %2 = vector.load %arg0[%c0_0, %c0_1] : memref<2x8xf32, #tpu.memory_space<vmem>>, vector<2x8xf32>
    %c0_2 = arith.constant 0 : index
    %c0_3 = arith.constant 0 : index
    %c0_4 = arith.constant 0 : index
    %3 = vector.load %arg4[%c0_2, %c0_3, %c0_4] : memref<25x32x32xbf16, #tpu.memory_space<vmem>>, vector<1x8x32xbf16>
    %4 = vector.shape_cast %3 : vector<1x8x32xbf16> to vector<8x32xbf16>
    %c0_5 = arith.constant 0 : index
    %c0_6 = arith.constant 0 : index
    %c0_7 = arith.constant 0 : index
    %5 = vector.load %arg5[%c0_5, %c0_6, %c0_7] : memref<25x3x32xf32, #tpu.memory_space<vmem>>, vector<1x3x32xf32>
    %6 = vector.shape_cast %5 : vector<1x3x32xf32> to vector<3x32xf32>
    %7 = arith.truncf %2 : vector<2x8xf32> to vector<2x8xbf16>
    %cst = arith.constant dense<0.000000e+00> : vector<2x32xf32>
    %8 = tpu.matmul %7, %4, %cst {dimension_numbers = #tpu.dot_dimension_numbers<[1], [0], [0], [1], [0, 0, 1, 1], [], []>} : vector<2x8xbf16>, vector<8x32xbf16>, vector<2x32xf32> -> vector<2x32xf32>
    %9 = vector.extract_strided_slice %6 {offsets = [0, 0], sizes = [1, 32], strides = [1, 1]} : vector<3x32xf32> to vector<1x32xf32>
    %10 = vector.broadcast %9 : vector<1x32xf32> to vector<2x32xf32>
    %11 = arith.addf %8, %10 : vector<2x32xf32>
    %cst_8 = arith.constant dense<0.000000e+00> : vector<2xf32>
    %12 = vector.multi_reduction <add>, %11, %cst_8 [1] : vector<2x32xf32> to vector<2xf32>
    %13 = vector.shape_cast %12 : vector<2xf32> to vector<2x1xf32>
    %cst_9 = arith.constant 3.200000e+01 : f32
    %14 = vector.broadcast %cst_9 : f32 to vector<2x1xf32>
    %15 = arith.divf %13, %14 : vector<2x1xf32>
    %16 = vector.broadcast %15 : vector<2x1xf32> to vector<2x32xf32>
    %17 = arith.subf %11, %16 : vector<2x32xf32>
    %18 = arith.mulf %17, %17 : vector<2x32xf32>
    %cst_10 = arith.constant dense<0.000000e+00> : vector<2xf32>
    %19 = vector.multi_reduction <add>, %18, %cst_10 [1] : vector<2x32xf32> to vector<2xf32>
    %20 = vector.shape_cast %19 : vector<2xf32> to vector<2x1xf32>
    %cst_11 = arith.constant 3.200000e+01 : f32
    %21 = vector.broadcast %cst_11 : f32 to vector<2x1xf32>
    %22 = arith.divf %20, %21 : vector<2x1xf32>
    %cst_12 = arith.constant 9.99999974E-6 : f32
    %23 = vector.broadcast %cst_12 : f32 to vector<2x1xf32>
    %24 = arith.addf %22, %23 : vector<2x1xf32>
    %25 = math.rsqrt %24 : vector<2x1xf32>
    %26 = vector.broadcast %25 : vector<2x1xf32> to vector<2x32xf32>
    %27 = arith.mulf %17, %26 : vector<2x32xf32>
    %28 = vector.extract_strided_slice %6 {offsets = [1, 0], sizes = [1, 32], strides = [1, 1]} : vector<3x32xf32> to vector<1x32xf32>
    %29 = vector.broadcast %28 : vector<1x32xf32> to vector<2x32xf32>
    %30 = arith.mulf %27, %29 : vector<2x32xf32>
    %31 = vector.extract_strided_slice %6 {offsets = [2, 0], sizes = [1, 32], strides = [1, 1]} : vector<3x32xf32> to vector<1x32xf32>
    %32 = vector.broadcast %31 : vector<1x32xf32> to vector<2x32xf32>
    %33 = arith.addf %30, %32 : vector<2x32xf32>
    %cst_13 = arith.constant 0.000000e+00 : f32
    %34 = vector.broadcast %cst_13 : f32 to vector<2x32xf32>
    %35 = arith.maximumf %33, %34 : vector<2x32xf32>
    %c1_14 = arith.constant 1 : index
    %c0_15 = arith.constant 0 : index
    %c0_16 = arith.constant 0 : index
    %36 = vector.load %arg4[%c1_14, %c0_15, %c0_16] : memref<25x32x32xbf16, #tpu.memory_space<vmem>>, vector<1x32x32xbf16>
    %37 = vector.shape_cast %36 : vector<1x32x32xbf16> to vector<32x32xbf16>
    %c1_17 = arith.constant 1 : index
    %c0_18 = arith.constant 0 : index
    %c0_19 = arith.constant 0 : index
    %38 = vector.load %arg5[%c1_17, %c0_18, %c0_19] : memref<25x3x32xf32, #tpu.memory_space<vmem>>, vector<1x3x32xf32>
    %39 = vector.shape_cast %38 : vector<1x3x32xf32> to vector<3x32xf32>
    %40 = arith.truncf %35 : vector<2x32xf32> to vector<2x32xbf16>
    %cst_20 = arith.constant dense<0.000000e+00> : vector<2x32xf32>
    %41 = tpu.matmul %40, %37, %cst_20 {dimension_numbers = #tpu.dot_dimension_numbers<[1], [0], [0], [1], [0, 0, 1, 1], [], []>} : vector<2x32xbf16>, vector<32x32xbf16>, vector<2x32xf32> -> vector<2x32xf32>
    %42 = vector.extract_strided_slice %39 {offsets = [0, 0], sizes = [1, 32], strides = [1, 1]} : vector<3x32xf32> to vector<1x32xf32>
    %43 = vector.broadcast %42 : vector<1x32xf32> to vector<2x32xf32>
    %44 = arith.addf %41, %43 : vector<2x32xf32>
    %cst_21 = arith.constant dense<0.000000e+00> : vector<2xf32>
    %45 = vector.multi_reduction <add>, %44, %cst_21 [1] : vector<2x32xf32> to vector<2xf32>
    %46 = vector.shape_cast %45 : vector<2xf32> to vector<2x1xf32>
    %cst_22 = arith.constant 3.200000e+01 : f32
    %47 = vector.broadcast %cst_22 : f32 to vector<2x1xf32>
    %48 = arith.divf %46, %47 : vector<2x1xf32>
    %49 = vector.broadcast %48 : vector<2x1xf32> to vector<2x32xf32>
    %50 = arith.subf %44, %49 : vector<2x32xf32>
    %51 = arith.mulf %50, %50 : vector<2x32xf32>
    %cst_23 = arith.constant dense<0.000000e+00> : vector<2xf32>
    %52 = vector.multi_reduction <add>, %51, %cst_23 [1] : vector<2x32xf32> to vector<2xf32>
    %53 = vector.shape_cast %52 : vector<2xf32> to vector<2x1xf32>
    %cst_24 = arith.constant 3.200000e+01 : f32
    %54 = vector.broadcast %cst_24 : f32 to vector<2x1xf32>
    %55 = arith.divf %53, %54 : vector<2x1xf32>
    %cst_25 = arith.constant 9.99999974E-6 : f32
    %56 = vector.broadcast %cst_25 : f32 to vector<2x1xf32>
    %57 = arith.addf %55, %56 : vector<2x1xf32>
    %58 = math.rsqrt %57 : vector<2x1xf32>
    %59 = vector.broadcast %58 : vector<2x1xf32> to vector<2x32xf32>
    %60 = arith.mulf %50, %59 : vector<2x32xf32>
    %61 = vector.extract_strided_slice %39 {offsets = [1, 0], sizes = [1, 32], strides = [1, 1]} : vector<3x32xf32> to vector<1x32xf32>
    %62 = vector.broadcast %61 : vector<1x32xf32> to vector<2x32xf32>
    %63 = arith.mulf %60, %62 : vector<2x32xf32>
    %64 = vector.extract_strided_slice %39 {offsets = [2, 0], sizes = [1, 32], strides = [1, 1]} : vector<3x32xf32> to vector<1x32xf32>
    %65 = vector.broadcast %64 : vector<1x32xf32> to vector<2x32xf32>
    %66 = arith.addf %63, %65 : vector<2x32xf32>
    %cst_26 = arith.constant 0.000000e+00 : f32
    %67 = vector.broadcast %cst_26 : f32 to vector<2x32xf32>
    %68 = arith.maximumf %66, %67 : vector<2x32xf32>
    %c2 = arith.constant 2 : index
    %c0_27 = arith.constant 0 : index
    %c0_28 = arith.constant 0 : index
    %69 = vector.load %arg4[%c2, %c0_27, %c0_28] : memref<25x32x32xbf16, #tpu.memory_space<vmem>>, vector<1x32x32xbf16>
    %70 = vector.shape_cast %69 : vector<1x32x32xbf16> to vector<32x32xbf16>
    %c2_29 = arith.constant 2 : index
    %c0_30 = arith.constant 0 : index
    %c0_31 = arith.constant 0 : index
    %71 = vector.load %arg5[%c2_29, %c0_30, %c0_31] : memref<25x3x32xf32, #tpu.memory_space<vmem>>, vector<1x3x32xf32>
    %72 = vector.shape_cast %71 : vector<1x3x32xf32> to vector<3x32xf32>
    %73 = arith.truncf %68 : vector<2x32xf32> to vector<2x32xbf16>
    %cst_32 = arith.constant dense<0.000000e+00> : vector<2x32xf32>
    %74 = tpu.matmul %73, %70, %cst_32 {dimension_numbers = #tpu.dot_dimension_numbers<[1], [0], [0], [1], [0, 0, 1, 1], [], []>} : vector<2x32xbf16>, vector<32x32xbf16>, vector<2x32xf32> -> vector<2x32xf32>
    %75 = vector.extract_strided_slice %72 {offsets = [0, 0], sizes = [1, 32], strides = [1, 1]} : vector<3x32xf32> to vector<1x32xf32>
    %76 = vector.broadcast %75 : vector<1x32xf32> to vector<2x32xf32>
    %77 = arith.addf %74, %76 : vector<2x32xf32>
    %cst_33 = arith.constant dense<0.000000e+00> : vector<2xf32>
    %78 = vector.multi_reduction <add>, %77, %cst_33 [1] : vector<2x32xf32> to vector<2xf32>
    %79 = vector.shape_cast %78 : vector<2xf32> to vector<2x1xf32>
    %cst_34 = arith.constant 3.200000e+01 : f32
    %80 = vector.broadcast %cst_34 : f32 to vector<2x1xf32>
    %81 = arith.divf %79, %80 : vector<2x1xf32>
    %82 = vector.broadcast %81 : vector<2x1xf32> to vector<2x32xf32>
    %83 = arith.subf %77, %82 : vector<2x32xf32>
    %84 = arith.mulf %83, %83 : vector<2x32xf32>
    %cst_35 = arith.constant dense<0.000000e+00> : vector<2xf32>
    %85 = vector.multi_reduction <add>, %84, %cst_35 [1] : vector<2x32xf32> to vector<2xf32>
    %86 = vector.shape_cast %85 : vector<2xf32> to vector<2x1xf32>
    %cst_36 = arith.constant 3.200000e+01 : f32
    %87 = vector.broadcast %cst_36 : f32 to vector<2x1xf32>
    %88 = arith.divf %86, %87 : vector<2x1xf32>
    %cst_37 = arith.constant 9.99999974E-6 : f32
    %89 = vector.broadcast %cst_37 : f32 to vector<2x1xf32>
    %90 = arith.addf %88, %89 : vector<2x1xf32>
    %91 = math.rsqrt %90 : vector<2x1xf32>
    %92 = vector.broadcast %91 : vector<2x1xf32> to vector<2x32xf32>
    %93 = arith.mulf %83, %92 : vector<2x32xf32>
    %94 = vector.extract_strided_slice %72 {offsets = [1, 0], sizes = [1, 32], strides = [1, 1]} : vector<3x32xf32> to vector<1x32xf32>
    %95 = vector.broadcast %94 : vector<1x32xf32> to vector<2x32xf32>
    %96 = arith.mulf %93, %95 : vector<2x32xf32>
    %97 = vector.extract_strided_slice %72 {offsets = [2, 0], sizes = [1, 32], strides = [1, 1]} : vector<3x32xf32> to vector<1x32xf32>
    %98 = vector.broadcast %97 : vector<1x32xf32> to vector<2x32xf32>
    %99 = arith.addf %96, %98 : vector<2x32xf32>
    %c0_38 = arith.constant 0 : index
    %c0_39 = arith.constant 0 : index
    %100 = vector.load %arg1[%c0_38, %c0_39] : memref<16x10xf32, #tpu.memory_space<vmem>>, vector<16x10xf32>
    %c0_40 = arith.constant 0 : index
    %c0_41 = arith.constant 0 : index
    %101 = vector.load %arg3[%c0_40, %c0_41] : memref<16x1xi32, #tpu.memory_space<vmem>>, vector<16x1xi32>
    %c1_i32 = arith.constant 1 : i32
    %102 = vector.broadcast %c1_i32 : i32 to vector<16x1xi32>
    %103 = arith.subi %101, %102 : vector<16x1xi32>
    %c0_42 = arith.constant 0 : index
    %c0_43 = arith.constant 0 : index
    %c0_44 = arith.constant 0 : index
    %104 = vector.load %arg6[%c0_42, %c0_43, %c0_44] : memref<2x32x96xbf16, #tpu.memory_space<vmem>>, vector<1x32x96xbf16>
    %105 = vector.shape_cast %104 : vector<1x32x96xbf16> to vector<32x96xbf16>
    %c0_45 = arith.constant 0 : index
    %c0_46 = arith.constant 0 : index
    %106 = vector.load %arg7[%c0_45, %c0_46] : memref<5x96xf32, #tpu.memory_space<vmem>>, vector<1x96xf32>
    %c1_47 = arith.constant 1 : index
    %c0_48 = arith.constant 0 : index
    %107 = vector.load %arg7[%c1_47, %c0_48] : memref<5x96xf32, #tpu.memory_space<vmem>>, vector<1x96xf32>
    %c2_49 = arith.constant 2 : index
    %c0_50 = arith.constant 0 : index
    %108 = vector.load %arg7[%c2_49, %c0_50] : memref<5x96xf32, #tpu.memory_space<vmem>>, vector<1x96xf32>
    %c3 = arith.constant 3 : index
    %c0_51 = arith.constant 0 : index
    %109 = vector.load %arg7[%c3, %c0_51] : memref<5x96xf32, #tpu.memory_space<vmem>>, vector<1x96xf32>
    %cst_52 = arith.constant 0.000000e+00 : f32
    %110 = vector.broadcast %cst_52 : f32 to vector<16x32xf32>
    %cst_53 = arith.constant 0.000000e+00 : f32
    %111 = vector.broadcast %cst_53 : f32 to vector<16x32xf32>
    %112 = vector.extract_strided_slice %100 {offsets = [0, 0], sizes = [16, 2], strides = [1, 1]} : vector<16x10xf32> to vector<16x2xf32>
    %113 = vector.extract_strided_slice %112 {offsets = [0, 0], sizes = [16, 1], strides = [1, 1]} : vector<16x2xf32> to vector<16x1xf32>
    %114 = vector.broadcast %113 : vector<16x1xf32> to vector<16x96xf32>
    %115 = vector.broadcast %108 : vector<1x96xf32> to vector<16x96xf32>
    %116 = arith.mulf %114, %115 : vector<16x96xf32>
    %117 = vector.extract_strided_slice %112 {offsets = [0, 1], sizes = [16, 1], strides = [1, 1]} : vector<16x2xf32> to vector<16x1xf32>
    %118 = vector.broadcast %117 : vector<16x1xf32> to vector<16x96xf32>
    %119 = vector.broadcast %109 : vector<1x96xf32> to vector<16x96xf32>
    %120 = arith.mulf %118, %119 : vector<16x96xf32>
    %121 = arith.addf %116, %120 : vector<16x96xf32>
    %122 = vector.broadcast %106 : vector<1x96xf32> to vector<16x96xf32>
    %123 = arith.addf %121, %122 : vector<16x96xf32>
    %124 = arith.truncf %110 : vector<16x32xf32> to vector<16x32xbf16>
    %cst_54 = arith.constant dense<0.000000e+00> : vector<16x96xf32>
    %125 = tpu.matmul %124, %105, %cst_54 {dimension_numbers = #tpu.dot_dimension_numbers<[1], [0], [0], [1], [0, 0, 1, 1], [], []>} : vector<16x32xbf16>, vector<32x96xbf16>, vector<16x96xf32> -> vector<16x96xf32>
    %126 = vector.broadcast %107 : vector<1x96xf32> to vector<16x96xf32>
    %127 = arith.addf %125, %126 : vector<16x96xf32>
    %128 = vector.extract_strided_slice %123 {offsets = [0, 0], sizes = [16, 32], strides = [1, 1]} : vector<16x96xf32> to vector<16x32xf32>
    %129 = vector.extract_strided_slice %127 {offsets = [0, 0], sizes = [16, 32], strides = [1, 1]} : vector<16x96xf32> to vector<16x32xf32>
    %130 = arith.addf %128, %129 : vector<16x32xf32>
    %131 = arith.negf %130 : vector<16x32xf32>
    %132 = math.exp %131 : vector<16x32xf32>
    %cst_55 = arith.constant 1.000000e+00 : f32
    %133 = vector.broadcast %cst_55 : f32 to vector<16x32xf32>
    %134 = arith.addf %133, %132 : vector<16x32xf32>
    %135 = arith.divf %133, %134 : vector<16x32xf32>
    %136 = vector.extract_strided_slice %123 {offsets = [0, 32], sizes = [16, 32], strides = [1, 1]} : vector<16x96xf32> to vector<16x32xf32>
    %137 = vector.extract_strided_slice %127 {offsets = [0, 32], sizes = [16, 32], strides = [1, 1]} : vector<16x96xf32> to vector<16x32xf32>
    %138 = arith.addf %136, %137 : vector<16x32xf32>
    %139 = arith.negf %138 : vector<16x32xf32>
    %140 = math.exp %139 : vector<16x32xf32>
    %cst_56 = arith.constant 1.000000e+00 : f32
    %141 = vector.broadcast %cst_56 : f32 to vector<16x32xf32>
    %142 = arith.addf %141, %140 : vector<16x32xf32>
    %143 = arith.divf %141, %142 : vector<16x32xf32>
    %144 = vector.extract_strided_slice %123 {offsets = [0, 64], sizes = [16, 32], strides = [1, 1]} : vector<16x96xf32> to vector<16x32xf32>
    %145 = vector.extract_strided_slice %127 {offsets = [0, 64], sizes = [16, 32], strides = [1, 1]} : vector<16x96xf32> to vector<16x32xf32>
    %146 = arith.mulf %135, %145 : vector<16x32xf32>
    %147 = arith.addf %144, %146 : vector<16x32xf32>
    %148 = math.tanh %147 : vector<16x32xf32>
    %cst_57 = arith.constant 1.000000e+00 : f32
    %149 = vector.broadcast %cst_57 : f32 to vector<16x32xf32>
    %150 = arith.subf %149, %143 : vector<16x32xf32>
    %151 = arith.mulf %150, %148 : vector<16x32xf32>
    %152 = arith.mulf %143, %110 : vector<16x32xf32>
    %153 = arith.addf %151, %152 : vector<16x32xf32>
    %c0_i32 = arith.constant 0 : i32
    %154 = vector.broadcast %c0_i32 : i32 to vector<16x1xi32>
    %155 = arith.cmpi eq, %103, %154 : vector<16x1xi32>
    %156 = vector.shape_cast %155 : vector<16x1xi1> to vector<16x1xi1>
    %157 = vector.broadcast %156 : vector<16x1xi1> to vector<16x32xi1>
    %158 = arith.select %157, %153, %111 : vector<16x32xi1>, vector<16x32xf32>
    %159 = vector.extract_strided_slice %100 {offsets = [0, 2], sizes = [16, 2], strides = [1, 1]} : vector<16x10xf32> to vector<16x2xf32>
    %160 = vector.extract_strided_slice %159 {offsets = [0, 0], sizes = [16, 1], strides = [1, 1]} : vector<16x2xf32> to vector<16x1xf32>
    %161 = vector.broadcast %160 : vector<16x1xf32> to vector<16x96xf32>
    %162 = vector.broadcast %108 : vector<1x96xf32> to vector<16x96xf32>
    %163 = arith.mulf %161, %162 : vector<16x96xf32>
    %164 = vector.extract_strided_slice %159 {offsets = [0, 1], sizes = [16, 1], strides = [1, 1]} : vector<16x2xf32> to vector<16x1xf32>
    %165 = vector.broadcast %164 : vector<16x1xf32> to vector<16x96xf32>
    %166 = vector.broadcast %109 : vector<1x96xf32> to vector<16x96xf32>
    %167 = arith.mulf %165, %166 : vector<16x96xf32>
    %168 = arith.addf %163, %167 : vector<16x96xf32>
    %169 = vector.broadcast %106 : vector<1x96xf32> to vector<16x96xf32>
    %170 = arith.addf %168, %169 : vector<16x96xf32>
    %171 = arith.truncf %153 : vector<16x32xf32> to vector<16x32xbf16>
    %cst_58 = arith.constant dense<0.000000e+00> : vector<16x96xf32>
    %172 = tpu.matmul %171, %105, %cst_58 {dimension_numbers = #tpu.dot_dimension_numbers<[1], [0], [0], [1], [0, 0, 1, 1], [], []>} : vector<16x32xbf16>, vector<32x96xbf16>, vector<16x96xf32> -> vector<16x96xf32>
    %173 = vector.broadcast %107 : vector<1x96xf32> to vector<16x96xf32>
    %174 = arith.addf %172, %173 : vector<16x96xf32>
    %175 = vector.extract_strided_slice %170 {offsets = [0, 0], sizes = [16, 32], strides = [1, 1]} : vector<16x96xf32> to vector<16x32xf32>
    %176 = vector.extract_strided_slice %174 {offsets = [0, 0], sizes = [16, 32], strides = [1, 1]} : vector<16x96xf32> to vector<16x32xf32>
    %177 = arith.addf %175, %176 : vector<16x32xf32>
    %178 = arith.negf %177 : vector<16x32xf32>
    %179 = math.exp %178 : vector<16x32xf32>
    %cst_59 = arith.constant 1.000000e+00 : f32
    %180 = vector.broadcast %cst_59 : f32 to vector<16x32xf32>
    %181 = arith.addf %180, %179 : vector<16x32xf32>
    %182 = arith.divf %180, %181 : vector<16x32xf32>
    %183 = vector.extract_strided_slice %170 {offsets = [0, 32], sizes = [16, 32], strides = [1, 1]} : vector<16x96xf32> to vector<16x32xf32>
    %184 = vector.extract_strided_slice %174 {offsets = [0, 32], sizes = [16, 32], strides = [1, 1]} : vector<16x96xf32> to vector<16x32xf32>
    %185 = arith.addf %183, %184 : vector<16x32xf32>
    %186 = arith.negf %185 : vector<16x32xf32>
    %187 = math.exp %186 : vector<16x32xf32>
    %cst_60 = arith.constant 1.000000e+00 : f32
    %188 = vector.broadcast %cst_60 : f32 to vector<16x32xf32>
    %189 = arith.addf %188, %187 : vector<16x32xf32>
    %190 = arith.divf %188, %189 : vector<16x32xf32>
    %191 = vector.extract_strided_slice %170 {offsets = [0, 64], sizes = [16, 32], strides = [1, 1]} : vector<16x96xf32> to vector<16x32xf32>
    %192 = vector.extract_strided_slice %174 {offsets = [0, 64], sizes = [16, 32], strides = [1, 1]} : vector<16x96xf32> to vector<16x32xf32>
    %193 = arith.mulf %182, %192 : vector<16x32xf32>
    %194 = arith.addf %191, %193 : vector<16x32xf32>
    %195 = math.tanh %194 : vector<16x32xf32>
    %cst_61 = arith.constant 1.000000e+00 : f32
    %196 = vector.broadcast %cst_61 : f32 to vector<16x32xf32>
    %197 = arith.subf %196, %190 : vector<16x32xf32>
    %198 = arith.mulf %197, %195 : vector<16x32xf32>
    %199 = arith.mulf %190, %153 : vector<16x32xf32>
    %200 = arith.addf %198, %199 : vector<16x32xf32>
    %c1_i32_62 = arith.constant 1 : i32
    %201 = vector.broadcast %c1_i32_62 : i32 to vector<16x1xi32>
    %202 = arith.cmpi eq, %103, %201 : vector<16x1xi32>
    %203 = vector.shape_cast %202 : vector<16x1xi1> to vector<16x1xi1>
    %204 = vector.broadcast %203 : vector<16x1xi1> to vector<16x32xi1>
    %205 = arith.select %204, %200, %158 : vector<16x32xi1>, vector<16x32xf32>
    %206 = vector.extract_strided_slice %100 {offsets = [0, 4], sizes = [16, 2], strides = [1, 1]} : vector<16x10xf32> to vector<16x2xf32>
    %207 = vector.extract_strided_slice %206 {offsets = [0, 0], sizes = [16, 1], strides = [1, 1]} : vector<16x2xf32> to vector<16x1xf32>
    %208 = vector.broadcast %207 : vector<16x1xf32> to vector<16x96xf32>
    %209 = vector.broadcast %108 : vector<1x96xf32> to vector<16x96xf32>
    %210 = arith.mulf %208, %209 : vector<16x96xf32>
    %211 = vector.extract_strided_slice %206 {offsets = [0, 1], sizes = [16, 1], strides = [1, 1]} : vector<16x2xf32> to vector<16x1xf32>
    %212 = vector.broadcast %211 : vector<16x1xf32> to vector<16x96xf32>
    %213 = vector.broadcast %109 : vector<1x96xf32> to vector<16x96xf32>
    %214 = arith.mulf %212, %213 : vector<16x96xf32>
    %215 = arith.addf %210, %214 : vector<16x96xf32>
    %216 = vector.broadcast %106 : vector<1x96xf32> to vector<16x96xf32>
    %217 = arith.addf %215, %216 : vector<16x96xf32>
    %218 = arith.truncf %200 : vector<16x32xf32> to vector<16x32xbf16>
    %cst_63 = arith.constant dense<0.000000e+00> : vector<16x96xf32>
    %219 = tpu.matmul %218, %105, %cst_63 {dimension_numbers = #tpu.dot_dimension_numbers<[1], [0], [0], [1], [0, 0, 1, 1], [], []>} : vector<16x32xbf16>, vector<32x96xbf16>, vector<16x96xf32> -> vector<16x96xf32>
    %220 = vector.broadcast %107 : vector<1x96xf32> to vector<16x96xf32>
    %221 = arith.addf %219, %220 : vector<16x96xf32>
    %222 = vector.extract_strided_slice %217 {offsets = [0, 0], sizes = [16, 32], strides = [1, 1]} : vector<16x96xf32> to vector<16x32xf32>
    %223 = vector.extract_strided_slice %221 {offsets = [0, 0], sizes = [16, 32], strides = [1, 1]} : vector<16x96xf32> to vector<16x32xf32>
    %224 = arith.addf %222, %223 : vector<16x32xf32>
    %225 = arith.negf %224 : vector<16x32xf32>
    %226 = math.exp %225 : vector<16x32xf32>
    %cst_64 = arith.constant 1.000000e+00 : f32
    %227 = vector.broadcast %cst_64 : f32 to vector<16x32xf32>
    %228 = arith.addf %227, %226 : vector<16x32xf32>
    %229 = arith.divf %227, %228 : vector<16x32xf32>
    %230 = vector.extract_strided_slice %217 {offsets = [0, 32], sizes = [16, 32], strides = [1, 1]} : vector<16x96xf32> to vector<16x32xf32>
    %231 = vector.extract_strided_slice %221 {offsets = [0, 32], sizes = [16, 32], strides = [1, 1]} : vector<16x96xf32> to vector<16x32xf32>
    %232 = arith.addf %230, %231 : vector<16x32xf32>
    %233 = arith.negf %232 : vector<16x32xf32>
    %234 = math.exp %233 : vector<16x32xf32>
    %cst_65 = arith.constant 1.000000e+00 : f32
    %235 = vector.broadcast %cst_65 : f32 to vector<16x32xf32>
    %236 = arith.addf %235, %234 : vector<16x32xf32>
    %237 = arith.divf %235, %236 : vector<16x32xf32>
    %238 = vector.extract_strided_slice %217 {offsets = [0, 64], sizes = [16, 32], strides = [1, 1]} : vector<16x96xf32> to vector<16x32xf32>
    %239 = vector.extract_strided_slice %221 {offsets = [0, 64], sizes = [16, 32], strides = [1, 1]} : vector<16x96xf32> to vector<16x32xf32>
    %240 = arith.mulf %229, %239 : vector<16x32xf32>
    %241 = arith.addf %238, %240 : vector<16x32xf32>
    %242 = math.tanh %241 : vector<16x32xf32>
    %cst_66 = arith.constant 1.000000e+00 : f32
    %243 = vector.broadcast %cst_66 : f32 to vector<16x32xf32>
    %244 = arith.subf %243, %237 : vector<16x32xf32>
    %245 = arith.mulf %244, %242 : vector<16x32xf32>
    %246 = arith.mulf %237, %200 : vector<16x32xf32>
    %247 = arith.addf %245, %246 : vector<16x32xf32>
    %c2_i32 = arith.constant 2 : i32
    %248 = vector.broadcast %c2_i32 : i32 to vector<16x1xi32>
    %249 = arith.cmpi eq, %103, %248 : vector<16x1xi32>
    %250 = vector.shape_cast %249 : vector<16x1xi1> to vector<16x1xi1>
    %251 = vector.broadcast %250 : vector<16x1xi1> to vector<16x32xi1>
    %252 = arith.select %251, %247, %205 : vector<16x32xi1>, vector<16x32xf32>
    %253 = vector.extract_strided_slice %100 {offsets = [0, 6], sizes = [16, 2], strides = [1, 1]} : vector<16x10xf32> to vector<16x2xf32>
    %254 = vector.extract_strided_slice %253 {offsets = [0, 0], sizes = [16, 1], strides = [1, 1]} : vector<16x2xf32> to vector<16x1xf32>
    %255 = vector.broadcast %254 : vector<16x1xf32> to vector<16x96xf32>
    %256 = vector.broadcast %108 : vector<1x96xf32> to vector<16x96xf32>
    %257 = arith.mulf %255, %256 : vector<16x96xf32>
    %258 = vector.extract_strided_slice %253 {offsets = [0, 1], sizes = [16, 1], strides = [1, 1]} : vector<16x2xf32> to vector<16x1xf32>
    %259 = vector.broadcast %258 : vector<16x1xf32> to vector<16x96xf32>
    %260 = vector.broadcast %109 : vector<1x96xf32> to vector<16x96xf32>
    %261 = arith.mulf %259, %260 : vector<16x96xf32>
    %262 = arith.addf %257, %261 : vector<16x96xf32>
    %263 = vector.broadcast %106 : vector<1x96xf32> to vector<16x96xf32>
    %264 = arith.addf %262, %263 : vector<16x96xf32>
    %265 = arith.truncf %247 : vector<16x32xf32> to vector<16x32xbf16>
    %cst_67 = arith.constant dense<0.000000e+00> : vector<16x96xf32>
    %266 = tpu.matmul %265, %105, %cst_67 {dimension_numbers = #tpu.dot_dimension_numbers<[1], [0], [0], [1], [0, 0, 1, 1], [], []>} : vector<16x32xbf16>, vector<32x96xbf16>, vector<16x96xf32> -> vector<16x96xf32>
    %267 = vector.broadcast %107 : vector<1x96xf32> to vector<16x96xf32>
    %268 = arith.addf %266, %267 : vector<16x96xf32>
    %269 = vector.extract_strided_slice %264 {offsets = [0, 0], sizes = [16, 32], strides = [1, 1]} : vector<16x96xf32> to vector<16x32xf32>
    %270 = vector.extract_strided_slice %268 {offsets = [0, 0], sizes = [16, 32], strides = [1, 1]} : vector<16x96xf32> to vector<16x32xf32>
    %271 = arith.addf %269, %270 : vector<16x32xf32>
    %272 = arith.negf %271 : vector<16x32xf32>
    %273 = math.exp %272 : vector<16x32xf32>
    %cst_68 = arith.constant 1.000000e+00 : f32
    %274 = vector.broadcast %cst_68 : f32 to vector<16x32xf32>
    %275 = arith.addf %274, %273 : vector<16x32xf32>
    %276 = arith.divf %274, %275 : vector<16x32xf32>
    %277 = vector.extract_strided_slice %264 {offsets = [0, 32], sizes = [16, 32], strides = [1, 1]} : vector<16x96xf32> to vector<16x32xf32>
    %278 = vector.extract_strided_slice %268 {offsets = [0, 32], sizes = [16, 32], strides = [1, 1]} : vector<16x96xf32> to vector<16x32xf32>
    %279 = arith.addf %277, %278 : vector<16x32xf32>
    %280 = arith.negf %279 : vector<16x32xf32>
    %281 = math.exp %280 : vector<16x32xf32>
    %cst_69 = arith.constant 1.000000e+00 : f32
    %282 = vector.broadcast %cst_69 : f32 to vector<16x32xf32>
    %283 = arith.addf %282, %281 : vector<16x32xf32>
    %284 = arith.divf %282, %283 : vector<16x32xf32>
    %285 = vector.extract_strided_slice %264 {offsets = [0, 64], sizes = [16, 32], strides = [1, 1]} : vector<16x96xf32> to vector<16x32xf32>
    %286 = vector.extract_strided_slice %268 {offsets = [0, 64], sizes = [16, 32], strides = [1, 1]} : vector<16x96xf32> to vector<16x32xf32>
    %287 = arith.mulf %276, %286 : vector<16x32xf32>
    %288 = arith.addf %285, %287 : vector<16x32xf32>
    %289 = math.tanh %288 : vector<16x32xf32>
    %cst_70 = arith.constant 1.000000e+00 : f32
    %290 = vector.broadcast %cst_70 : f32 to vector<16x32xf32>
    %291 = arith.subf %290, %284 : vector<16x32xf32>
    %292 = arith.mulf %291, %289 : vector<16x32xf32>
    %293 = arith.mulf %284, %247 : vector<16x32xf32>
    %294 = arith.addf %292, %293 : vector<16x32xf32>
    %c3_i32 = arith.constant 3 : i32
    %295 = vector.broadcast %c3_i32 : i32 to vector<16x1xi32>
    %296 = arith.cmpi eq, %103, %295 : vector<16x1xi32>
    %297 = vector.shape_cast %296 : vector<16x1xi1> to vector<16x1xi1>
    %298 = vector.broadcast %297 : vector<16x1xi1> to vector<16x32xi1>
    %299 = arith.select %298, %294, %252 : vector<16x32xi1>, vector<16x32xf32>
    %300 = vector.extract_strided_slice %100 {offsets = [0, 8], sizes = [16, 2], strides = [1, 1]} : vector<16x10xf32> to vector<16x2xf32>
    %301 = vector.extract_strided_slice %300 {offsets = [0, 0], sizes = [16, 1], strides = [1, 1]} : vector<16x2xf32> to vector<16x1xf32>
    %302 = vector.broadcast %301 : vector<16x1xf32> to vector<16x96xf32>
    %303 = vector.broadcast %108 : vector<1x96xf32> to vector<16x96xf32>
    %304 = arith.mulf %302, %303 : vector<16x96xf32>
    %305 = vector.extract_strided_slice %300 {offsets = [0, 1], sizes = [16, 1], strides = [1, 1]} : vector<16x2xf32> to vector<16x1xf32>
    %306 = vector.broadcast %305 : vector<16x1xf32> to vector<16x96xf32>
    %307 = vector.broadcast %109 : vector<1x96xf32> to vector<16x96xf32>
    %308 = arith.mulf %306, %307 : vector<16x96xf32>
    %309 = arith.addf %304, %308 : vector<16x96xf32>
    %310 = vector.broadcast %106 : vector<1x96xf32> to vector<16x96xf32>
    %311 = arith.addf %309, %310 : vector<16x96xf32>
    %312 = arith.truncf %294 : vector<16x32xf32> to vector<16x32xbf16>
    %cst_71 = arith.constant dense<0.000000e+00> : vector<16x96xf32>
    %313 = tpu.matmul %312, %105, %cst_71 {dimension_numbers = #tpu.dot_dimension_numbers<[1], [0], [0], [1], [0, 0, 1, 1], [], []>} : vector<16x32xbf16>, vector<32x96xbf16>, vector<16x96xf32> -> vector<16x96xf32>
    %314 = vector.broadcast %107 : vector<1x96xf32> to vector<16x96xf32>
    %315 = arith.addf %313, %314 : vector<16x96xf32>
    %316 = vector.extract_strided_slice %311 {offsets = [0, 0], sizes = [16, 32], strides = [1, 1]} : vector<16x96xf32> to vector<16x32xf32>
    %317 = vector.extract_strided_slice %315 {offsets = [0, 0], sizes = [16, 32], strides = [1, 1]} : vector<16x96xf32> to vector<16x32xf32>
    %318 = arith.addf %316, %317 : vector<16x32xf32>
    %319 = arith.negf %318 : vector<16x32xf32>
    %320 = math.exp %319 : vector<16x32xf32>
    %cst_72 = arith.constant 1.000000e+00 : f32
    %321 = vector.broadcast %cst_72 : f32 to vector<16x32xf32>
    %322 = arith.addf %321, %320 : vector<16x32xf32>
    %323 = arith.divf %321, %322 : vector<16x32xf32>
    %324 = vector.extract_strided_slice %311 {offsets = [0, 32], sizes = [16, 32], strides = [1, 1]} : vector<16x96xf32> to vector<16x32xf32>
    %325 = vector.extract_strided_slice %315 {offsets = [0, 32], sizes = [16, 32], strides = [1, 1]} : vector<16x96xf32> to vector<16x32xf32>
    %326 = arith.addf %324, %325 : vector<16x32xf32>
    %327 = arith.negf %326 : vector<16x32xf32>
    %328 = math.exp %327 : vector<16x32xf32>
    %cst_73 = arith.constant 1.000000e+00 : f32
    %329 = vector.broadcast %cst_73 : f32 to vector<16x32xf32>
    %330 = arith.addf %329, %328 : vector<16x32xf32>
    %331 = arith.divf %329, %330 : vector<16x32xf32>
    %332 = vector.extract_strided_slice %311 {offsets = [0, 64], sizes = [16, 32], strides = [1, 1]} : vector<16x96xf32> to vector<16x32xf32>
    %333 = vector.extract_strided_slice %315 {offsets = [0, 64], sizes = [16, 32], strides = [1, 1]} : vector<16x96xf32> to vector<16x32xf32>
    %334 = arith.mulf %323, %333 : vector<16x32xf32>
    %335 = arith.addf %332, %334 : vector<16x32xf32>
    %336 = math.tanh %335 : vector<16x32xf32>
    %cst_74 = arith.constant 1.000000e+00 : f32
    %337 = vector.broadcast %cst_74 : f32 to vector<16x32xf32>
    %338 = arith.subf %337, %331 : vector<16x32xf32>
    %339 = arith.mulf %338, %336 : vector<16x32xf32>
    %340 = arith.mulf %331, %294 : vector<16x32xf32>
    %341 = arith.addf %339, %340 : vector<16x32xf32>
    %c4_i32 = arith.constant 4 : i32
    %342 = vector.broadcast %c4_i32 : i32 to vector<16x1xi32>
    %343 = arith.cmpi eq, %103, %342 : vector<16x1xi32>
    %c0_i32_75 = arith.constant 0 : i32
    %344 = vector.broadcast %c0_i32_75 : i32 to vector<16x1xi32>
    %345 = arith.cmpi slt, %103, %344 : vector<16x1xi32>
    %346 = arith.ori %343, %345 : vector<16x1xi1>
    %347 = vector.shape_cast %346 : vector<16x1xi1> to vector<16x1xi1>
    %348 = vector.broadcast %347 : vector<16x1xi1> to vector<16x32xi1>
    %349 = arith.select %348, %341, %299 : vector<16x32xi1>, vector<16x32xf32>
    %c1_76 = arith.constant 1 : index
    %c0_77 = arith.constant 0 : index
    %c0_78 = arith.constant 0 : index
    %350 = vector.load %arg6[%c1_76, %c0_77, %c0_78] : memref<2x32x96xbf16, #tpu.memory_space<vmem>>, vector<1x32x96xbf16>
    %351 = vector.shape_cast %350 : vector<1x32x96xbf16> to vector<32x96xbf16>
    %352 = arith.truncf %349 : vector<16x32xf32> to vector<16x32xbf16>
    %cst_79 = arith.constant dense<0.000000e+00> : vector<16x96xf32>
    %353 = tpu.matmul %352, %351, %cst_79 {dimension_numbers = #tpu.dot_dimension_numbers<[1], [0], [0], [1], [0, 0, 1, 1], [], []>} : vector<16x32xbf16>, vector<32x96xbf16>, vector<16x96xf32> -> vector<16x96xf32>
    %c4 = arith.constant 4 : index
    %c0_80 = arith.constant 0 : index
    %354 = vector.load %arg7[%c4, %c0_80] : memref<5x96xf32, #tpu.memory_space<vmem>>, vector<1x96xf32>
    %355 = vector.broadcast %354 : vector<1x96xf32> to vector<16x96xf32>
    %356 = arith.addf %353, %355 : vector<16x96xf32>
    %357 = tpu.iota {dimensions = array<i32: 0>} : vector<16x16xi32>
    %358 = tpu.iota {dimensions = array<i32: 1>} : vector<16x16xi32>
    %c3_i32_81 = arith.constant 3 : i32
    %359 = vector.broadcast %c3_i32_81 : i32 to vector<16x16xi32>
    %360 = arith.shrsi %358, %359 : vector<16x16xi32>
    %c7_i32 = arith.constant 7 : i32
    %361 = vector.broadcast %c7_i32 : i32 to vector<16x16xi32>
    %362 = arith.andi %358, %361 : vector<16x16xi32>
    %c3_i32_82 = arith.constant 3 : i32
    %363 = vector.broadcast %c3_i32_82 : i32 to vector<16x16xi32>
    %364 = arith.shrsi %357, %363 : vector<16x16xi32>
    %365 = arith.cmpi eq, %364, %360 : vector<16x16xi32>
    %c0_i32_83 = arith.constant 0 : i32
    %366 = vector.broadcast %c0_i32_83 : i32 to vector<16x16xi32>
    %367 = arith.cmpi eq, %360, %366 : vector<16x16xi32>
    %368 = vector.broadcast %0 : i32 to vector<16x16xi32>
    %369 = vector.broadcast %1 : i32 to vector<16x16xi32>
    %370 = arith.select %367, %368, %369 : vector<16x16xi1>, vector<16x16xi32>
    %371 = arith.cmpi slt, %362, %370 : vector<16x16xi32>
    %372 = arith.andi %365, %371 : vector<16x16xi1>
    %373 = vector.extract_strided_slice %356 {offsets = [0, 0], sizes = [16, 16], strides = [1, 1]} : vector<16x96xf32> to vector<16x16xf32>
    %cst_84 = arith.constant 2.500000e-01 : f32
    %374 = vector.broadcast %cst_84 : f32 to vector<16x16xf32>
    %375 = arith.mulf %373, %374 : vector<16x16xf32>
    %376 = vector.extract_strided_slice %356 {offsets = [0, 32], sizes = [16, 16], strides = [1, 1]} : vector<16x96xf32> to vector<16x16xf32>
    %377 = vector.extract_strided_slice %356 {offsets = [0, 64], sizes = [16, 16], strides = [1, 1]} : vector<16x96xf32> to vector<16x16xf32>
    %378 = arith.truncf %375 : vector<16x16xf32> to vector<16x16xbf16>
    %379 = arith.truncf %376 : vector<16x16xf32> to vector<16x16xbf16>
    %cst_85 = arith.constant dense<0.000000e+00> : vector<16x16xf32>
    %380 = tpu.matmul %378, %379, %cst_85 {dimension_numbers = #tpu.dot_dimension_numbers<[1], [1], [0], [0], [0, 0, 1, 0], [], []>} : vector<16x16xbf16>, vector<16x16xbf16>, vector<16x16xf32> -> vector<16x16xf32>
    %cst_86 = arith.constant -1.000000e+09 : f32
    %381 = vector.broadcast %cst_86 : f32 to vector<16x16xf32>
    %382 = arith.select %372, %380, %381 : vector<16x16xi1>, vector<16x16xf32>
    %cst_87 = arith.constant dense<0xFF800000> : vector<16xf32>
    %383 = vector.multi_reduction <maximumf>, %382, %cst_87 [1] : vector<16x16xf32> to vector<16xf32>
    %384 = vector.shape_cast %383 : vector<16xf32> to vector<16x1xf32>
    %385 = vector.broadcast %384 : vector<16x1xf32> to vector<16x16xf32>
    %386 = arith.subf %382, %385 : vector<16x16xf32>
    %387 = math.exp %386 : vector<16x16xf32>
    %cst_88 = arith.constant dense<0.000000e+00> : vector<16xf32>
    %388 = vector.multi_reduction <add>, %387, %cst_88 [1] : vector<16x16xf32> to vector<16xf32>
    %389 = vector.shape_cast %388 : vector<16xf32> to vector<16x1xf32>
    %390 = vector.broadcast %389 : vector<16x1xf32> to vector<16x16xf32>
    %391 = arith.divf %387, %390 : vector<16x16xf32>
    %392 = arith.truncf %391 : vector<16x16xf32> to vector<16x16xbf16>
    %393 = arith.truncf %377 : vector<16x16xf32> to vector<16x16xbf16>
    %cst_89 = arith.constant dense<0.000000e+00> : vector<16x16xf32>
    %394 = tpu.matmul %392, %393, %cst_89 {dimension_numbers = #tpu.dot_dimension_numbers<[1], [0], [0], [1], [0, 0, 1, 1], [], []>} : vector<16x16xbf16>, vector<16x16xbf16>, vector<16x16xf32> -> vector<16x16xf32>
    %c3_90 = arith.constant 3 : index
    %c0_91 = arith.constant 0 : index
    %c0_92 = arith.constant 0 : index
    %395 = vector.load %arg4[%c3_90, %c0_91, %c0_92] : memref<25x32x32xbf16, #tpu.memory_space<vmem>>, vector<1x16x32xbf16>
    %396 = vector.shape_cast %395 : vector<1x16x32xbf16> to vector<16x32xbf16>
    %397 = arith.truncf %394 : vector<16x16xf32> to vector<16x16xbf16>
    %cst_93 = arith.constant dense<0.000000e+00> : vector<16x32xf32>
    %398 = tpu.matmul %397, %396, %cst_93 {dimension_numbers = #tpu.dot_dimension_numbers<[1], [0], [0], [1], [0, 0, 1, 1], [], []>} : vector<16x16xbf16>, vector<16x32xbf16>, vector<16x32xf32> -> vector<16x32xf32>
    %399 = vector.extract_strided_slice %356 {offsets = [0, 16], sizes = [16, 16], strides = [1, 1]} : vector<16x96xf32> to vector<16x16xf32>
    %cst_94 = arith.constant 2.500000e-01 : f32
    %400 = vector.broadcast %cst_94 : f32 to vector<16x16xf32>
    %401 = arith.mulf %399, %400 : vector<16x16xf32>
    %402 = vector.extract_strided_slice %356 {offsets = [0, 48], sizes = [16, 16], strides = [1, 1]} : vector<16x96xf32> to vector<16x16xf32>
    %403 = vector.extract_strided_slice %356 {offsets = [0, 80], sizes = [16, 16], strides = [1, 1]} : vector<16x96xf32> to vector<16x16xf32>
    %404 = arith.truncf %401 : vector<16x16xf32> to vector<16x16xbf16>
    %405 = arith.truncf %402 : vector<16x16xf32> to vector<16x16xbf16>
    %cst_95 = arith.constant dense<0.000000e+00> : vector<16x16xf32>
    %406 = tpu.matmul %404, %405, %cst_95 {dimension_numbers = #tpu.dot_dimension_numbers<[1], [1], [0], [0], [0, 0, 1, 0], [], []>} : vector<16x16xbf16>, vector<16x16xbf16>, vector<16x16xf32> -> vector<16x16xf32>
    %cst_96 = arith.constant -1.000000e+09 : f32
    %407 = vector.broadcast %cst_96 : f32 to vector<16x16xf32>
    %408 = arith.select %372, %406, %407 : vector<16x16xi1>, vector<16x16xf32>
    %cst_97 = arith.constant dense<0xFF800000> : vector<16xf32>
    %409 = vector.multi_reduction <maximumf>, %408, %cst_97 [1] : vector<16x16xf32> to vector<16xf32>
    %410 = vector.shape_cast %409 : vector<16xf32> to vector<16x1xf32>
    %411 = vector.broadcast %410 : vector<16x1xf32> to vector<16x16xf32>
    %412 = arith.subf %408, %411 : vector<16x16xf32>
    %413 = math.exp %412 : vector<16x16xf32>
    %cst_98 = arith.constant dense<0.000000e+00> : vector<16xf32>
    %414 = vector.multi_reduction <add>, %413, %cst_98 [1] : vector<16x16xf32> to vector<16xf32>
    %415 = vector.shape_cast %414 : vector<16xf32> to vector<16x1xf32>
    %416 = vector.broadcast %415 : vector<16x1xf32> to vector<16x16xf32>
    %417 = arith.divf %413, %416 : vector<16x16xf32>
    %418 = arith.truncf %417 : vector<16x16xf32> to vector<16x16xbf16>
    %419 = arith.truncf %403 : vector<16x16xf32> to vector<16x16xbf16>
    %cst_99 = arith.constant dense<0.000000e+00> : vector<16x16xf32>
    %420 = tpu.matmul %418, %419, %cst_99 {dimension_numbers = #tpu.dot_dimension_numbers<[1], [0], [0], [1], [0, 0, 1, 1], [], []>} : vector<16x16xbf16>, vector<16x16xbf16>, vector<16x16xf32> -> vector<16x16xf32>
    %c3_100 = arith.constant 3 : index
    %c16 = arith.constant 16 : index
    %c0_101 = arith.constant 0 : index
    %421 = vector.load %arg4[%c3_100, %c16, %c0_101] : memref<25x32x32xbf16, #tpu.memory_space<vmem>>, vector<1x16x32xbf16>
    %422 = vector.shape_cast %421 : vector<1x16x32xbf16> to vector<16x32xbf16>
    %423 = arith.truncf %420 : vector<16x16xf32> to vector<16x16xbf16>
    %cst_102 = arith.constant dense<0.000000e+00> : vector<16x32xf32>
    %424 = tpu.matmul %423, %422, %cst_102 {dimension_numbers = #tpu.dot_dimension_numbers<[1], [0], [0], [1], [0, 0, 1, 1], [], []>} : vector<16x16xbf16>, vector<16x32xbf16>, vector<16x32xf32> -> vector<16x32xf32>
    %425 = arith.addf %398, %424 : vector<16x32xf32>
    %c3_103 = arith.constant 3 : index
    %c0_104 = arith.constant 0 : index
    %c0_105 = arith.constant 0 : index
    %426 = vector.load %arg5[%c3_103, %c0_104, %c0_105] : memref<25x3x32xf32, #tpu.memory_space<vmem>>, vector<1x1x32xf32>
    %427 = vector.shape_cast %426 : vector<1x1x32xf32> to vector<1x32xf32>
    %428 = vector.broadcast %427 : vector<1x32xf32> to vector<16x32xf32>
    %429 = arith.addf %425, %428 : vector<16x32xf32>
    %c4_106 = arith.constant 4 : index
    %c0_107 = arith.constant 0 : index
    %c0_108 = arith.constant 0 : index
    %430 = vector.load %arg4[%c4_106, %c0_107, %c0_108] : memref<25x32x32xbf16, #tpu.memory_space<vmem>>, vector<1x32x32xbf16>
    %431 = vector.shape_cast %430 : vector<1x32x32xbf16> to vector<32x32xbf16>
    %c4_109 = arith.constant 4 : index
    %c0_110 = arith.constant 0 : index
    %c0_111 = arith.constant 0 : index
    %432 = vector.load %arg5[%c4_109, %c0_110, %c0_111] : memref<25x3x32xf32, #tpu.memory_space<vmem>>, vector<1x3x32xf32>
    %433 = vector.shape_cast %432 : vector<1x3x32xf32> to vector<3x32xf32>
    %434 = arith.truncf %429 : vector<16x32xf32> to vector<16x32xbf16>
    %cst_112 = arith.constant dense<0.000000e+00> : vector<16x32xf32>
    %435 = tpu.matmul %434, %431, %cst_112 {dimension_numbers = #tpu.dot_dimension_numbers<[1], [0], [0], [1], [0, 0, 1, 1], [], []>} : vector<16x32xbf16>, vector<32x32xbf16>, vector<16x32xf32> -> vector<16x32xf32>
    %436 = vector.extract_strided_slice %433 {offsets = [0, 0], sizes = [1, 32], strides = [1, 1]} : vector<3x32xf32> to vector<1x32xf32>
    %437 = vector.broadcast %436 : vector<1x32xf32> to vector<16x32xf32>
    %438 = arith.addf %435, %437 : vector<16x32xf32>
    %cst_113 = arith.constant dense<0.000000e+00> : vector<16xf32>
    %439 = vector.multi_reduction <add>, %438, %cst_113 [1] : vector<16x32xf32> to vector<16xf32>
    %440 = vector.shape_cast %439 : vector<16xf32> to vector<16x1xf32>
    %cst_114 = arith.constant 3.200000e+01 : f32
    %441 = vector.broadcast %cst_114 : f32 to vector<16x1xf32>
    %442 = arith.divf %440, %441 : vector<16x1xf32>
    %443 = vector.broadcast %442 : vector<16x1xf32> to vector<16x32xf32>
    %444 = arith.subf %438, %443 : vector<16x32xf32>
    %445 = arith.mulf %444, %444 : vector<16x32xf32>
    %cst_115 = arith.constant dense<0.000000e+00> : vector<16xf32>
    %446 = vector.multi_reduction <add>, %445, %cst_115 [1] : vector<16x32xf32> to vector<16xf32>
    %447 = vector.shape_cast %446 : vector<16xf32> to vector<16x1xf32>
    %cst_116 = arith.constant 3.200000e+01 : f32
    %448 = vector.broadcast %cst_116 : f32 to vector<16x1xf32>
    %449 = arith.divf %447, %448 : vector<16x1xf32>
    %cst_117 = arith.constant 9.99999974E-6 : f32
    %450 = vector.broadcast %cst_117 : f32 to vector<16x1xf32>
    %451 = arith.addf %449, %450 : vector<16x1xf32>
    %452 = math.rsqrt %451 : vector<16x1xf32>
    %453 = vector.broadcast %452 : vector<16x1xf32> to vector<16x32xf32>
    %454 = arith.mulf %444, %453 : vector<16x32xf32>
    %455 = vector.extract_strided_slice %433 {offsets = [1, 0], sizes = [1, 32], strides = [1, 1]} : vector<3x32xf32> to vector<1x32xf32>
    %456 = vector.broadcast %455 : vector<1x32xf32> to vector<16x32xf32>
    %457 = arith.mulf %454, %456 : vector<16x32xf32>
    %458 = vector.extract_strided_slice %433 {offsets = [2, 0], sizes = [1, 32], strides = [1, 1]} : vector<3x32xf32> to vector<1x32xf32>
    %459 = vector.broadcast %458 : vector<1x32xf32> to vector<16x32xf32>
    %460 = arith.addf %457, %459 : vector<16x32xf32>
    %cst_118 = arith.constant 0.000000e+00 : f32
    %461 = vector.broadcast %cst_118 : f32 to vector<16x32xf32>
    %462 = arith.maximumf %460, %461 : vector<16x32xf32>
    %c5 = arith.constant 5 : index
    %c0_119 = arith.constant 0 : index
    %c0_120 = arith.constant 0 : index
    %463 = vector.load %arg4[%c5, %c0_119, %c0_120] : memref<25x32x32xbf16, #tpu.memory_space<vmem>>, vector<1x32x32xbf16>
    %464 = vector.shape_cast %463 : vector<1x32x32xbf16> to vector<32x32xbf16>
    %c5_121 = arith.constant 5 : index
    %c0_122 = arith.constant 0 : index
    %c0_123 = arith.constant 0 : index
    %465 = vector.load %arg5[%c5_121, %c0_122, %c0_123] : memref<25x3x32xf32, #tpu.memory_space<vmem>>, vector<1x3x32xf32>
    %466 = vector.shape_cast %465 : vector<1x3x32xf32> to vector<3x32xf32>
    %467 = arith.truncf %462 : vector<16x32xf32> to vector<16x32xbf16>
    %cst_124 = arith.constant dense<0.000000e+00> : vector<16x32xf32>
    %468 = tpu.matmul %467, %464, %cst_124 {dimension_numbers = #tpu.dot_dimension_numbers<[1], [0], [0], [1], [0, 0, 1, 1], [], []>} : vector<16x32xbf16>, vector<32x32xbf16>, vector<16x32xf32> -> vector<16x32xf32>
    %469 = vector.extract_strided_slice %466 {offsets = [0, 0], sizes = [1, 32], strides = [1, 1]} : vector<3x32xf32> to vector<1x32xf32>
    %470 = vector.broadcast %469 : vector<1x32xf32> to vector<16x32xf32>
    %471 = arith.addf %468, %470 : vector<16x32xf32>
    %cst_125 = arith.constant dense<0.000000e+00> : vector<16xf32>
    %472 = vector.multi_reduction <add>, %471, %cst_125 [1] : vector<16x32xf32> to vector<16xf32>
    %473 = vector.shape_cast %472 : vector<16xf32> to vector<16x1xf32>
    %cst_126 = arith.constant 3.200000e+01 : f32
    %474 = vector.broadcast %cst_126 : f32 to vector<16x1xf32>
    %475 = arith.divf %473, %474 : vector<16x1xf32>
    %476 = vector.broadcast %475 : vector<16x1xf32> to vector<16x32xf32>
    %477 = arith.subf %471, %476 : vector<16x32xf32>
    %478 = arith.mulf %477, %477 : vector<16x32xf32>
    %cst_127 = arith.constant dense<0.000000e+00> : vector<16xf32>
    %479 = vector.multi_reduction <add>, %478, %cst_127 [1] : vector<16x32xf32> to vector<16xf32>
    %480 = vector.shape_cast %479 : vector<16xf32> to vector<16x1xf32>
    %cst_128 = arith.constant 3.200000e+01 : f32
    %481 = vector.broadcast %cst_128 : f32 to vector<16x1xf32>
    %482 = arith.divf %480, %481 : vector<16x1xf32>
    %cst_129 = arith.constant 9.99999974E-6 : f32
    %483 = vector.broadcast %cst_129 : f32 to vector<16x1xf32>
    %484 = arith.addf %482, %483 : vector<16x1xf32>
    %485 = math.rsqrt %484 : vector<16x1xf32>
    %486 = vector.broadcast %485 : vector<16x1xf32> to vector<16x32xf32>
    %487 = arith.mulf %477, %486 : vector<16x32xf32>
    %488 = vector.extract_strided_slice %466 {offsets = [1, 0], sizes = [1, 32], strides = [1, 1]} : vector<3x32xf32> to vector<1x32xf32>
    %489 = vector.broadcast %488 : vector<1x32xf32> to vector<16x32xf32>
    %490 = arith.mulf %487, %489 : vector<16x32xf32>
    %491 = vector.extract_strided_slice %466 {offsets = [2, 0], sizes = [1, 32], strides = [1, 1]} : vector<3x32xf32> to vector<1x32xf32>
    %492 = vector.broadcast %491 : vector<1x32xf32> to vector<16x32xf32>
    %493 = arith.addf %490, %492 : vector<16x32xf32>
    %cst_130 = arith.constant 0.000000e+00 : f32
    %494 = vector.broadcast %cst_130 : f32 to vector<16x32xf32>
    %495 = arith.maximumf %493, %494 : vector<16x32xf32>
    %c6 = arith.constant 6 : index
    %c0_131 = arith.constant 0 : index
    %c0_132 = arith.constant 0 : index
    %496 = vector.load %arg4[%c6, %c0_131, %c0_132] : memref<25x32x32xbf16, #tpu.memory_space<vmem>>, vector<1x32x32xbf16>
    %497 = vector.shape_cast %496 : vector<1x32x32xbf16> to vector<32x32xbf16>
    %c6_133 = arith.constant 6 : index
    %c0_134 = arith.constant 0 : index
    %c0_135 = arith.constant 0 : index
    %498 = vector.load %arg5[%c6_133, %c0_134, %c0_135] : memref<25x3x32xf32, #tpu.memory_space<vmem>>, vector<1x3x32xf32>
    %499 = vector.shape_cast %498 : vector<1x3x32xf32> to vector<3x32xf32>
    %500 = arith.truncf %495 : vector<16x32xf32> to vector<16x32xbf16>
    %cst_136 = arith.constant dense<0.000000e+00> : vector<16x32xf32>
    %501 = tpu.matmul %500, %497, %cst_136 {dimension_numbers = #tpu.dot_dimension_numbers<[1], [0], [0], [1], [0, 0, 1, 1], [], []>} : vector<16x32xbf16>, vector<32x32xbf16>, vector<16x32xf32> -> vector<16x32xf32>
    %502 = vector.extract_strided_slice %499 {offsets = [0, 0], sizes = [1, 32], strides = [1, 1]} : vector<3x32xf32> to vector<1x32xf32>
    %503 = vector.broadcast %502 : vector<1x32xf32> to vector<16x32xf32>
    %504 = arith.addf %501, %503 : vector<16x32xf32>
    %cst_137 = arith.constant dense<0.000000e+00> : vector<16xf32>
    %505 = vector.multi_reduction <add>, %504, %cst_137 [1] : vector<16x32xf32> to vector<16xf32>
    %506 = vector.shape_cast %505 : vector<16xf32> to vector<16x1xf32>
    %cst_138 = arith.constant 3.200000e+01 : f32
    %507 = vector.broadcast %cst_138 : f32 to vector<16x1xf32>
    %508 = arith.divf %506, %507 : vector<16x1xf32>
    %509 = vector.broadcast %508 : vector<16x1xf32> to vector<16x32xf32>
    %510 = arith.subf %504, %509 : vector<16x32xf32>
    %511 = arith.mulf %510, %510 : vector<16x32xf32>
    %cst_139 = arith.constant dense<0.000000e+00> : vector<16xf32>
    %512 = vector.multi_reduction <add>, %511, %cst_139 [1] : vector<16x32xf32> to vector<16xf32>
    %513 = vector.shape_cast %512 : vector<16xf32> to vector<16x1xf32>
    %cst_140 = arith.constant 3.200000e+01 : f32
    %514 = vector.broadcast %cst_140 : f32 to vector<16x1xf32>
    %515 = arith.divf %513, %514 : vector<16x1xf32>
    %cst_141 = arith.constant 9.99999974E-6 : f32
    %516 = vector.broadcast %cst_141 : f32 to vector<16x1xf32>
    %517 = arith.addf %515, %516 : vector<16x1xf32>
    %518 = math.rsqrt %517 : vector<16x1xf32>
    %519 = vector.broadcast %518 : vector<16x1xf32> to vector<16x32xf32>
    %520 = arith.mulf %510, %519 : vector<16x32xf32>
    %521 = vector.extract_strided_slice %499 {offsets = [1, 0], sizes = [1, 32], strides = [1, 1]} : vector<3x32xf32> to vector<1x32xf32>
    %522 = vector.broadcast %521 : vector<1x32xf32> to vector<16x32xf32>
    %523 = arith.mulf %520, %522 : vector<16x32xf32>
    %524 = vector.extract_strided_slice %499 {offsets = [2, 0], sizes = [1, 32], strides = [1, 1]} : vector<3x32xf32> to vector<1x32xf32>
    %525 = vector.broadcast %524 : vector<1x32xf32> to vector<16x32xf32>
    %526 = arith.addf %523, %525 : vector<16x32xf32>
    %cst_142 = arith.constant 0.000000e+00 : f32
    %527 = vector.broadcast %cst_142 : f32 to vector<16x32xf32>
    %528 = arith.maximumf %526, %527 : vector<16x32xf32>
    %c7 = arith.constant 7 : index
    %c0_143 = arith.constant 0 : index
    %c0_144 = arith.constant 0 : index
    %529 = vector.load %arg4[%c7, %c0_143, %c0_144] : memref<25x32x32xbf16, #tpu.memory_space<vmem>>, vector<1x32x32xbf16>
    %530 = vector.shape_cast %529 : vector<1x32x32xbf16> to vector<32x32xbf16>
    %c7_145 = arith.constant 7 : index
    %c0_146 = arith.constant 0 : index
    %c0_147 = arith.constant 0 : index
    %531 = vector.load %arg5[%c7_145, %c0_146, %c0_147] : memref<25x3x32xf32, #tpu.memory_space<vmem>>, vector<1x3x32xf32>
    %532 = vector.shape_cast %531 : vector<1x3x32xf32> to vector<3x32xf32>
    %533 = arith.truncf %528 : vector<16x32xf32> to vector<16x32xbf16>
    %cst_148 = arith.constant dense<0.000000e+00> : vector<16x32xf32>
    %534 = tpu.matmul %533, %530, %cst_148 {dimension_numbers = #tpu.dot_dimension_numbers<[1], [0], [0], [1], [0, 0, 1, 1], [], []>} : vector<16x32xbf16>, vector<32x32xbf16>, vector<16x32xf32> -> vector<16x32xf32>
    %535 = vector.extract_strided_slice %532 {offsets = [0, 0], sizes = [1, 32], strides = [1, 1]} : vector<3x32xf32> to vector<1x32xf32>
    %536 = vector.broadcast %535 : vector<1x32xf32> to vector<16x32xf32>
    %537 = arith.addf %534, %536 : vector<16x32xf32>
    %cst_149 = arith.constant dense<0.000000e+00> : vector<16xf32>
    %538 = vector.multi_reduction <add>, %537, %cst_149 [1] : vector<16x32xf32> to vector<16xf32>
    %539 = vector.shape_cast %538 : vector<16xf32> to vector<16x1xf32>
    %cst_150 = arith.constant 3.200000e+01 : f32
    %540 = vector.broadcast %cst_150 : f32 to vector<16x1xf32>
    %541 = arith.divf %539, %540 : vector<16x1xf32>
    %542 = vector.broadcast %541 : vector<16x1xf32> to vector<16x32xf32>
    %543 = arith.subf %537, %542 : vector<16x32xf32>
    %544 = arith.mulf %543, %543 : vector<16x32xf32>
    %cst_151 = arith.constant dense<0.000000e+00> : vector<16xf32>
    %545 = vector.multi_reduction <add>, %544, %cst_151 [1] : vector<16x32xf32> to vector<16xf32>
    %546 = vector.shape_cast %545 : vector<16xf32> to vector<16x1xf32>
    %cst_152 = arith.constant 3.200000e+01 : f32
    %547 = vector.broadcast %cst_152 : f32 to vector<16x1xf32>
    %548 = arith.divf %546, %547 : vector<16x1xf32>
    %cst_153 = arith.constant 9.99999974E-6 : f32
    %549 = vector.broadcast %cst_153 : f32 to vector<16x1xf32>
    %550 = arith.addf %548, %549 : vector<16x1xf32>
    %551 = math.rsqrt %550 : vector<16x1xf32>
    %552 = vector.broadcast %551 : vector<16x1xf32> to vector<16x32xf32>
    %553 = arith.mulf %543, %552 : vector<16x32xf32>
    %554 = vector.extract_strided_slice %532 {offsets = [1, 0], sizes = [1, 32], strides = [1, 1]} : vector<3x32xf32> to vector<1x32xf32>
    %555 = vector.broadcast %554 : vector<1x32xf32> to vector<16x32xf32>
    %556 = arith.mulf %553, %555 : vector<16x32xf32>
    %557 = vector.extract_strided_slice %532 {offsets = [2, 0], sizes = [1, 32], strides = [1, 1]} : vector<3x32xf32> to vector<1x32xf32>
    %558 = vector.broadcast %557 : vector<1x32xf32> to vector<16x32xf32>
    %559 = arith.addf %556, %558 : vector<16x32xf32>
    %cst_154 = arith.constant 0.000000e+00 : f32
    %560 = vector.broadcast %cst_154 : f32 to vector<16x32xf32>
    %561 = arith.maximumf %559, %560 : vector<16x32xf32>
    %c8 = arith.constant 8 : index
    %c0_155 = arith.constant 0 : index
    %c0_156 = arith.constant 0 : index
    %562 = vector.load %arg4[%c8, %c0_155, %c0_156] : memref<25x32x32xbf16, #tpu.memory_space<vmem>>, vector<1x32x32xbf16>
    %563 = vector.shape_cast %562 : vector<1x32x32xbf16> to vector<32x32xbf16>
    %c8_157 = arith.constant 8 : index
    %c0_158 = arith.constant 0 : index
    %c0_159 = arith.constant 0 : index
    %564 = vector.load %arg5[%c8_157, %c0_158, %c0_159] : memref<25x3x32xf32, #tpu.memory_space<vmem>>, vector<1x3x32xf32>
    %565 = vector.shape_cast %564 : vector<1x3x32xf32> to vector<3x32xf32>
    %566 = arith.truncf %561 : vector<16x32xf32> to vector<16x32xbf16>
    %cst_160 = arith.constant dense<0.000000e+00> : vector<16x32xf32>
    %567 = tpu.matmul %566, %563, %cst_160 {dimension_numbers = #tpu.dot_dimension_numbers<[1], [0], [0], [1], [0, 0, 1, 1], [], []>} : vector<16x32xbf16>, vector<32x32xbf16>, vector<16x32xf32> -> vector<16x32xf32>
    %568 = vector.extract_strided_slice %565 {offsets = [0, 0], sizes = [1, 32], strides = [1, 1]} : vector<3x32xf32> to vector<1x32xf32>
    %569 = vector.broadcast %568 : vector<1x32xf32> to vector<16x32xf32>
    %570 = arith.addf %567, %569 : vector<16x32xf32>
    %571 = tpu.iota {dimensions = array<i32: 0>} : vector<64x64xi32>
    %572 = tpu.iota {dimensions = array<i32: 1>} : vector<64x64xi32>
    %c5_i32 = arith.constant 5 : i32
    %573 = vector.broadcast %c5_i32 : i32 to vector<64x64xi32>
    %574 = arith.shrsi %571, %573 : vector<64x64xi32>
    %c5_i32_161 = arith.constant 5 : i32
    %575 = vector.broadcast %c5_i32_161 : i32 to vector<64x64xi32>
    %576 = arith.shrsi %572, %575 : vector<64x64xi32>
    %577 = arith.cmpi eq, %574, %576 : vector<64x64xi32>
    %cst_162 = arith.constant 3.125000e-02 : f32
    %cst_163 = arith.constant 0.000000e+00 : f32
    %578 = vector.broadcast %cst_162 : f32 to vector<64x64xf32>
    %579 = vector.broadcast %cst_163 : f32 to vector<64x64xf32>
    %580 = arith.select %577, %578, %579 : vector<64x64xi1>, vector<64x64xf32>
    %581 = tpu.iota {dimensions = array<i32: 0>} : vector<128x128xi32>
    %582 = tpu.iota {dimensions = array<i32: 1>} : vector<128x128xi32>
    %c5_i32_164 = arith.constant 5 : i32
    %583 = vector.broadcast %c5_i32_164 : i32 to vector<128x128xi32>
    %584 = arith.shrsi %581, %583 : vector<128x128xi32>
    %c5_i32_165 = arith.constant 5 : i32
    %585 = vector.broadcast %c5_i32_165 : i32 to vector<128x128xi32>
    %586 = arith.shrsi %582, %585 : vector<128x128xi32>
    %587 = arith.cmpi eq, %584, %586 : vector<128x128xi32>
    %cst_166 = arith.constant 3.125000e-02 : f32
    %cst_167 = arith.constant 0.000000e+00 : f32
    %588 = vector.broadcast %cst_166 : f32 to vector<128x128xf32>
    %589 = vector.broadcast %cst_167 : f32 to vector<128x128xf32>
    %590 = arith.select %587, %588, %589 : vector<128x128xi1>, vector<128x128xf32>
    %c0_168 = arith.constant 0 : index
    %c0_169 = arith.constant 0 : index
    %c0_170 = arith.constant 0 : index
    %591 = vector.load %arg9[%c0_168, %c0_169, %c0_170] : memref<2x3x64xf32, #tpu.memory_space<vmem>>, vector<1x3x64xf32>
    %592 = vector.shape_cast %591 : vector<1x3x64xf32> to vector<3x64xf32>
    %c1_171 = arith.constant 1 : index
    %c0_172 = arith.constant 0 : index
    %c0_173 = arith.constant 0 : index
    %593 = vector.load %arg9[%c1_171, %c0_172, %c0_173] : memref<2x3x64xf32, #tpu.memory_space<vmem>>, vector<1x3x64xf32>
    %594 = vector.shape_cast %593 : vector<1x3x64xf32> to vector<3x64xf32>
    %c0_174 = arith.constant 0 : index
    %c0_175 = arith.constant 0 : index
    %595 = vector.load %arg8[%c0_174, %c0_175] : memref<96x64xbf16, #tpu.memory_space<vmem>>, vector<32x64xbf16>
    %596 = arith.truncf %99 : vector<2x32xf32> to vector<2x32xbf16>
    %cst_176 = arith.constant dense<0.000000e+00> : vector<2x64xf32>
    %597 = tpu.matmul %596, %595, %cst_176 {dimension_numbers = #tpu.dot_dimension_numbers<[1], [0], [0], [1], [0, 0, 1, 1], [], []>} : vector<2x32xbf16>, vector<32x64xbf16>, vector<2x64xf32> -> vector<2x64xf32>
    %598 = vector.extract_strided_slice %592 {offsets = [0, 0], sizes = [1, 64], strides = [1, 1]} : vector<3x64xf32> to vector<1x64xf32>
    %599 = vector.broadcast %598 : vector<1x64xf32> to vector<2x64xf32>
    %600 = arith.addf %597, %599 : vector<2x64xf32>
    %601 = vector.extract_strided_slice %592 {offsets = [1, 0], sizes = [1, 64], strides = [1, 1]} : vector<3x64xf32> to vector<1x64xf32>
    %602 = vector.extract_strided_slice %592 {offsets = [2, 0], sizes = [1, 64], strides = [1, 1]} : vector<3x64xf32> to vector<1x64xf32>
    %cst_177 = arith.constant dense<0.000000e+00> : vector<2x64xf32>
    %603 = tpu.matmul %600, %580, %cst_177 {dimension_numbers = #tpu.dot_dimension_numbers<[1], [0], [0], [1], [0, 0, 1, 1], [], []>} : vector<2x64xf32>, vector<64x64xf32>, vector<2x64xf32> -> vector<2x64xf32>
    %604 = arith.subf %600, %603 : vector<2x64xf32>
    %605 = arith.mulf %604, %604 : vector<2x64xf32>
    %cst_178 = arith.constant dense<0.000000e+00> : vector<2x64xf32>
    %606 = tpu.matmul %605, %580, %cst_178 {dimension_numbers = #tpu.dot_dimension_numbers<[1], [0], [0], [1], [0, 0, 1, 1], [], []>} : vector<2x64xf32>, vector<64x64xf32>, vector<2x64xf32> -> vector<2x64xf32>
    %cst_179 = arith.constant 9.99999974E-6 : f32
    %607 = vector.broadcast %cst_179 : f32 to vector<2x64xf32>
    %608 = arith.addf %606, %607 : vector<2x64xf32>
    %609 = math.rsqrt %608 : vector<2x64xf32>
    %610 = arith.mulf %604, %609 : vector<2x64xf32>
    %611 = vector.broadcast %601 : vector<1x64xf32> to vector<2x64xf32>
    %612 = arith.mulf %610, %611 : vector<2x64xf32>
    %613 = vector.broadcast %602 : vector<1x64xf32> to vector<2x64xf32>
    %614 = arith.addf %612, %613 : vector<2x64xf32>
    %cst_180 = arith.constant 0.000000e+00 : f32
    %615 = vector.broadcast %cst_180 : f32 to vector<2x64xf32>
    %616 = arith.maximumf %614, %615 : vector<2x64xf32>
    %c32 = arith.constant 32 : index
    %c0_181 = arith.constant 0 : index
    %617 = vector.load %arg8[%c32, %c0_181] : memref<96x64xbf16, #tpu.memory_space<vmem>>, vector<64x64xbf16>
    %618 = arith.truncf %616 : vector<2x64xf32> to vector<2x64xbf16>
    %cst_182 = arith.constant dense<0.000000e+00> : vector<2x64xf32>
    %619 = tpu.matmul %618, %617, %cst_182 {dimension_numbers = #tpu.dot_dimension_numbers<[1], [0], [0], [1], [0, 0, 1, 1], [], []>} : vector<2x64xbf16>, vector<64x64xbf16>, vector<2x64xf32> -> vector<2x64xf32>
    %620 = vector.extract_strided_slice %594 {offsets = [0, 0], sizes = [1, 64], strides = [1, 1]} : vector<3x64xf32> to vector<1x64xf32>
    %621 = vector.broadcast %620 : vector<1x64xf32> to vector<2x64xf32>
    %622 = arith.addf %619, %621 : vector<2x64xf32>
    %623 = vector.extract_strided_slice %594 {offsets = [1, 0], sizes = [1, 64], strides = [1, 1]} : vector<3x64xf32> to vector<1x64xf32>
    %624 = vector.extract_strided_slice %594 {offsets = [2, 0], sizes = [1, 64], strides = [1, 1]} : vector<3x64xf32> to vector<1x64xf32>
    %cst_183 = arith.constant dense<0.000000e+00> : vector<2x64xf32>
    %625 = tpu.matmul %622, %580, %cst_183 {dimension_numbers = #tpu.dot_dimension_numbers<[1], [0], [0], [1], [0, 0, 1, 1], [], []>} : vector<2x64xf32>, vector<64x64xf32>, vector<2x64xf32> -> vector<2x64xf32>
    %626 = arith.subf %622, %625 : vector<2x64xf32>
    %627 = arith.mulf %626, %626 : vector<2x64xf32>
    %cst_184 = arith.constant dense<0.000000e+00> : vector<2x64xf32>
    %628 = tpu.matmul %627, %580, %cst_184 {dimension_numbers = #tpu.dot_dimension_numbers<[1], [0], [0], [1], [0, 0, 1, 1], [], []>} : vector<2x64xf32>, vector<64x64xf32>, vector<2x64xf32> -> vector<2x64xf32>
    %cst_185 = arith.constant 9.99999974E-6 : f32
    %629 = vector.broadcast %cst_185 : f32 to vector<2x64xf32>
    %630 = arith.addf %628, %629 : vector<2x64xf32>
    %631 = math.rsqrt %630 : vector<2x64xf32>
    %632 = arith.mulf %626, %631 : vector<2x64xf32>
    %633 = vector.broadcast %623 : vector<1x64xf32> to vector<2x64xf32>
    %634 = arith.mulf %632, %633 : vector<2x64xf32>
    %635 = vector.broadcast %624 : vector<1x64xf32> to vector<2x64xf32>
    %636 = arith.addf %634, %635 : vector<2x64xf32>
    %c0_186 = arith.constant 0 : index
    %c0_187 = arith.constant 0 : index
    %c0_188 = arith.constant 0 : index
    %637 = vector.load %arg11[%c0_186, %c0_187, %c0_188] : memref<2x3x128xf32, #tpu.memory_space<vmem>>, vector<1x3x128xf32>
    %638 = vector.shape_cast %637 : vector<1x3x128xf32> to vector<3x128xf32>
    %c1_189 = arith.constant 1 : index
    %c0_190 = arith.constant 0 : index
    %c0_191 = arith.constant 0 : index
    %639 = vector.load %arg11[%c1_189, %c0_190, %c0_191] : memref<2x3x128xf32, #tpu.memory_space<vmem>>, vector<1x3x128xf32>
    %640 = vector.shape_cast %639 : vector<1x3x128xf32> to vector<3x128xf32>
    %c0_192 = arith.constant 0 : index
    %c0_193 = arith.constant 0 : index
    %641 = vector.load %arg10[%c0_192, %c0_193] : memref<160x128xbf16, #tpu.memory_space<vmem>>, vector<32x128xbf16>
    %642 = arith.truncf %570 : vector<16x32xf32> to vector<16x32xbf16>
    %cst_194 = arith.constant dense<0.000000e+00> : vector<16x128xf32>
    %643 = tpu.matmul %642, %641, %cst_194 {dimension_numbers = #tpu.dot_dimension_numbers<[1], [0], [0], [1], [0, 0, 1, 1], [], []>} : vector<16x32xbf16>, vector<32x128xbf16>, vector<16x128xf32> -> vector<16x128xf32>
    %644 = vector.extract_strided_slice %638 {offsets = [0, 0], sizes = [1, 128], strides = [1, 1]} : vector<3x128xf32> to vector<1x128xf32>
    %645 = vector.broadcast %644 : vector<1x128xf32> to vector<16x128xf32>
    %646 = arith.addf %643, %645 : vector<16x128xf32>
    %647 = vector.extract_strided_slice %638 {offsets = [1, 0], sizes = [1, 128], strides = [1, 1]} : vector<3x128xf32> to vector<1x128xf32>
    %648 = vector.extract_strided_slice %638 {offsets = [2, 0], sizes = [1, 128], strides = [1, 1]} : vector<3x128xf32> to vector<1x128xf32>
    %cst_195 = arith.constant dense<0.000000e+00> : vector<16x128xf32>
    %649 = tpu.matmul %646, %590, %cst_195 {dimension_numbers = #tpu.dot_dimension_numbers<[1], [0], [0], [1], [0, 0, 1, 1], [], []>} : vector<16x128xf32>, vector<128x128xf32>, vector<16x128xf32> -> vector<16x128xf32>
    %650 = arith.subf %646, %649 : vector<16x128xf32>
    %651 = arith.mulf %650, %650 : vector<16x128xf32>
    %cst_196 = arith.constant dense<0.000000e+00> : vector<16x128xf32>
    %652 = tpu.matmul %651, %590, %cst_196 {dimension_numbers = #tpu.dot_dimension_numbers<[1], [0], [0], [1], [0, 0, 1, 1], [], []>} : vector<16x128xf32>, vector<128x128xf32>, vector<16x128xf32> -> vector<16x128xf32>
    %cst_197 = arith.constant 9.99999974E-6 : f32
    %653 = vector.broadcast %cst_197 : f32 to vector<16x128xf32>
    %654 = arith.addf %652, %653 : vector<16x128xf32>
    %655 = math.rsqrt %654 : vector<16x128xf32>
    %656 = arith.mulf %650, %655 : vector<16x128xf32>
    %657 = vector.broadcast %647 : vector<1x128xf32> to vector<16x128xf32>
    %658 = arith.mulf %656, %657 : vector<16x128xf32>
    %659 = vector.broadcast %648 : vector<1x128xf32> to vector<16x128xf32>
    %660 = arith.addf %658, %659 : vector<16x128xf32>
    %cst_198 = arith.constant 0.000000e+00 : f32
    %661 = vector.broadcast %cst_198 : f32 to vector<16x128xf32>
    %662 = arith.maximumf %660, %661 : vector<16x128xf32>
    %c32_199 = arith.constant 32 : index
    %c0_200 = arith.constant 0 : index
    %663 = vector.load %arg10[%c32_199, %c0_200] : memref<160x128xbf16, #tpu.memory_space<vmem>>, vector<128x128xbf16>
    %664 = arith.truncf %662 : vector<16x128xf32> to vector<16x128xbf16>
    %cst_201 = arith.constant dense<0.000000e+00> : vector<16x128xf32>
    %665 = tpu.matmul %664, %663, %cst_201 {dimension_numbers = #tpu.dot_dimension_numbers<[1], [0], [0], [1], [0, 0, 1, 1], [], []>} : vector<16x128xbf16>, vector<128x128xbf16>, vector<16x128xf32> -> vector<16x128xf32>
    %666 = vector.extract_strided_slice %640 {offsets = [0, 0], sizes = [1, 128], strides = [1, 1]} : vector<3x128xf32> to vector<1x128xf32>
    %667 = vector.broadcast %666 : vector<1x128xf32> to vector<16x128xf32>
    %668 = arith.addf %665, %667 : vector<16x128xf32>
    %669 = vector.extract_strided_slice %640 {offsets = [1, 0], sizes = [1, 128], strides = [1, 1]} : vector<3x128xf32> to vector<1x128xf32>
    %670 = vector.extract_strided_slice %640 {offsets = [2, 0], sizes = [1, 128], strides = [1, 1]} : vector<3x128xf32> to vector<1x128xf32>
    %cst_202 = arith.constant dense<0.000000e+00> : vector<16x128xf32>
    %671 = tpu.matmul %668, %590, %cst_202 {dimension_numbers = #tpu.dot_dimension_numbers<[1], [0], [0], [1], [0, 0, 1, 1], [], []>} : vector<16x128xf32>, vector<128x128xf32>, vector<16x128xf32> -> vector<16x128xf32>
    %672 = arith.subf %668, %671 : vector<16x128xf32>
    %673 = arith.mulf %672, %672 : vector<16x128xf32>
    %cst_203 = arith.constant dense<0.000000e+00> : vector<16x128xf32>
    %674 = tpu.matmul %673, %590, %cst_203 {dimension_numbers = #tpu.dot_dimension_numbers<[1], [0], [0], [1], [0, 0, 1, 1], [], []>} : vector<16x128xf32>, vector<128x128xf32>, vector<16x128xf32> -> vector<16x128xf32>
    %cst_204 = arith.constant 9.99999974E-6 : f32
    %675 = vector.broadcast %cst_204 : f32 to vector<16x128xf32>
    %676 = arith.addf %674, %675 : vector<16x128xf32>
    %677 = math.rsqrt %676 : vector<16x128xf32>
    %678 = arith.mulf %672, %677 : vector<16x128xf32>
    %679 = vector.broadcast %669 : vector<1x128xf32> to vector<16x128xf32>
    %680 = arith.mulf %678, %679 : vector<16x128xf32>
    %681 = vector.broadcast %670 : vector<1x128xf32> to vector<16x128xf32>
    %682 = arith.addf %680, %681 : vector<16x128xf32>
    %683 = tpu.iota {dimensions = array<i32: 0>} : vector<2x16xi32>
    %684 = tpu.iota {dimensions = array<i32: 1>} : vector<2x16xi32>
    %c3_i32_205 = arith.constant 3 : i32
    %685 = vector.broadcast %c3_i32_205 : i32 to vector<2x16xi32>
    %686 = arith.shrsi %684, %685 : vector<2x16xi32>
    %687 = arith.cmpi eq, %686, %683 : vector<2x16xi32>
    %c7_i32_206 = arith.constant 7 : i32
    %688 = vector.broadcast %c7_i32_206 : i32 to vector<2x16xi32>
    %689 = arith.andi %684, %688 : vector<2x16xi32>
    %c0_i32_207 = arith.constant 0 : i32
    %690 = vector.broadcast %c0_i32_207 : i32 to vector<2x16xi32>
    %691 = arith.cmpi eq, %683, %690 : vector<2x16xi32>
    %692 = vector.broadcast %0 : i32 to vector<2x16xi32>
    %693 = vector.broadcast %1 : i32 to vector<2x16xi32>
    %694 = arith.select %691, %692, %693 : vector<2x16xi1>, vector<2x16xi32>
    %695 = arith.cmpi slt, %689, %694 : vector<2x16xi32>
    %696 = arith.andi %687, %695 : vector<2x16xi1>
    %697 = vector.extract_strided_slice %636 {offsets = [0, 0], sizes = [2, 32], strides = [1, 1]} : vector<2x64xf32> to vector<2x32xf32>
    %698 = vector.extract_strided_slice %682 {offsets = [0, 0], sizes = [16, 32], strides = [1, 1]} : vector<16x128xf32> to vector<16x32xf32>
    %699 = vector.extract_strided_slice %682 {offsets = [0, 64], sizes = [16, 32], strides = [1, 1]} : vector<16x128xf32> to vector<16x32xf32>
    %700 = arith.truncf %697 : vector<2x32xf32> to vector<2x32xbf16>
    %701 = arith.truncf %698 : vector<16x32xf32> to vector<16x32xbf16>
    %cst_208 = arith.constant dense<0.000000e+00> : vector<2x16xf32>
    %702 = tpu.matmul %700, %701, %cst_208 {dimension_numbers = #tpu.dot_dimension_numbers<[1], [1], [0], [0], [0, 0, 1, 0], [], []>} : vector<2x32xbf16>, vector<16x32xbf16>, vector<2x16xf32> -> vector<2x16xf32>
    %cst_209 = arith.constant 0.176776692 : f32
    %703 = vector.broadcast %cst_209 : f32 to vector<2x16xf32>
    %704 = arith.mulf %702, %703 : vector<2x16xf32>
    %cst_210 = arith.constant -1.000000e+09 : f32
    %705 = vector.broadcast %cst_210 : f32 to vector<2x16xf32>
    %706 = arith.select %696, %704, %705 : vector<2x16xi1>, vector<2x16xf32>
    %cst_211 = arith.constant dense<0xFF800000> : vector<2xf32>
    %707 = vector.multi_reduction <maximumf>, %706, %cst_211 [1] : vector<2x16xf32> to vector<2xf32>
    %708 = vector.shape_cast %707 : vector<2xf32> to vector<2x1xf32>
    %709 = vector.broadcast %708 : vector<2x1xf32> to vector<2x16xf32>
    %710 = arith.subf %706, %709 : vector<2x16xf32>
    %711 = math.exp %710 : vector<2x16xf32>
    %cst_212 = arith.constant dense<0.000000e+00> : vector<2xf32>
    %712 = vector.multi_reduction <add>, %711, %cst_212 [1] : vector<2x16xf32> to vector<2xf32>
    %713 = vector.shape_cast %712 : vector<2xf32> to vector<2x1xf32>
    %714 = vector.broadcast %713 : vector<2x1xf32> to vector<2x16xf32>
    %715 = arith.divf %711, %714 : vector<2x16xf32>
    %716 = arith.truncf %715 : vector<2x16xf32> to vector<2x16xbf16>
    %717 = arith.truncf %699 : vector<16x32xf32> to vector<16x32xbf16>
    %cst_213 = arith.constant dense<0.000000e+00> : vector<2x32xf32>
    %718 = tpu.matmul %716, %717, %cst_213 {dimension_numbers = #tpu.dot_dimension_numbers<[1], [0], [0], [1], [0, 0, 1, 1], [], []>} : vector<2x16xbf16>, vector<16x32xbf16>, vector<2x32xf32> -> vector<2x32xf32>
    %c9 = arith.constant 9 : index
    %c0_214 = arith.constant 0 : index
    %c0_215 = arith.constant 0 : index
    %719 = vector.load %arg4[%c9, %c0_214, %c0_215] : memref<25x32x32xbf16, #tpu.memory_space<vmem>>, vector<1x32x32xbf16>
    %720 = vector.shape_cast %719 : vector<1x32x32xbf16> to vector<32x32xbf16>
    %721 = arith.truncf %718 : vector<2x32xf32> to vector<2x32xbf16>
    %cst_216 = arith.constant dense<0.000000e+00> : vector<2x32xf32>
    %722 = tpu.matmul %721, %720, %cst_216 {dimension_numbers = #tpu.dot_dimension_numbers<[1], [0], [0], [1], [0, 0, 1, 1], [], []>} : vector<2x32xbf16>, vector<32x32xbf16>, vector<2x32xf32> -> vector<2x32xf32>
    %723 = vector.extract_strided_slice %636 {offsets = [0, 32], sizes = [2, 32], strides = [1, 1]} : vector<2x64xf32> to vector<2x32xf32>
    %724 = vector.extract_strided_slice %682 {offsets = [0, 32], sizes = [16, 32], strides = [1, 1]} : vector<16x128xf32> to vector<16x32xf32>
    %725 = vector.extract_strided_slice %682 {offsets = [0, 96], sizes = [16, 32], strides = [1, 1]} : vector<16x128xf32> to vector<16x32xf32>
    %726 = arith.truncf %723 : vector<2x32xf32> to vector<2x32xbf16>
    %727 = arith.truncf %724 : vector<16x32xf32> to vector<16x32xbf16>
    %cst_217 = arith.constant dense<0.000000e+00> : vector<2x16xf32>
    %728 = tpu.matmul %726, %727, %cst_217 {dimension_numbers = #tpu.dot_dimension_numbers<[1], [1], [0], [0], [0, 0, 1, 0], [], []>} : vector<2x32xbf16>, vector<16x32xbf16>, vector<2x16xf32> -> vector<2x16xf32>
    %cst_218 = arith.constant 0.176776692 : f32
    %729 = vector.broadcast %cst_218 : f32 to vector<2x16xf32>
    %730 = arith.mulf %728, %729 : vector<2x16xf32>
    %cst_219 = arith.constant -1.000000e+09 : f32
    %731 = vector.broadcast %cst_219 : f32 to vector<2x16xf32>
    %732 = arith.select %696, %730, %731 : vector<2x16xi1>, vector<2x16xf32>
    %cst_220 = arith.constant dense<0xFF800000> : vector<2xf32>
    %733 = vector.multi_reduction <maximumf>, %732, %cst_220 [1] : vector<2x16xf32> to vector<2xf32>
    %734 = vector.shape_cast %733 : vector<2xf32> to vector<2x1xf32>
    %735 = vector.broadcast %734 : vector<2x1xf32> to vector<2x16xf32>
    %736 = arith.subf %732, %735 : vector<2x16xf32>
    %737 = math.exp %736 : vector<2x16xf32>
    %cst_221 = arith.constant dense<0.000000e+00> : vector<2xf32>
    %738 = vector.multi_reduction <add>, %737, %cst_221 [1] : vector<2x16xf32> to vector<2xf32>
    %739 = vector.shape_cast %738 : vector<2xf32> to vector<2x1xf32>
    %740 = vector.broadcast %739 : vector<2x1xf32> to vector<2x16xf32>
    %741 = arith.divf %737, %740 : vector<2x16xf32>
    %742 = arith.truncf %741 : vector<2x16xf32> to vector<2x16xbf16>
    %743 = arith.truncf %725 : vector<16x32xf32> to vector<16x32xbf16>
    %cst_222 = arith.constant dense<0.000000e+00> : vector<2x32xf32>
    %744 = tpu.matmul %742, %743, %cst_222 {dimension_numbers = #tpu.dot_dimension_numbers<[1], [0], [0], [1], [0, 0, 1, 1], [], []>} : vector<2x16xbf16>, vector<16x32xbf16>, vector<2x32xf32> -> vector<2x32xf32>
    %c10 = arith.constant 10 : index
    %c0_223 = arith.constant 0 : index
    %c0_224 = arith.constant 0 : index
    %745 = vector.load %arg4[%c10, %c0_223, %c0_224] : memref<25x32x32xbf16, #tpu.memory_space<vmem>>, vector<1x32x32xbf16>
    %746 = vector.shape_cast %745 : vector<1x32x32xbf16> to vector<32x32xbf16>
    %747 = arith.truncf %744 : vector<2x32xf32> to vector<2x32xbf16>
    %cst_225 = arith.constant dense<0.000000e+00> : vector<2x32xf32>
    %748 = tpu.matmul %747, %746, %cst_225 {dimension_numbers = #tpu.dot_dimension_numbers<[1], [0], [0], [1], [0, 0, 1, 1], [], []>} : vector<2x32xbf16>, vector<32x32xbf16>, vector<2x32xf32> -> vector<2x32xf32>
    %749 = arith.addf %722, %748 : vector<2x32xf32>
    %c9_226 = arith.constant 9 : index
    %c0_227 = arith.constant 0 : index
    %c0_228 = arith.constant 0 : index
    %750 = vector.load %arg5[%c9_226, %c0_227, %c0_228] : memref<25x3x32xf32, #tpu.memory_space<vmem>>, vector<1x1x32xf32>
    %751 = vector.shape_cast %750 : vector<1x1x32xf32> to vector<1x32xf32>
    %752 = vector.broadcast %751 : vector<1x32xf32> to vector<2x32xf32>
    %753 = arith.addf %749, %752 : vector<2x32xf32>
    %c11 = arith.constant 11 : index
    %c0_229 = arith.constant 0 : index
    %c0_230 = arith.constant 0 : index
    %754 = vector.load %arg4[%c11, %c0_229, %c0_230] : memref<25x32x32xbf16, #tpu.memory_space<vmem>>, vector<1x32x32xbf16>
    %755 = vector.shape_cast %754 : vector<1x32x32xbf16> to vector<32x32xbf16>
    %c11_231 = arith.constant 11 : index
    %c0_232 = arith.constant 0 : index
    %c0_233 = arith.constant 0 : index
    %756 = vector.load %arg5[%c11_231, %c0_232, %c0_233] : memref<25x3x32xf32, #tpu.memory_space<vmem>>, vector<1x3x32xf32>
    %757 = vector.shape_cast %756 : vector<1x3x32xf32> to vector<3x32xf32>
    %758 = arith.truncf %753 : vector<2x32xf32> to vector<2x32xbf16>
    %cst_234 = arith.constant dense<0.000000e+00> : vector<2x32xf32>
    %759 = tpu.matmul %758, %755, %cst_234 {dimension_numbers = #tpu.dot_dimension_numbers<[1], [0], [0], [1], [0, 0, 1, 1], [], []>} : vector<2x32xbf16>, vector<32x32xbf16>, vector<2x32xf32> -> vector<2x32xf32>
    %760 = vector.extract_strided_slice %757 {offsets = [0, 0], sizes = [1, 32], strides = [1, 1]} : vector<3x32xf32> to vector<1x32xf32>
    %761 = vector.broadcast %760 : vector<1x32xf32> to vector<2x32xf32>
    %762 = arith.addf %759, %761 : vector<2x32xf32>
    %cst_235 = arith.constant 0.000000e+00 : f32
    %763 = vector.broadcast %cst_235 : f32 to vector<2x32xf32>
    %764 = arith.maximumf %762, %763 : vector<2x32xf32>
    %c12 = arith.constant 12 : index
    %c0_236 = arith.constant 0 : index
    %c0_237 = arith.constant 0 : index
    %765 = vector.load %arg4[%c12, %c0_236, %c0_237] : memref<25x32x32xbf16, #tpu.memory_space<vmem>>, vector<1x32x32xbf16>
    %766 = vector.shape_cast %765 : vector<1x32x32xbf16> to vector<32x32xbf16>
    %c12_238 = arith.constant 12 : index
    %c0_239 = arith.constant 0 : index
    %c0_240 = arith.constant 0 : index
    %767 = vector.load %arg5[%c12_238, %c0_239, %c0_240] : memref<25x3x32xf32, #tpu.memory_space<vmem>>, vector<1x3x32xf32>
    %768 = vector.shape_cast %767 : vector<1x3x32xf32> to vector<3x32xf32>
    %769 = arith.truncf %764 : vector<2x32xf32> to vector<2x32xbf16>
    %cst_241 = arith.constant dense<0.000000e+00> : vector<2x32xf32>
    %770 = tpu.matmul %769, %766, %cst_241 {dimension_numbers = #tpu.dot_dimension_numbers<[1], [0], [0], [1], [0, 0, 1, 1], [], []>} : vector<2x32xbf16>, vector<32x32xbf16>, vector<2x32xf32> -> vector<2x32xf32>
    %771 = vector.extract_strided_slice %768 {offsets = [0, 0], sizes = [1, 32], strides = [1, 1]} : vector<3x32xf32> to vector<1x32xf32>
    %772 = vector.broadcast %771 : vector<1x32xf32> to vector<2x32xf32>
    %773 = arith.addf %770, %772 : vector<2x32xf32>
    %cst_242 = arith.constant dense<0.000000e+00> : vector<2xf32>
    %774 = vector.multi_reduction <add>, %773, %cst_242 [1] : vector<2x32xf32> to vector<2xf32>
    %775 = vector.shape_cast %774 : vector<2xf32> to vector<2x1xf32>
    %cst_243 = arith.constant 3.200000e+01 : f32
    %776 = vector.broadcast %cst_243 : f32 to vector<2x1xf32>
    %777 = arith.divf %775, %776 : vector<2x1xf32>
    %778 = vector.broadcast %777 : vector<2x1xf32> to vector<2x32xf32>
    %779 = arith.subf %773, %778 : vector<2x32xf32>
    %780 = arith.mulf %779, %779 : vector<2x32xf32>
    %cst_244 = arith.constant dense<0.000000e+00> : vector<2xf32>
    %781 = vector.multi_reduction <add>, %780, %cst_244 [1] : vector<2x32xf32> to vector<2xf32>
    %782 = vector.shape_cast %781 : vector<2xf32> to vector<2x1xf32>
    %cst_245 = arith.constant 3.200000e+01 : f32
    %783 = vector.broadcast %cst_245 : f32 to vector<2x1xf32>
    %784 = arith.divf %782, %783 : vector<2x1xf32>
    %cst_246 = arith.constant 9.99999974E-6 : f32
    %785 = vector.broadcast %cst_246 : f32 to vector<2x1xf32>
    %786 = arith.addf %784, %785 : vector<2x1xf32>
    %787 = math.rsqrt %786 : vector<2x1xf32>
    %788 = vector.broadcast %787 : vector<2x1xf32> to vector<2x32xf32>
    %789 = arith.mulf %779, %788 : vector<2x32xf32>
    %790 = vector.extract_strided_slice %768 {offsets = [1, 0], sizes = [1, 32], strides = [1, 1]} : vector<3x32xf32> to vector<1x32xf32>
    %791 = vector.broadcast %790 : vector<1x32xf32> to vector<2x32xf32>
    %792 = arith.mulf %789, %791 : vector<2x32xf32>
    %793 = vector.extract_strided_slice %768 {offsets = [2, 0], sizes = [1, 32], strides = [1, 1]} : vector<3x32xf32> to vector<1x32xf32>
    %794 = vector.broadcast %793 : vector<1x32xf32> to vector<2x32xf32>
    %795 = arith.addf %792, %794 : vector<2x32xf32>
    %cst_247 = arith.constant 0.000000e+00 : f32
    %796 = vector.broadcast %cst_247 : f32 to vector<2x32xf32>
    %797 = arith.maximumf %795, %796 : vector<2x32xf32>
    %c13 = arith.constant 13 : index
    %c0_248 = arith.constant 0 : index
    %c0_249 = arith.constant 0 : index
    %798 = vector.load %arg4[%c13, %c0_248, %c0_249] : memref<25x32x32xbf16, #tpu.memory_space<vmem>>, vector<1x32x32xbf16>
    %799 = vector.shape_cast %798 : vector<1x32x32xbf16> to vector<32x32xbf16>
    %c13_250 = arith.constant 13 : index
    %c0_251 = arith.constant 0 : index
    %c0_252 = arith.constant 0 : index
    %800 = vector.load %arg5[%c13_250, %c0_251, %c0_252] : memref<25x3x32xf32, #tpu.memory_space<vmem>>, vector<1x3x32xf32>
    %801 = vector.shape_cast %800 : vector<1x3x32xf32> to vector<3x32xf32>
    %802 = arith.truncf %797 : vector<2x32xf32> to vector<2x32xbf16>
    %cst_253 = arith.constant dense<0.000000e+00> : vector<2x32xf32>
    %803 = tpu.matmul %802, %799, %cst_253 {dimension_numbers = #tpu.dot_dimension_numbers<[1], [0], [0], [1], [0, 0, 1, 1], [], []>} : vector<2x32xbf16>, vector<32x32xbf16>, vector<2x32xf32> -> vector<2x32xf32>
    %804 = vector.extract_strided_slice %801 {offsets = [0, 0], sizes = [1, 32], strides = [1, 1]} : vector<3x32xf32> to vector<1x32xf32>
    %805 = vector.broadcast %804 : vector<1x32xf32> to vector<2x32xf32>
    %806 = arith.addf %803, %805 : vector<2x32xf32>
    %cst_254 = arith.constant dense<0.000000e+00> : vector<2xf32>
    %807 = vector.multi_reduction <add>, %806, %cst_254 [1] : vector<2x32xf32> to vector<2xf32>
    %808 = vector.shape_cast %807 : vector<2xf32> to vector<2x1xf32>
    %cst_255 = arith.constant 3.200000e+01 : f32
    %809 = vector.broadcast %cst_255 : f32 to vector<2x1xf32>
    %810 = arith.divf %808, %809 : vector<2x1xf32>
    %811 = vector.broadcast %810 : vector<2x1xf32> to vector<2x32xf32>
    %812 = arith.subf %806, %811 : vector<2x32xf32>
    %813 = arith.mulf %812, %812 : vector<2x32xf32>
    %cst_256 = arith.constant dense<0.000000e+00> : vector<2xf32>
    %814 = vector.multi_reduction <add>, %813, %cst_256 [1] : vector<2x32xf32> to vector<2xf32>
    %815 = vector.shape_cast %814 : vector<2xf32> to vector<2x1xf32>
    %cst_257 = arith.constant 3.200000e+01 : f32
    %816 = vector.broadcast %cst_257 : f32 to vector<2x1xf32>
    %817 = arith.divf %815, %816 : vector<2x1xf32>
    %cst_258 = arith.constant 9.99999974E-6 : f32
    %818 = vector.broadcast %cst_258 : f32 to vector<2x1xf32>
    %819 = arith.addf %817, %818 : vector<2x1xf32>
    %820 = math.rsqrt %819 : vector<2x1xf32>
    %821 = vector.broadcast %820 : vector<2x1xf32> to vector<2x32xf32>
    %822 = arith.mulf %812, %821 : vector<2x32xf32>
    %823 = vector.extract_strided_slice %801 {offsets = [1, 0], sizes = [1, 32], strides = [1, 1]} : vector<3x32xf32> to vector<1x32xf32>
    %824 = vector.broadcast %823 : vector<1x32xf32> to vector<2x32xf32>
    %825 = arith.mulf %822, %824 : vector<2x32xf32>
    %826 = vector.extract_strided_slice %801 {offsets = [2, 0], sizes = [1, 32], strides = [1, 1]} : vector<3x32xf32> to vector<1x32xf32>
    %827 = vector.broadcast %826 : vector<1x32xf32> to vector<2x32xf32>
    %828 = arith.addf %825, %827 : vector<2x32xf32>
    %cst_259 = arith.constant 0.000000e+00 : f32
    %829 = vector.broadcast %cst_259 : f32 to vector<2x32xf32>
    %830 = arith.maximumf %828, %829 : vector<2x32xf32>
    %c14 = arith.constant 14 : index
    %c0_260 = arith.constant 0 : index
    %c0_261 = arith.constant 0 : index
    %831 = vector.load %arg4[%c14, %c0_260, %c0_261] : memref<25x32x32xbf16, #tpu.memory_space<vmem>>, vector<1x32x32xbf16>
    %832 = vector.shape_cast %831 : vector<1x32x32xbf16> to vector<32x32xbf16>
    %c14_262 = arith.constant 14 : index
    %c0_263 = arith.constant 0 : index
    %c0_264 = arith.constant 0 : index
    %833 = vector.load %arg5[%c14_262, %c0_263, %c0_264] : memref<25x3x32xf32, #tpu.memory_space<vmem>>, vector<1x3x32xf32>
    %834 = vector.shape_cast %833 : vector<1x3x32xf32> to vector<3x32xf32>
    %835 = arith.truncf %830 : vector<2x32xf32> to vector<2x32xbf16>
    %cst_265 = arith.constant dense<0.000000e+00> : vector<2x32xf32>
    %836 = tpu.matmul %835, %832, %cst_265 {dimension_numbers = #tpu.dot_dimension_numbers<[1], [0], [0], [1], [0, 0, 1, 1], [], []>} : vector<2x32xbf16>, vector<32x32xbf16>, vector<2x32xf32> -> vector<2x32xf32>
    %837 = vector.extract_strided_slice %834 {offsets = [0, 0], sizes = [1, 32], strides = [1, 1]} : vector<3x32xf32> to vector<1x32xf32>
    %838 = vector.broadcast %837 : vector<1x32xf32> to vector<2x32xf32>
    %839 = arith.addf %836, %838 : vector<2x32xf32>
    %cst_266 = arith.constant dense<0.000000e+00> : vector<2xf32>
    %840 = vector.multi_reduction <add>, %839, %cst_266 [1] : vector<2x32xf32> to vector<2xf32>
    %841 = vector.shape_cast %840 : vector<2xf32> to vector<2x1xf32>
    %cst_267 = arith.constant 3.200000e+01 : f32
    %842 = vector.broadcast %cst_267 : f32 to vector<2x1xf32>
    %843 = arith.divf %841, %842 : vector<2x1xf32>
    %844 = vector.broadcast %843 : vector<2x1xf32> to vector<2x32xf32>
    %845 = arith.subf %839, %844 : vector<2x32xf32>
    %846 = arith.mulf %845, %845 : vector<2x32xf32>
    %cst_268 = arith.constant dense<0.000000e+00> : vector<2xf32>
    %847 = vector.multi_reduction <add>, %846, %cst_268 [1] : vector<2x32xf32> to vector<2xf32>
    %848 = vector.shape_cast %847 : vector<2xf32> to vector<2x1xf32>
    %cst_269 = arith.constant 3.200000e+01 : f32
    %849 = vector.broadcast %cst_269 : f32 to vector<2x1xf32>
    %850 = arith.divf %848, %849 : vector<2x1xf32>
    %cst_270 = arith.constant 9.99999974E-6 : f32
    %851 = vector.broadcast %cst_270 : f32 to vector<2x1xf32>
    %852 = arith.addf %850, %851 : vector<2x1xf32>
    %853 = math.rsqrt %852 : vector<2x1xf32>
    %854 = vector.broadcast %853 : vector<2x1xf32> to vector<2x32xf32>
    %855 = arith.mulf %845, %854 : vector<2x32xf32>
    %856 = vector.extract_strided_slice %834 {offsets = [1, 0], sizes = [1, 32], strides = [1, 1]} : vector<3x32xf32> to vector<1x32xf32>
    %857 = vector.broadcast %856 : vector<1x32xf32> to vector<2x32xf32>
    %858 = arith.mulf %855, %857 : vector<2x32xf32>
    %859 = vector.extract_strided_slice %834 {offsets = [2, 0], sizes = [1, 32], strides = [1, 1]} : vector<3x32xf32> to vector<1x32xf32>
    %860 = vector.broadcast %859 : vector<1x32xf32> to vector<2x32xf32>
    %861 = arith.addf %858, %860 : vector<2x32xf32>
    %cst_271 = arith.constant 0.000000e+00 : f32
    %862 = vector.broadcast %cst_271 : f32 to vector<2x32xf32>
    %863 = arith.maximumf %861, %862 : vector<2x32xf32>
    %c15 = arith.constant 15 : index
    %c0_272 = arith.constant 0 : index
    %c0_273 = arith.constant 0 : index
    %864 = vector.load %arg4[%c15, %c0_272, %c0_273] : memref<25x32x32xbf16, #tpu.memory_space<vmem>>, vector<1x32x32xbf16>
    %865 = vector.shape_cast %864 : vector<1x32x32xbf16> to vector<32x32xbf16>
    %c15_274 = arith.constant 15 : index
    %c0_275 = arith.constant 0 : index
    %c0_276 = arith.constant 0 : index
    %866 = vector.load %arg5[%c15_274, %c0_275, %c0_276] : memref<25x3x32xf32, #tpu.memory_space<vmem>>, vector<1x3x32xf32>
    %867 = vector.shape_cast %866 : vector<1x3x32xf32> to vector<3x32xf32>
    %868 = arith.truncf %863 : vector<2x32xf32> to vector<2x32xbf16>
    %cst_277 = arith.constant dense<0.000000e+00> : vector<2x32xf32>
    %869 = tpu.matmul %868, %865, %cst_277 {dimension_numbers = #tpu.dot_dimension_numbers<[1], [0], [0], [1], [0, 0, 1, 1], [], []>} : vector<2x32xbf16>, vector<32x32xbf16>, vector<2x32xf32> -> vector<2x32xf32>
    %870 = vector.extract_strided_slice %867 {offsets = [0, 0], sizes = [1, 32], strides = [1, 1]} : vector<3x32xf32> to vector<1x32xf32>
    %871 = vector.broadcast %870 : vector<1x32xf32> to vector<2x32xf32>
    %872 = arith.addf %869, %871 : vector<2x32xf32>
    %cst_278 = arith.constant dense<0.000000e+00> : vector<2xf32>
    %873 = vector.multi_reduction <add>, %872, %cst_278 [1] : vector<2x32xf32> to vector<2xf32>
    %874 = vector.shape_cast %873 : vector<2xf32> to vector<2x1xf32>
    %cst_279 = arith.constant 3.200000e+01 : f32
    %875 = vector.broadcast %cst_279 : f32 to vector<2x1xf32>
    %876 = arith.divf %874, %875 : vector<2x1xf32>
    %877 = vector.broadcast %876 : vector<2x1xf32> to vector<2x32xf32>
    %878 = arith.subf %872, %877 : vector<2x32xf32>
    %879 = arith.mulf %878, %878 : vector<2x32xf32>
    %cst_280 = arith.constant dense<0.000000e+00> : vector<2xf32>
    %880 = vector.multi_reduction <add>, %879, %cst_280 [1] : vector<2x32xf32> to vector<2xf32>
    %881 = vector.shape_cast %880 : vector<2xf32> to vector<2x1xf32>
    %cst_281 = arith.constant 3.200000e+01 : f32
    %882 = vector.broadcast %cst_281 : f32 to vector<2x1xf32>
    %883 = arith.divf %881, %882 : vector<2x1xf32>
    %cst_282 = arith.constant 9.99999974E-6 : f32
    %884 = vector.broadcast %cst_282 : f32 to vector<2x1xf32>
    %885 = arith.addf %883, %884 : vector<2x1xf32>
    %886 = math.rsqrt %885 : vector<2x1xf32>
    %887 = vector.broadcast %886 : vector<2x1xf32> to vector<2x32xf32>
    %888 = arith.mulf %878, %887 : vector<2x32xf32>
    %889 = vector.extract_strided_slice %867 {offsets = [1, 0], sizes = [1, 32], strides = [1, 1]} : vector<3x32xf32> to vector<1x32xf32>
    %890 = vector.broadcast %889 : vector<1x32xf32> to vector<2x32xf32>
    %891 = arith.mulf %888, %890 : vector<2x32xf32>
    %892 = vector.extract_strided_slice %867 {offsets = [2, 0], sizes = [1, 32], strides = [1, 1]} : vector<3x32xf32> to vector<1x32xf32>
    %893 = vector.broadcast %892 : vector<1x32xf32> to vector<2x32xf32>
    %894 = arith.addf %891, %893 : vector<2x32xf32>
    %cst_283 = arith.constant 0.000000e+00 : f32
    %895 = vector.broadcast %cst_283 : f32 to vector<2x32xf32>
    %896 = arith.maximumf %894, %895 : vector<2x32xf32>
    %c16_284 = arith.constant 16 : index
    %c0_285 = arith.constant 0 : index
    %c0_286 = arith.constant 0 : index
    %897 = vector.load %arg4[%c16_284, %c0_285, %c0_286] : memref<25x32x32xbf16, #tpu.memory_space<vmem>>, vector<1x32x32xbf16>
    %898 = vector.shape_cast %897 : vector<1x32x32xbf16> to vector<32x32xbf16>
    %c16_287 = arith.constant 16 : index
    %c0_288 = arith.constant 0 : index
    %c0_289 = arith.constant 0 : index
    %899 = vector.load %arg5[%c16_287, %c0_288, %c0_289] : memref<25x3x32xf32, #tpu.memory_space<vmem>>, vector<1x3x32xf32>
    %900 = vector.shape_cast %899 : vector<1x3x32xf32> to vector<3x32xf32>
    %901 = arith.truncf %896 : vector<2x32xf32> to vector<2x32xbf16>
    %cst_290 = arith.constant dense<0.000000e+00> : vector<2x32xf32>
    %902 = tpu.matmul %901, %898, %cst_290 {dimension_numbers = #tpu.dot_dimension_numbers<[1], [0], [0], [1], [0, 0, 1, 1], [], []>} : vector<2x32xbf16>, vector<32x32xbf16>, vector<2x32xf32> -> vector<2x32xf32>
    %903 = vector.extract_strided_slice %900 {offsets = [0, 0], sizes = [1, 32], strides = [1, 1]} : vector<3x32xf32> to vector<1x32xf32>
    %904 = vector.broadcast %903 : vector<1x32xf32> to vector<2x32xf32>
    %905 = arith.addf %902, %904 : vector<2x32xf32>
    %c17 = arith.constant 17 : index
    %c0_291 = arith.constant 0 : index
    %c0_292 = arith.constant 0 : index
    %906 = vector.load %arg4[%c17, %c0_291, %c0_292] : memref<25x32x32xbf16, #tpu.memory_space<vmem>>, vector<1x32x32xbf16>
    %907 = vector.shape_cast %906 : vector<1x32x32xbf16> to vector<32x32xbf16>
    %c17_293 = arith.constant 17 : index
    %c0_294 = arith.constant 0 : index
    %c0_295 = arith.constant 0 : index
    %908 = vector.load %arg5[%c17_293, %c0_294, %c0_295] : memref<25x3x32xf32, #tpu.memory_space<vmem>>, vector<1x3x32xf32>
    %909 = vector.shape_cast %908 : vector<1x3x32xf32> to vector<3x32xf32>
    %910 = arith.truncf %99 : vector<2x32xf32> to vector<2x32xbf16>
    %cst_296 = arith.constant dense<0.000000e+00> : vector<2x32xf32>
    %911 = tpu.matmul %910, %907, %cst_296 {dimension_numbers = #tpu.dot_dimension_numbers<[1], [0], [0], [1], [0, 0, 1, 1], [], []>} : vector<2x32xbf16>, vector<32x32xbf16>, vector<2x32xf32> -> vector<2x32xf32>
    %912 = vector.extract_strided_slice %909 {offsets = [0, 0], sizes = [1, 32], strides = [1, 1]} : vector<3x32xf32> to vector<1x32xf32>
    %913 = vector.broadcast %912 : vector<1x32xf32> to vector<2x32xf32>
    %914 = arith.addf %911, %913 : vector<2x32xf32>
    %cst_297 = arith.constant dense<0.000000e+00> : vector<2xf32>
    %915 = vector.multi_reduction <add>, %914, %cst_297 [1] : vector<2x32xf32> to vector<2xf32>
    %916 = vector.shape_cast %915 : vector<2xf32> to vector<2x1xf32>
    %cst_298 = arith.constant 3.200000e+01 : f32
    %917 = vector.broadcast %cst_298 : f32 to vector<2x1xf32>
    %918 = arith.divf %916, %917 : vector<2x1xf32>
    %919 = vector.broadcast %918 : vector<2x1xf32> to vector<2x32xf32>
    %920 = arith.subf %914, %919 : vector<2x32xf32>
    %921 = arith.mulf %920, %920 : vector<2x32xf32>
    %cst_299 = arith.constant dense<0.000000e+00> : vector<2xf32>
    %922 = vector.multi_reduction <add>, %921, %cst_299 [1] : vector<2x32xf32> to vector<2xf32>
    %923 = vector.shape_cast %922 : vector<2xf32> to vector<2x1xf32>
    %cst_300 = arith.constant 3.200000e+01 : f32
    %924 = vector.broadcast %cst_300 : f32 to vector<2x1xf32>
    %925 = arith.divf %923, %924 : vector<2x1xf32>
    %cst_301 = arith.constant 9.99999974E-6 : f32
    %926 = vector.broadcast %cst_301 : f32 to vector<2x1xf32>
    %927 = arith.addf %925, %926 : vector<2x1xf32>
    %928 = math.rsqrt %927 : vector<2x1xf32>
    %929 = vector.broadcast %928 : vector<2x1xf32> to vector<2x32xf32>
    %930 = arith.mulf %920, %929 : vector<2x32xf32>
    %931 = vector.extract_strided_slice %909 {offsets = [1, 0], sizes = [1, 32], strides = [1, 1]} : vector<3x32xf32> to vector<1x32xf32>
    %932 = vector.broadcast %931 : vector<1x32xf32> to vector<2x32xf32>
    %933 = arith.mulf %930, %932 : vector<2x32xf32>
    %934 = vector.extract_strided_slice %909 {offsets = [2, 0], sizes = [1, 32], strides = [1, 1]} : vector<3x32xf32> to vector<1x32xf32>
    %935 = vector.broadcast %934 : vector<1x32xf32> to vector<2x32xf32>
    %936 = arith.addf %933, %935 : vector<2x32xf32>
    %cst_302 = arith.constant 0.000000e+00 : f32
    %937 = vector.broadcast %cst_302 : f32 to vector<2x32xf32>
    %938 = arith.maximumf %936, %937 : vector<2x32xf32>
    %c18 = arith.constant 18 : index
    %c0_303 = arith.constant 0 : index
    %c0_304 = arith.constant 0 : index
    %939 = vector.load %arg4[%c18, %c0_303, %c0_304] : memref<25x32x32xbf16, #tpu.memory_space<vmem>>, vector<1x32x32xbf16>
    %940 = vector.shape_cast %939 : vector<1x32x32xbf16> to vector<32x32xbf16>
    %c18_305 = arith.constant 18 : index
    %c0_306 = arith.constant 0 : index
    %c0_307 = arith.constant 0 : index
    %941 = vector.load %arg5[%c18_305, %c0_306, %c0_307] : memref<25x3x32xf32, #tpu.memory_space<vmem>>, vector<1x3x32xf32>
    %942 = vector.shape_cast %941 : vector<1x3x32xf32> to vector<3x32xf32>
    %943 = arith.truncf %938 : vector<2x32xf32> to vector<2x32xbf16>
    %cst_308 = arith.constant dense<0.000000e+00> : vector<2x32xf32>
    %944 = tpu.matmul %943, %940, %cst_308 {dimension_numbers = #tpu.dot_dimension_numbers<[1], [0], [0], [1], [0, 0, 1, 1], [], []>} : vector<2x32xbf16>, vector<32x32xbf16>, vector<2x32xf32> -> vector<2x32xf32>
    %945 = vector.extract_strided_slice %942 {offsets = [0, 0], sizes = [1, 32], strides = [1, 1]} : vector<3x32xf32> to vector<1x32xf32>
    %946 = vector.broadcast %945 : vector<1x32xf32> to vector<2x32xf32>
    %947 = arith.addf %944, %946 : vector<2x32xf32>
    %cst_309 = arith.constant 0.000000e+00 : f32
    %948 = vector.broadcast %cst_309 : f32 to vector<2x32xf32>
    %949 = arith.maximumf %947, %948 : vector<2x32xf32>
    %c19 = arith.constant 19 : index
    %c0_310 = arith.constant 0 : index
    %c0_311 = arith.constant 0 : index
    %950 = vector.load %arg5[%c19, %c0_310, %c0_311] : memref<25x3x32xf32, #tpu.memory_space<vmem>>, vector<1x3x32xf32>
    %951 = vector.shape_cast %950 : vector<1x3x32xf32> to vector<3x32xf32>
    %c19_312 = arith.constant 19 : index
    %c0_313 = arith.constant 0 : index
    %c0_314 = arith.constant 0 : index
    %952 = vector.load %arg4[%c19_312, %c0_313, %c0_314] : memref<25x32x32xbf16, #tpu.memory_space<vmem>>, vector<1x32x32xbf16>
    %953 = vector.shape_cast %952 : vector<1x32x32xbf16> to vector<32x32xbf16>
    %954 = arith.truncf %905 : vector<2x32xf32> to vector<2x32xbf16>
    %cst_315 = arith.constant dense<0.000000e+00> : vector<2x32xf32>
    %955 = tpu.matmul %954, %953, %cst_315 {dimension_numbers = #tpu.dot_dimension_numbers<[1], [0], [0], [1], [0, 0, 1, 1], [], []>} : vector<2x32xbf16>, vector<32x32xbf16>, vector<2x32xf32> -> vector<2x32xf32>
    %c20 = arith.constant 20 : index
    %c0_316 = arith.constant 0 : index
    %c0_317 = arith.constant 0 : index
    %956 = vector.load %arg4[%c20, %c0_316, %c0_317] : memref<25x32x32xbf16, #tpu.memory_space<vmem>>, vector<1x32x32xbf16>
    %957 = vector.shape_cast %956 : vector<1x32x32xbf16> to vector<32x32xbf16>
    %958 = arith.truncf %949 : vector<2x32xf32> to vector<2x32xbf16>
    %cst_318 = arith.constant dense<0.000000e+00> : vector<2x32xf32>
    %959 = tpu.matmul %958, %957, %cst_318 {dimension_numbers = #tpu.dot_dimension_numbers<[1], [0], [0], [1], [0, 0, 1, 1], [], []>} : vector<2x32xbf16>, vector<32x32xbf16>, vector<2x32xf32> -> vector<2x32xf32>
    %960 = arith.addf %955, %959 : vector<2x32xf32>
    %961 = vector.extract_strided_slice %951 {offsets = [0, 0], sizes = [1, 32], strides = [1, 1]} : vector<3x32xf32> to vector<1x32xf32>
    %962 = vector.broadcast %961 : vector<1x32xf32> to vector<2x32xf32>
    %963 = arith.addf %960, %962 : vector<2x32xf32>
    %cst_319 = arith.constant dense<0.000000e+00> : vector<2xf32>
    %964 = vector.multi_reduction <add>, %963, %cst_319 [1] : vector<2x32xf32> to vector<2xf32>
    %965 = vector.shape_cast %964 : vector<2xf32> to vector<2x1xf32>
    %cst_320 = arith.constant 3.200000e+01 : f32
    %966 = vector.broadcast %cst_320 : f32 to vector<2x1xf32>
    %967 = arith.divf %965, %966 : vector<2x1xf32>
    %968 = vector.broadcast %967 : vector<2x1xf32> to vector<2x32xf32>
    %969 = arith.subf %963, %968 : vector<2x32xf32>
    %970 = arith.mulf %969, %969 : vector<2x32xf32>
    %cst_321 = arith.constant dense<0.000000e+00> : vector<2xf32>
    %971 = vector.multi_reduction <add>, %970, %cst_321 [1] : vector<2x32xf32> to vector<2xf32>
    %972 = vector.shape_cast %971 : vector<2xf32> to vector<2x1xf32>
    %cst_322 = arith.constant 3.200000e+01 : f32
    %973 = vector.broadcast %cst_322 : f32 to vector<2x1xf32>
    %974 = arith.divf %972, %973 : vector<2x1xf32>
    %cst_323 = arith.constant 9.99999974E-6 : f32
    %975 = vector.broadcast %cst_323 : f32 to vector<2x1xf32>
    %976 = arith.addf %974, %975 : vector<2x1xf32>
    %977 = math.rsqrt %976 : vector<2x1xf32>
    %978 = vector.broadcast %977 : vector<2x1xf32> to vector<2x32xf32>
    %979 = arith.mulf %969, %978 : vector<2x32xf32>
    %980 = vector.extract_strided_slice %951 {offsets = [1, 0], sizes = [1, 32], strides = [1, 1]} : vector<3x32xf32> to vector<1x32xf32>
    %981 = vector.broadcast %980 : vector<1x32xf32> to vector<2x32xf32>
    %982 = arith.mulf %979, %981 : vector<2x32xf32>
    %983 = vector.extract_strided_slice %951 {offsets = [2, 0], sizes = [1, 32], strides = [1, 1]} : vector<3x32xf32> to vector<1x32xf32>
    %984 = vector.broadcast %983 : vector<1x32xf32> to vector<2x32xf32>
    %985 = arith.addf %982, %984 : vector<2x32xf32>
    %cst_324 = arith.constant 0.000000e+00 : f32
    %986 = vector.broadcast %cst_324 : f32 to vector<2x32xf32>
    %987 = arith.maximumf %985, %986 : vector<2x32xf32>
    %c21 = arith.constant 21 : index
    %c0_325 = arith.constant 0 : index
    %c0_326 = arith.constant 0 : index
    %988 = vector.load %arg4[%c21, %c0_325, %c0_326] : memref<25x32x32xbf16, #tpu.memory_space<vmem>>, vector<1x32x32xbf16>
    %989 = vector.shape_cast %988 : vector<1x32x32xbf16> to vector<32x32xbf16>
    %c21_327 = arith.constant 21 : index
    %c0_328 = arith.constant 0 : index
    %c0_329 = arith.constant 0 : index
    %990 = vector.load %arg5[%c21_327, %c0_328, %c0_329] : memref<25x3x32xf32, #tpu.memory_space<vmem>>, vector<1x3x32xf32>
    %991 = vector.shape_cast %990 : vector<1x3x32xf32> to vector<3x32xf32>
    %992 = arith.truncf %987 : vector<2x32xf32> to vector<2x32xbf16>
    %cst_330 = arith.constant dense<0.000000e+00> : vector<2x32xf32>
    %993 = tpu.matmul %992, %989, %cst_330 {dimension_numbers = #tpu.dot_dimension_numbers<[1], [0], [0], [1], [0, 0, 1, 1], [], []>} : vector<2x32xbf16>, vector<32x32xbf16>, vector<2x32xf32> -> vector<2x32xf32>
    %994 = vector.extract_strided_slice %991 {offsets = [0, 0], sizes = [1, 32], strides = [1, 1]} : vector<3x32xf32> to vector<1x32xf32>
    %995 = vector.broadcast %994 : vector<1x32xf32> to vector<2x32xf32>
    %996 = arith.addf %993, %995 : vector<2x32xf32>
    %cst_331 = arith.constant dense<0.000000e+00> : vector<2xf32>
    %997 = vector.multi_reduction <add>, %996, %cst_331 [1] : vector<2x32xf32> to vector<2xf32>
    %998 = vector.shape_cast %997 : vector<2xf32> to vector<2x1xf32>
    %cst_332 = arith.constant 3.200000e+01 : f32
    %999 = vector.broadcast %cst_332 : f32 to vector<2x1xf32>
    %1000 = arith.divf %998, %999 : vector<2x1xf32>
    %1001 = vector.broadcast %1000 : vector<2x1xf32> to vector<2x32xf32>
    %1002 = arith.subf %996, %1001 : vector<2x32xf32>
    %1003 = arith.mulf %1002, %1002 : vector<2x32xf32>
    %cst_333 = arith.constant dense<0.000000e+00> : vector<2xf32>
    %1004 = vector.multi_reduction <add>, %1003, %cst_333 [1] : vector<2x32xf32> to vector<2xf32>
    %1005 = vector.shape_cast %1004 : vector<2xf32> to vector<2x1xf32>
    %cst_334 = arith.constant 3.200000e+01 : f32
    %1006 = vector.broadcast %cst_334 : f32 to vector<2x1xf32>
    %1007 = arith.divf %1005, %1006 : vector<2x1xf32>
    %cst_335 = arith.constant 9.99999974E-6 : f32
    %1008 = vector.broadcast %cst_335 : f32 to vector<2x1xf32>
    %1009 = arith.addf %1007, %1008 : vector<2x1xf32>
    %1010 = math.rsqrt %1009 : vector<2x1xf32>
    %1011 = vector.broadcast %1010 : vector<2x1xf32> to vector<2x32xf32>
    %1012 = arith.mulf %1002, %1011 : vector<2x32xf32>
    %1013 = vector.extract_strided_slice %991 {offsets = [1, 0], sizes = [1, 32], strides = [1, 1]} : vector<3x32xf32> to vector<1x32xf32>
    %1014 = vector.broadcast %1013 : vector<1x32xf32> to vector<2x32xf32>
    %1015 = arith.mulf %1012, %1014 : vector<2x32xf32>
    %1016 = vector.extract_strided_slice %991 {offsets = [2, 0], sizes = [1, 32], strides = [1, 1]} : vector<3x32xf32> to vector<1x32xf32>
    %1017 = vector.broadcast %1016 : vector<1x32xf32> to vector<2x32xf32>
    %1018 = arith.addf %1015, %1017 : vector<2x32xf32>
    %cst_336 = arith.constant 0.000000e+00 : f32
    %1019 = vector.broadcast %cst_336 : f32 to vector<2x32xf32>
    %1020 = arith.maximumf %1018, %1019 : vector<2x32xf32>
    %c22 = arith.constant 22 : index
    %c0_337 = arith.constant 0 : index
    %c0_338 = arith.constant 0 : index
    %1021 = vector.load %arg4[%c22, %c0_337, %c0_338] : memref<25x32x32xbf16, #tpu.memory_space<vmem>>, vector<1x32x32xbf16>
    %1022 = vector.shape_cast %1021 : vector<1x32x32xbf16> to vector<32x32xbf16>
    %c22_339 = arith.constant 22 : index
    %c0_340 = arith.constant 0 : index
    %c0_341 = arith.constant 0 : index
    %1023 = vector.load %arg5[%c22_339, %c0_340, %c0_341] : memref<25x3x32xf32, #tpu.memory_space<vmem>>, vector<1x3x32xf32>
    %1024 = vector.shape_cast %1023 : vector<1x3x32xf32> to vector<3x32xf32>
    %1025 = arith.truncf %1020 : vector<2x32xf32> to vector<2x32xbf16>
    %cst_342 = arith.constant dense<0.000000e+00> : vector<2x32xf32>
    %1026 = tpu.matmul %1025, %1022, %cst_342 {dimension_numbers = #tpu.dot_dimension_numbers<[1], [0], [0], [1], [0, 0, 1, 1], [], []>} : vector<2x32xbf16>, vector<32x32xbf16>, vector<2x32xf32> -> vector<2x32xf32>
    %1027 = vector.extract_strided_slice %1024 {offsets = [0, 0], sizes = [1, 32], strides = [1, 1]} : vector<3x32xf32> to vector<1x32xf32>
    %1028 = vector.broadcast %1027 : vector<1x32xf32> to vector<2x32xf32>
    %1029 = arith.addf %1026, %1028 : vector<2x32xf32>
    %cst_343 = arith.constant dense<0.000000e+00> : vector<2xf32>
    %1030 = vector.multi_reduction <add>, %1029, %cst_343 [1] : vector<2x32xf32> to vector<2xf32>
    %1031 = vector.shape_cast %1030 : vector<2xf32> to vector<2x1xf32>
    %cst_344 = arith.constant 3.200000e+01 : f32
    %1032 = vector.broadcast %cst_344 : f32 to vector<2x1xf32>
    %1033 = arith.divf %1031, %1032 : vector<2x1xf32>
    %1034 = vector.broadcast %1033 : vector<2x1xf32> to vector<2x32xf32>
    %1035 = arith.subf %1029, %1034 : vector<2x32xf32>
    %1036 = arith.mulf %1035, %1035 : vector<2x32xf32>
    %cst_345 = arith.constant dense<0.000000e+00> : vector<2xf32>
    %1037 = vector.multi_reduction <add>, %1036, %cst_345 [1] : vector<2x32xf32> to vector<2xf32>
    %1038 = vector.shape_cast %1037 : vector<2xf32> to vector<2x1xf32>
    %cst_346 = arith.constant 3.200000e+01 : f32
    %1039 = vector.broadcast %cst_346 : f32 to vector<2x1xf32>
    %1040 = arith.divf %1038, %1039 : vector<2x1xf32>
    %cst_347 = arith.constant 9.99999974E-6 : f32
    %1041 = vector.broadcast %cst_347 : f32 to vector<2x1xf32>
    %1042 = arith.addf %1040, %1041 : vector<2x1xf32>
    %1043 = math.rsqrt %1042 : vector<2x1xf32>
    %1044 = vector.broadcast %1043 : vector<2x1xf32> to vector<2x32xf32>
    %1045 = arith.mulf %1035, %1044 : vector<2x32xf32>
    %1046 = vector.extract_strided_slice %1024 {offsets = [1, 0], sizes = [1, 32], strides = [1, 1]} : vector<3x32xf32> to vector<1x32xf32>
    %1047 = vector.broadcast %1046 : vector<1x32xf32> to vector<2x32xf32>
    %1048 = arith.mulf %1045, %1047 : vector<2x32xf32>
    %1049 = vector.extract_strided_slice %1024 {offsets = [2, 0], sizes = [1, 32], strides = [1, 1]} : vector<3x32xf32> to vector<1x32xf32>
    %1050 = vector.broadcast %1049 : vector<1x32xf32> to vector<2x32xf32>
    %1051 = arith.addf %1048, %1050 : vector<2x32xf32>
    %cst_348 = arith.constant 0.000000e+00 : f32
    %1052 = vector.broadcast %cst_348 : f32 to vector<2x32xf32>
    %1053 = arith.maximumf %1051, %1052 : vector<2x32xf32>
    %c23 = arith.constant 23 : index
    %c0_349 = arith.constant 0 : index
    %c0_350 = arith.constant 0 : index
    %1054 = vector.load %arg4[%c23, %c0_349, %c0_350] : memref<25x32x32xbf16, #tpu.memory_space<vmem>>, vector<1x32x32xbf16>
    %1055 = vector.shape_cast %1054 : vector<1x32x32xbf16> to vector<32x32xbf16>
    %c23_351 = arith.constant 23 : index
    %c0_352 = arith.constant 0 : index
    %c0_353 = arith.constant 0 : index
    %1056 = vector.load %arg5[%c23_351, %c0_352, %c0_353] : memref<25x3x32xf32, #tpu.memory_space<vmem>>, vector<1x3x32xf32>
    %1057 = vector.shape_cast %1056 : vector<1x3x32xf32> to vector<3x32xf32>
    %1058 = arith.truncf %1053 : vector<2x32xf32> to vector<2x32xbf16>
    %cst_354 = arith.constant dense<0.000000e+00> : vector<2x32xf32>
    %1059 = tpu.matmul %1058, %1055, %cst_354 {dimension_numbers = #tpu.dot_dimension_numbers<[1], [0], [0], [1], [0, 0, 1, 1], [], []>} : vector<2x32xbf16>, vector<32x32xbf16>, vector<2x32xf32> -> vector<2x32xf32>
    %1060 = vector.extract_strided_slice %1057 {offsets = [0, 0], sizes = [1, 32], strides = [1, 1]} : vector<3x32xf32> to vector<1x32xf32>
    %1061 = vector.broadcast %1060 : vector<1x32xf32> to vector<2x32xf32>
    %1062 = arith.addf %1059, %1061 : vector<2x32xf32>
    %cst_355 = arith.constant dense<0.000000e+00> : vector<2xf32>
    %1063 = vector.multi_reduction <add>, %1062, %cst_355 [1] : vector<2x32xf32> to vector<2xf32>
    %1064 = vector.shape_cast %1063 : vector<2xf32> to vector<2x1xf32>
    %cst_356 = arith.constant 3.200000e+01 : f32
    %1065 = vector.broadcast %cst_356 : f32 to vector<2x1xf32>
    %1066 = arith.divf %1064, %1065 : vector<2x1xf32>
    %1067 = vector.broadcast %1066 : vector<2x1xf32> to vector<2x32xf32>
    %1068 = arith.subf %1062, %1067 : vector<2x32xf32>
    %1069 = arith.mulf %1068, %1068 : vector<2x32xf32>
    %cst_357 = arith.constant dense<0.000000e+00> : vector<2xf32>
    %1070 = vector.multi_reduction <add>, %1069, %cst_357 [1] : vector<2x32xf32> to vector<2xf32>
    %1071 = vector.shape_cast %1070 : vector<2xf32> to vector<2x1xf32>
    %cst_358 = arith.constant 3.200000e+01 : f32
    %1072 = vector.broadcast %cst_358 : f32 to vector<2x1xf32>
    %1073 = arith.divf %1071, %1072 : vector<2x1xf32>
    %cst_359 = arith.constant 9.99999974E-6 : f32
    %1074 = vector.broadcast %cst_359 : f32 to vector<2x1xf32>
    %1075 = arith.addf %1073, %1074 : vector<2x1xf32>
    %1076 = math.rsqrt %1075 : vector<2x1xf32>
    %1077 = vector.broadcast %1076 : vector<2x1xf32> to vector<2x32xf32>
    %1078 = arith.mulf %1068, %1077 : vector<2x32xf32>
    %1079 = vector.extract_strided_slice %1057 {offsets = [1, 0], sizes = [1, 32], strides = [1, 1]} : vector<3x32xf32> to vector<1x32xf32>
    %1080 = vector.broadcast %1079 : vector<1x32xf32> to vector<2x32xf32>
    %1081 = arith.mulf %1078, %1080 : vector<2x32xf32>
    %1082 = vector.extract_strided_slice %1057 {offsets = [2, 0], sizes = [1, 32], strides = [1, 1]} : vector<3x32xf32> to vector<1x32xf32>
    %1083 = vector.broadcast %1082 : vector<1x32xf32> to vector<2x32xf32>
    %1084 = arith.addf %1081, %1083 : vector<2x32xf32>
    %cst_360 = arith.constant 0.000000e+00 : f32
    %1085 = vector.broadcast %cst_360 : f32 to vector<2x32xf32>
    %1086 = arith.maximumf %1084, %1085 : vector<2x32xf32>
    %c24 = arith.constant 24 : index
    %c0_361 = arith.constant 0 : index
    %c0_362 = arith.constant 0 : index
    %1087 = vector.load %arg4[%c24, %c0_361, %c0_362] : memref<25x32x32xbf16, #tpu.memory_space<vmem>>, vector<1x32x32xbf16>
    %1088 = vector.shape_cast %1087 : vector<1x32x32xbf16> to vector<32x32xbf16>
    %c24_363 = arith.constant 24 : index
    %c0_364 = arith.constant 0 : index
    %c0_365 = arith.constant 0 : index
    %1089 = vector.load %arg5[%c24_363, %c0_364, %c0_365] : memref<25x3x32xf32, #tpu.memory_space<vmem>>, vector<1x3x32xf32>
    %1090 = vector.shape_cast %1089 : vector<1x3x32xf32> to vector<3x32xf32>
    %1091 = arith.truncf %1086 : vector<2x32xf32> to vector<2x32xbf16>
    %cst_366 = arith.constant dense<0.000000e+00> : vector<2x32xf32>
    %1092 = tpu.matmul %1091, %1088, %cst_366 {dimension_numbers = #tpu.dot_dimension_numbers<[1], [0], [0], [1], [0, 0, 1, 1], [], []>} : vector<2x32xbf16>, vector<32x32xbf16>, vector<2x32xf32> -> vector<2x32xf32>
    %1093 = vector.extract_strided_slice %1090 {offsets = [0, 0], sizes = [1, 32], strides = [1, 1]} : vector<3x32xf32> to vector<1x32xf32>
    %1094 = vector.broadcast %1093 : vector<1x32xf32> to vector<2x32xf32>
    %1095 = arith.addf %1092, %1094 : vector<2x32xf32>
    %cst_367 = arith.constant dense<0.000000e+00> : vector<2xf32>
    %1096 = vector.multi_reduction <add>, %1095, %cst_367 [1] : vector<2x32xf32> to vector<2xf32>
    %1097 = vector.shape_cast %1096 : vector<2xf32> to vector<2x1xf32>
    %cst_368 = arith.constant 3.200000e+01 : f32
    %1098 = vector.broadcast %cst_368 : f32 to vector<2x1xf32>
    %1099 = arith.divf %1097, %1098 : vector<2x1xf32>
    %1100 = vector.broadcast %1099 : vector<2x1xf32> to vector<2x32xf32>
    %1101 = arith.subf %1095, %1100 : vector<2x32xf32>
    %1102 = arith.mulf %1101, %1101 : vector<2x32xf32>
    %cst_369 = arith.constant dense<0.000000e+00> : vector<2xf32>
    %1103 = vector.multi_reduction <add>, %1102, %cst_369 [1] : vector<2x32xf32> to vector<2xf32>
    %1104 = vector.shape_cast %1103 : vector<2xf32> to vector<2x1xf32>
    %cst_370 = arith.constant 3.200000e+01 : f32
    %1105 = vector.broadcast %cst_370 : f32 to vector<2x1xf32>
    %1106 = arith.divf %1104, %1105 : vector<2x1xf32>
    %cst_371 = arith.constant 9.99999974E-6 : f32
    %1107 = vector.broadcast %cst_371 : f32 to vector<2x1xf32>
    %1108 = arith.addf %1106, %1107 : vector<2x1xf32>
    %1109 = math.rsqrt %1108 : vector<2x1xf32>
    %1110 = vector.broadcast %1109 : vector<2x1xf32> to vector<2x32xf32>
    %1111 = arith.mulf %1101, %1110 : vector<2x32xf32>
    %1112 = vector.extract_strided_slice %1090 {offsets = [1, 0], sizes = [1, 32], strides = [1, 1]} : vector<3x32xf32> to vector<1x32xf32>
    %1113 = vector.broadcast %1112 : vector<1x32xf32> to vector<2x32xf32>
    %1114 = arith.mulf %1111, %1113 : vector<2x32xf32>
    %1115 = vector.extract_strided_slice %1090 {offsets = [2, 0], sizes = [1, 32], strides = [1, 1]} : vector<3x32xf32> to vector<1x32xf32>
    %1116 = vector.broadcast %1115 : vector<1x32xf32> to vector<2x32xf32>
    %1117 = arith.addf %1114, %1116 : vector<2x32xf32>
    %cst_372 = arith.constant 0.000000e+00 : f32
    %1118 = vector.broadcast %cst_372 : f32 to vector<2x32xf32>
    %1119 = arith.maximumf %1117, %1118 : vector<2x32xf32>
    %c0_373 = arith.constant 0 : index
    %c0_374 = arith.constant 0 : index
    %1120 = vector.load %arg12[%c0_373, %c0_374] : memref<2x32xf32, #tpu.memory_space<vmem>>, vector<2x32xf32>
    tpu.vector_store %arg12[%c0_373, %c0_374], %1119 {strides = array<i32>} : memref<2x32xf32, #tpu.memory_space<vmem>>, vector<2x32xf32>,
    return
  }
}

</mosaic_0001>

<bundles_post_ra>
// kernel: _forward_impl.1
= control target key start
LH: loop header
LB: loop body
LE: loop exit
PB: predicated region body
PF: predicated region fallthrough
CT: control target
= control target key end

     0   :  { %17 = vsyncpa [#allocation5], 0  ;;  %s5209_s0 = inlined_call_operand.vmem [shape: f32[2,8], index: 0, kind: input, shape index: {}]   ;;  %s5210_s1 = inlined_call_operand.vmem [shape: f32[16,10], index: 1, kind: input, shape index: {}]   ;;  %s5211_s2 = inlined_call_operand.vmem [shape: s32[2], index: 2, kind: input, shape index: {}]   ;;  %s5212_s3 = inlined_call_operand.vmem [shape: s32[16,1], index: 3, kind: input, shape index: {}]   ;;  %s5213_s4 = inlined_call_operand.hbm [shape: bf16[25,32,32], index: 4, kind: input, shape index: {}]   ;;  %s5214_s5 = inlined_call_operand.vmem [shape: f32[25,3,32], index: 5, kind: input, shape index: {}]   ;;  %s5215_s6 = inlined_call_operand.vmem [shape: bf16[2,32,96], index: 6, kind: input, shape index: {}]   ;;  %s5216_s7 = inlined_call_operand.vmem [shape: f32[5,96], index: 7, kind: input, shape index: {}]   ;;  %s5217_s8 = inlined_call_operand.vmem [shape: bf16[96,64], index: 8, kind: input, shape index: {}]   ;;  %s5218_s9 = inlined_call_operand.vmem [shape: f32[2,3,64], index: 9, kind: input, shape index: {}]   ;;  %s5219_s10 = inlined_call_operand.vmem [shape: bf16[160,128], index: 10, kind: input, shape index: {}]   ;;  %s5220_s11 = inlined_call_operand.vmem [shape: f32[2,3,128], index: 11, kind: input, shape index: {}]   ;;  %s5221_s12 = inlined_call_operand.hbm [shape: f32[2,32], index: 12, kind: output, shape index: {}]  }
   0x1   :  { %18 = vsyncpa [#allocation3], 0 }
   0x2   :  { %19 = vsyncpa [#allocation4], 0  ;;  %s29_s23 = sshll.u32 %s5211_s2, 4  ;;  %s39_s26 = sshll.u32 %s5213_s4, 4  ;;  %s30_s23 = int_to_ptr.vmem [resolvable:$true] %s29_s23  ;;  %s40_s26 = int_to_ptr.hbm [resolvable:$true] %s39_s26 }
   0x3   :  { %s4043_s27 = smov [#allocation2]   ;;  %s4044_s28 = smov [#allocation6]  }
   0x4   :  { %32 = dma.vmem_to_smem %s30_s23, 16, %s4043_s27, [#allocation5]  }
   0x5   :  { %s41_s29 = sshll.u32 %s4044_s28, 4  ;;  %s4045_s30 = smov 64   ;;  %s42_s29 = int_to_ptr.vmem [resolvable:$true] %s41_s29 }
   0x6   :  { %s4046_s13 = smov 4  }
   0x7   :  { %47 = dma.hbm_to_vmem [thread:$0]  %s40_s26, 6400, %s42_s29, [#allocation3], %s4045_s30, %s4045_s30, %s4046_s13  }
   0x8   :  { %4037 = dma.done.wait [#allocation5], 16  }
   0x9   :  { %4038 = vsyncadd [#allocation5], 4294967280 }
   0xa   :  { %4039 = dma.done.wait [#allocation3], 6400  }
   0xb   :  { %4040 = vsyncadd [#allocation3], 4294960896 }
   0xc   :  { %70 = sfence }
   0xd   :  { %v4141_v0 = vld [vmem:[%s5215_s6 + $0x8] sm:$0xff]  ;;  %v4146_v1 = vld [vmem:[%s5210_s1] sm:$0xff]  ;;  %v4047_v3 = vmov 1   ;;  %v4048_v4 = vmov 0   ;;  %s4049_s28 = smov 96   ;;  %vm83_vm8 = vcmask 1043456  }
   0xe   :  { %v4151_v2 = vld [vmem:[%s5215_s6] sm:$0xff]  ;;  %3808 = vset.pattern.permute.xlu1 %v4047_v3  ;;  %3807 = vset.pattern.permute.xlu0 %v4048_v4  ;;  %v4161_v5 = vld [vmem:[%s5210_s1 + $0x8] sm:$0xff]  ;;  %vm79_vm9 = vcmask 64512   ;;  %vm5222_vm10 = vcmask 254976   ;;  %vm5224_vm11 = vcmask 261120   ;;  %s4060_s2 = smov 112  }
   0xf   :  { %328 = vmatpush.bf16.msra.mxu3 %v4141_v0  ;;  %291 = vperm.xlu1 %3808, %v4146_v1   ;;  %v4171_v6 = vld [vmem:[%s5216_s7 + $0x1] ss:$0 sm:$0xff]  ;;  %v4180_v13 = vld [vmem:[%s5216_s7 + $0x3] ss:$0 sm:$0xff]  ;;  %v4185_v14 = vld [vmem:[%s5216_s7 + $0x2] ss:$0 sm:$0xff] }
  0x10   :  { %279 = vperm.xlu0 %3807, %v4146_v1   ;;  %v4192_v18 = vld [vmem:[%s5216_s7] ss:$0 sm:$0xff]  ;;  %s4452_s14 = sld [smem:[#allocation2 + $0x1]]  ;;  %s4061_s4 = smov 48  }
  0x11   :  { %v75_v3 = vld [vmem:[#allocation6] sm:$0xf] }
  0x13   :  { %329 = vmatpush.bf16.msra.mxu3 %v4151_v2 }
  0x16   :  { %330 = vmatmul.bf16.vlgmr.msra.gmra.mxu3 %v4048_v4 }
  0x17   :  { %876 = vmatpush.bf16.msrb.mxu3 %v4141_v0  ;;  %295 = vperm.xlu1 %3808, %v4161_v5  }
  0x18   :  { %284 = vperm.xlu0 %3807, %v4161_v5  }
  0x1b   :  { %877 = vmatpush.bf16.msrb.mxu3 %v4151_v2 }
  0x81   :  { %v292_v11 = vpop.permute.xlu1 %291 }
  0x82   :  { %v280_v12 = vpop.permute.xlu0 %279  ;;  %v299_v15 = vmul.f32 %v4180_v13, %v292_v11 }
  0x83   :  { %v288_v16 = vmul.f32 %v4185_v14, %v280_v12 }
  0x85   :  { %v301_v17 = vadd.f32 %v299_v15, %v288_v16 }
  0x87   :  { %v304_v21 = vadd.f32 %v4192_v18, %v301_v17 }
  0x89   :  { %v296_v19 = vpop.permute.xlu1 %295 }
  0x8a   :  { %v285_v20 = vpop.permute.xlu0 %284  ;;  %v300_v22 = vmul.f32 %v4180_v13, %v296_v19 }
  0x8b   :  { %v289_v23 = vmul.f32 %v4185_v14, %v285_v20 }
  0x8d   :  { %v302_v25 = vadd.f32 %v300_v22, %v289_v23 }
  0x8f   :  { %v305_v27 = vadd.f32 %v4192_v18, %v302_v25  ;;  %v4219_v25 = vld [vmem:[%s5214_s5] sm:$0x7] }
  0x99   :  { %v331_v7 = vpop.f32.mrf.mxu3 }
  0x9a   :  { %v332_v8 = vadd.f32 %v4171_v6, %v331_v7  ;;  %v74_v7 = vld [vmem:[%s5209_s0] sm:$0x3]  ;;  %s4059_s0 = smov 80  }
  0x9c   :  { %378 = vrot.lane.b32.xlu2 %v332_v8, %s4045_s30  ;;  %v336_v24 = vadd.f32 %v332_v8, %v304_v21  ;;  %v85_v8 = vsel %vm83_vm8, %v75_v3, 0 }
  0x9d   :  { %94 = vmatpush.bf16.msra.mxu0 %v85_v8 }
  0x9e   :  { %v3294_v26 = vmul.f32 -1.442695, %v336_v24 }
  0xa0   :  { %3833 = vpow2.f32 %v3294_v26  ;;  %v78_v26 = vperm.slane %v4219_v25, 0 }
  0xa1   :  { %v333_v9 = vpop.f32.mrf.mxu3  ;;  %465 = vmatpush.bf16.msrb.mxu0 %v4141_v0 }
  0xa2   :  { %v334_v10 = vadd.f32 %v4171_v6, %v333_v9  ;;  %v77_v9 = vpack.c.bf16 %v74_v7, %v74_v7 }
  0xa4   :  { %380 = vrot.lane.b32.xlu2 %v334_v10, %s4045_s30  ;;  %v337_v28 = vadd.f32 %v334_v10, %v305_v27  ;;  %3263 = vmatmul.msk.bf16.vlgmr.msra.gmra.mxu0 %vm79_vm9, %v77_v9  ;;  %v4050_v10 = vmov 2  }
  0xa5   :  { %466 = vmatpush.bf16.msrb.mxu0 %v4151_v2  ;;  %3810 = vset.pattern.permute.xlu0 %v4050_v10 }
  0xa6   :  { %v3295_v29 = vmul.f32 -1.442695, %v337_v28  ;;  %v3834_v30 = vpop.eup %3833  ;;  %3809 = vset.pattern.permute.xlu2 %v4050_v10 }
  0xa7   :  { %v344_v31 = vadd.f32 1.0, %v3834_v30 }
  0xa8   :  { %3835 = vpow2.f32 %v3295_v29 }
  0xa9   :  { %3837 = vrcp.f32 %v344_v31  ;;  %v357_v42 = vand.u32 2147483648, %v344_v31  ;;  %vm351_vm1 = vweird.f32 %v344_v31  ;;  %v355_v43 = vand.u32 2147483647, %v344_v31 }
  0xab   :  { %v358_v46 = vor.u32 1.1754944e-38, %v357_v42  ;;  %vm356_vm3 = vcmp.eq.f32.partialorder %v355_v43, 8.507059e+37 }
  0xae   :  { %v3836_v32 = vpop.eup %3835 }
  0xaf   :  { %v345_v33 = vadd.f32 1.0, %v3836_v32  ;;  %v3838_v34 = vpop.eup %3837 }
  0xb0   :  { %v347_v35 = vmul.f32 %v3838_v34, %v344_v31  ;;  %vm352_vm0 = vweird.f32 %v3838_v34  ;;  %v4051_v31 = vmov 3  }
  0xb1   :  { %3839 = vrcp.f32 %v345_v33  ;;  %vm353_vm2 = vmor %vm351_vm1, %vm352_vm0  ;;  %v372_v51 = vand.u32 2147483648, %v345_v33  ;;  %vm366_vm5 = vweird.f32 %v345_v33  ;;  %v370_v52 = vand.u32 2147483647, %v345_v33  ;;  %3811 = vset.pattern.permute.xlu1 %v4051_v31 }
  0xb2   :  { %v348_v36 = vsub.f32 1.0, %v347_v35 }
  0xb3   :  { %v373_v54 = vor.u32 1.1754944e-38, %v372_v51  ;;  %vm371_vm7 = vcmp.eq.f32.partialorder %v370_v52, 8.507059e+37 }
  0xb4   :  { %v349_v38 = vmul.f32 %v3838_v34, %v348_v36 }
  0xb6   :  { %v350_v40 = vadd.f32 %v3838_v34, %v349_v38 }
  0xb7   :  { %v3840_v37 = vpop.eup %3839 }
  0xb8   :  { %v362_v39 = vmul.f32 %v3840_v37, %v345_v33  ;;  %v354_v44 = vsel %vm353_vm2, %v3838_v34, %v350_v40  ;;  %vm367_vm4 = vweird.f32 %v3840_v37 }
  0xb9   :  { %v359_v48 = vsel %vm356_vm3, %v358_v46, %v354_v44  ;;  %vm368_vm6 = vmor %vm366_vm5, %vm367_vm4 }
  0xba   :  { %v363_v41 = vsub.f32 1.0, %v362_v39  ;;  %v398_v12 = vsub.f32 1.0, %v359_v48  ;;  %v410_v19 = vmul.f32 0.0, %v359_v48 }
  0xbc   :  { %v364_v45 = vmul.f32 %v3840_v37, %v363_v41 }
  0xbe   :  { %v365_v50 = vadd.f32 %v3840_v37, %v364_v45 }
  0xc0   :  { %v369_v53 = vsel %vm368_vm6, %v3840_v37, %v365_v50 }
  0xc1   :  { %v374_v56 = vsel %vm371_vm7, %v373_v54, %v369_v53 }
  0xc2   :  { %v399_v16 = vsub.f32 1.0, %v374_v56  ;;  %v411_v20 = vmul.f32 0.0, %v374_v56 }
  0xf6   :  { %v379_v47 = vpop.permute.xlu2 %378 }
  0xf7   :  { %v384_v49 = vmul.f32 %v379_v47, %v359_v48 }
  0xf9   :  { %388 = vrot.lane.b32.xlu0 %v384_v49, %s4045_s30 }
  0xfe   :  { %v381_v55 = vpop.permute.xlu2 %380 }
  0xff   :  { %v385_v57 = vmul.f32 %v381_v55, %v374_v56 }
 0x101   :  { %390 = vrot.lane.b32.xlu1 %v385_v57, %s4045_s30 }
 0x16b   :  { %v389_v58 = vpop.permute.xlu0 %388 }
 0x16c   :  { %v394_v59 = vadd.f32 %v389_v58, %v304_v21 }
 0x16e   :  { %3841 = vtanh.f32 %v394_v59 }
 0x173   :  { %v391_v60 = vpop.permute.xlu1 %390 }
 0x174   :  { %v3842_v61 = vpop.eup %3841  ;;  %v395_v62 = vadd.f32 %v391_v60, %v305_v27  ;;  %v96_v27 = vpop.f32.mrf.mxu0 }
 0x175   :  { %402 = vrot.lane.b32.xlu2 %v3842_v61, %s4049_s28  ;;  %v4222_v28 = vadd.f32 %v96_v27, %v78_v26 }
 0x176   :  { %3843 = vtanh.f32 %v395_v62 }
 0x177   :  { %v101_v29 = vsel %vm5222_vm10, %v4222_v28, 0.0 }
 0x17c   :  { %v3844_v63 = vpop.eup %3843  ;;  %v98_v30 = vpop.f32.mrf.mxu0 }
 0x17d   :  { %404 = vrot.lane.b32.xlu0 %v3844_v63, %s4049_s28  ;;  %429 = vperm.xlu2 %3809, %v4146_v1   ;;  %v4052_v30 = vmov 32.0  }
 0x185   :  { %433 = vperm.xlu0 %3810, %v4161_v5   ;;  %3812 = vset.pattern.permute.xlu2 %v4051_v31 }
 0x186   :  { %443 = vperm.xlu2 %3812, %v4161_v5  }
 0x1af   :  { %102 = vadd.xlane.f32.xlu0 %v101_v29 }
 0x1cf   :  { %v403_v11 = vpop.permute.xlu2 %402 }
 0x1d0   :  { %v408_v15 = vmul.f32 %v403_v11, %v398_v12 }
 0x1d2   :  { %v4209_v22 = vadd.f32 %v410_v19, %v408_v15 }
 0x1d7   :  { %v430_v37 = vpop.permute.xlu2 %429 }
 0x1d8   :  { %v436_v46 = vmul.f32 %v4185_v14, %v430_v37 }
 0x1e0   :  { %v444_v38 = vpop.permute.xlu2 %443 }
 0x1e1   :  { %v447_v41 = vmul.f32 %v4180_v13, %v444_v38 }
 0x1ef   :  { %v405_v17 = vpop.permute.xlu0 %404 }
 0x1f0   :  { %v409_v21 = vmul.f32 %v405_v17, %v399_v16 }
 0x1f2   :  { %v4211_v23 = vadd.f32 %v411_v20, %v409_v21 }
 0x1f4   :  { %v452_v24 = vpack.c.bf16 %v4211_v23, %v4209_v22 }
 0x1f6   :  { %454 = vrot.lane.b32.xlu1 %v452_v24, %s4049_s28 }
 0x1f7   :  { %v434_v39 = vpop.permute.xlu0 %433 }
 0x1f8   :  { %v437_v40 = vmul.f32 %v4185_v14, %v434_v39 }
 0x1fa   :  { %v449_v42 = vadd.f32 %v447_v41, %v437_v40 }
 0x1fc   :  { %v4236_v43 = vadd.f32 %v4192_v18, %v449_v42 }
 0x1fe   :  { %439 = vperm.xlu1 %3811, %v4146_v1  }
 0x222   :  { %v103_v37 = vpop.xlane.xlu0 %102 }
 0x268   :  { %v455_v32 = vpop.permute.xlu1 %454 }
 0x269   :  { %3296 = vmatmul.msk.bf16.vlgmr.msrb.gmra.mxu0 %vm5224_vm11, %v455_v32 }
 0x270   :  { %v440_v45 = vpop.permute.xlu1 %439 }
 0x271   :  { %v446_v47 = vmul.f32 %v4180_v13, %v440_v45 }
 0x273   :  { %v448_v49 = vadd.f32 %v446_v47, %v436_v46 }
 0x275   :  { %v450_v50 = vadd.f32 %v4192_v18, %v448_v49  ;;  %v3718_v49 = vld [vmem:[#allocation6 + $0x18] sm:$0xff] }
 0x276   :  { %166 = vmatpush.bf16.msra.mxu1 %v3718_v49 }
 0x2e6   :  { %v468_v33 = vpop.f32.mrf.mxu0 }
 0x2e7   :  { %v469_v34 = vadd.f32 %v4171_v6, %v468_v33 }
 0x2e9   :  { %515 = vrot.lane.b32.xlu1 %v469_v34, %s4045_s30  ;;  %v473_v52 = vadd.f32 %v469_v34, %v450_v50 }
 0x2eb   :  { %v3297_v54 = vmul.f32 -1.442695, %v473_v52 }
 0x2ee   :  { %v470_v35 = vpop.f32.mrf.mxu0 }
 0x2ef   :  { %v471_v36 = vadd.f32 %v4171_v6, %v470_v35 }
 0x2f1   :  { %517 = vrot.lane.b32.xlu2 %v471_v36, %s4045_s30  ;;  %v474_v44 = vadd.f32 %v471_v36, %v4236_v43 }
 0x2f3   :  { %v3298_v48 = vmul.f32 -1.442695, %v474_v44 }
 0x2f5   :  { %3845 = vpow2.f32 %v3298_v48 }
 0x2fb   :  { %v3846_v51 = vpop.eup %3845 }
 0x2fc   :  { %v482_v53 = vadd.f32 1.0, %v3846_v51 }
 0x2fe   :  { %3847 = vrcp.f32 %v482_v53  ;;  %v509_v63 = vand.u32 2147483648, %v482_v53  ;;  %vm503_vm13 = vweird.f32 %v482_v53  ;;  %v507_v3 = vand.u32 2147483647, %v482_v53 }
 0x2ff   :  { %3849 = vpow2.f32 %v3297_v54 }
 0x300   :  { %v510_v9 = vor.u32 1.1754944e-38, %v509_v63  ;;  %vm508_vm15 = vcmp.eq.f32.partialorder %v507_v3, 8.507059e+37 }
 0x304   :  { %v3848_v55 = vpop.eup %3847 }
 0x305   :  { %v3850_v56 = vpop.eup %3849  ;;  %v499_v57 = vmul.f32 %v3848_v55, %v482_v53  ;;  %vm504_vm12 = vweird.f32 %v3848_v55 }
 0x306   :  { %v481_v58 = vadd.f32 1.0, %v3850_v56  ;;  %vm505_vm14 = vmor %vm503_vm13, %vm504_vm12 }
 0x307   :  { %v500_v59 = vsub.f32 1.0, %v499_v57 }
 0x308   :  { %3851 = vrcp.f32 %v481_v58  ;;  %v494_v19 = vand.u32 2147483648, %v481_v58  ;;  %vm488_vm1 = vweird.f32 %v481_v58  ;;  %v492_v20 = vand.u32 2147483647, %v481_v58 }
 0x309   :  { %v501_v60 = vmul.f32 %v3848_v55, %v500_v59  ;;  %3853 = vrcp.f32 %v4052_v30 }
 0x30a   :  { %v495_v24 = vor.u32 1.1754944e-38, %v494_v19  ;;  %vm493_vm3 = vcmp.eq.f32.partialorder %v492_v20, 8.507059e+37 }
 0x30b   :  { %v502_v61 = vadd.f32 %v3848_v55, %v501_v60 }
 0x30d   :  { %v506_v7 = vsel %vm505_vm14, %v3848_v55, %v502_v61  ;;  %v132_v61 = vperm.slane %v4219_v25, 2 }
 0x30e   :  { %v3852_v62 = vpop.eup %3851  ;;  %v4242_v11 = vsel %vm508_vm15, %v510_v9, %v506_v7 }
 0x30f   :  { %v484_v8 = vmul.f32 %v3852_v62, %v481_v58  ;;  %vm489_vm0 = vweird.f32 %v3852_v62  ;;  %v3854_v31 = vpop.eup %3853  ;;  %v130_v58 = vperm.slane %v4219_v25, 1 }
 0x310   :  { %vm490_vm2 = vmor %vm488_vm1, %vm489_vm0  ;;  %v105_v32 = vmul.f32 32.0, %v3854_v31  ;;  %vm109_vm4 = vweird.f32 %v3854_v31 }
 0x311   :  { %v485_v15 = vsub.f32 1.0, %v484_v8 }
 0x312   :  { %v106_v33 = vsub.f32 1.0, %v105_v32 }
 0x313   :  { %v486_v16 = vmul.f32 %v3852_v62, %v485_v15 }
 0x314   :  { %v107_v34 = vmul.f32 %v3854_v31, %v106_v33 }
 0x315   :  { %v487_v17 = vadd.f32 %v3852_v62, %v486_v16 }
 0x316   :  { %v108_v35 = vadd.f32 %v3854_v31, %v107_v34 }
 0x317   :  { %v491_v21 = vsel %vm490_vm2, %v3852_v62, %v487_v17  ;;  %v548_v17 = vmul.f32 %v4242_v11, %v4211_v23 }
 0x318   :  { %v496_v27 = vsel %vm493_vm3, %v495_v24, %v491_v21  ;;  %v4247_v36 = vsel %vm109_vm4, %v3854_v31, %v108_v35  ;;  %v4053_v24 = vmov 5  }
 0x319   :  { %v111_v38 = vmul.f32 %v4247_v36, %v103_v37  ;;  %v535_v9 = vsub.f32 1.0, %v496_v27  ;;  %v547_v16 = vmul.f32 %v496_v27, %v4209_v22  ;;  %3814 = vset.pattern.permute.xlu0 %v4053_v24 }
 0x31a   :  { %576 = vperm.xlu0 %3814, %v4146_v1  }
 0x31b   :  { %v112_v39 = vsub.f32 %v4222_v28, %v111_v38  ;;  %v3717_v28 = vld [vmem:[#allocation6 + $0x10] sm:$0xff]  ;;  %v4284_v38 = vld [vmem:[%s5214_s5 + $0x4] sm:$0x7] }
 0x31c   :  { %167 = vmatpush.bf16.msra.mxu1 %v3717_v28 }
 0x31d   :  { %v113_v40 = vmul.f32 %v112_v39, %v112_v39 }
 0x31f   :  { %v114_v41 = vsel %vm5222_vm10, %v113_v40, 0.0 }
 0x320   :  { %602 = vmatpush.bf16.msrb.mxu1 %v4141_v0 }
 0x324   :  { %603 = vmatpush.bf16.msrb.mxu1 %v4151_v2 }
 0x34b   :  { %v518_v10 = vpop.permute.xlu2 %517 }
 0x34c   :  { %v522_v12 = vmul.f32 %v518_v10, %v4242_v11 }
 0x34e   :  { %527 = vrot.lane.b32.xlu2 %v522_v12, %s4045_s30  ;;  %v536_v12 = vsub.f32 1.0, %v4242_v11 }
 0x35b   :  { %v516_v26 = vpop.permute.xlu1 %515 }
 0x35c   :  { %v521_v29 = vmul.f32 %v516_v26, %v496_v27  ;;  %v4054_v26 = vmov 4  }
 0x35d   :  { %3813 = vset.pattern.permute.xlu2 %v4054_v26 }
 0x35e   :  { %525 = vrot.lane.b32.xlu1 %v521_v29, %s4045_s30 }
 0x388   :  { %115 = vadd.xlane.f32.xlu1 %v114_v41  ;;  %v143_v41 = vperm.slane %v4284_v38, 0 }
 0x3a8   :  { %v528_v45 = vpop.permute.xlu2 %527 }
 0x3a9   :  { %v532_v46 = vadd.f32 %v528_v45, %v4236_v43 }
 0x3d0   :  { %v526_v42 = vpop.permute.xlu1 %525 }
 0x3d1   :  { %v531_v44 = vadd.f32 %v526_v42, %v450_v50 }
 0x3d3   :  { %3855 = vtanh.f32 %v531_v44 }
 0x3d4   :  { %3857 = vtanh.f32 %v532_v46 }
 0x3d9   :  { %v3856_v47 = vpop.eup %3855 }
 0x3da   :  { %539 = vrot.lane.b32.xlu2 %v3856_v47, %s4049_s28  ;;  %v3858_v48 = vpop.eup %3857 }
 0x3e2   :  { %541 = vrot.lane.b32.xlu2 %v3858_v48, %s4049_s28  ;;  %v577_v48 = vpop.permute.xlu0 %576 }
 0x3e3   :  { %v583_v28 = vmul.f32 %v4180_v13, %v577_v48  ;;  %v3720_v48 = vld [vmem:[#allocation6 + $0x28] sm:$0xff] }
 0x3e4   :  { %230 = vmatpush.bf16.msra.mxu2 %v3720_v48 }
 0x3fb   :  { %v116_v51 = vpop.xlane.xlu1 %115 }
 0x3fc   :  { %v117_v50 = vmul.f32 %v116_v51, %v4247_v36 }
 0x3fe   :  { %v118_v52 = vadd.f32 1e-05, %v117_v50 }
 0x400   :  { %3859 = vrsqrt.f32 %v118_v52  ;;  %vm125_vm6 = vweird.f32 %v118_v52 }
 0x406   :  { %v3860_v43 = vpop.eup %3859 }
 0x407   :  { %v120_v53 = vmul.f32 %v3860_v43, %v118_v52  ;;  %vm126_vm5 = vweird.f32 %v3860_v43 }
 0x408   :  { %vm127_vm7 = vmor %vm125_vm6, %vm126_vm5 }
 0x409   :  { %v121_v54 = vmul.f32 %v3860_v43, %v120_v53 }
 0x40b   :  { %v122_v55 = vmul.f32 0.5, %v121_v54 }
 0x40d   :  { %v123_v56 = vsub.f32 1.5, %v122_v55 }
 0x40f   :  { %v124_v57 = vmul.f32 %v3860_v43, %v123_v56 }
 0x411   :  { %v128_v59 = vsel %vm127_vm7, %v3860_v43, %v124_v57 }
 0x412   :  { %v129_v60 = vmul.f32 %v128_v59, %v112_v39 }
 0x414   :  { %v131_v62 = vmul.f32 %v130_v58, %v129_v60 }
 0x416   :  { %v133_v63 = vadd.f32 %v132_v61, %v131_v62 }
 0x418   :  { %v134_v3 = vmax.f32 %v133_v63, 0.0 }
 0x41a   :  { %v142_v7 = vpack.c.bf16 %v134_v3, %v134_v3 }
 0x41c   :  { %3273 = vmatmul.msk.bf16.vlgmr.msra.gmra.mxu1 %vm5224_vm11, %v142_v7 }
 0x434   :  { %v540_v8 = vpop.permute.xlu2 %539 }
 0x435   :  { %v545_v10 = vmul.f32 %v540_v8, %v535_v9 }
 0x437   :  { %v4265_v20 = vadd.f32 %v547_v16, %v545_v10 }
 0x43c   :  { %v542_v15 = vpop.permute.xlu2 %541 }
 0x43d   :  { %v546_v19 = vmul.f32 %v542_v15, %v536_v12 }
 0x43f   :  { %v4267_v25 = vadd.f32 %v548_v17, %v546_v19 }
 0x441   :  { %v589_v21 = vpack.c.bf16 %v4267_v25, %v4265_v20 }
 0x443   :  { %591 = vrot.lane.b32.xlu2 %v589_v21, %s4049_s28 }
 0x44b   :  { %566 = vperm.xlu2 %3813, %v4146_v1  }
 0x453   :  { %570 = vperm.xlu2 %3813, %v4161_v5  }
 0x45b   :  { %3815 = vset.pattern.permute.xlu2 %v4053_v24 }
 0x45c   :  { %580 = vperm.xlu2 %3815, %v4161_v5  }
 0x499   :  { %v169_v11 = vpop.f32.mrf.mxu1 }
 0x49a   :  { %v170_v44 = vadd.f32 %v169_v11, %v143_v41 }
 0x49c   :  { %v173_v46 = vsel %vm5222_vm10, %v170_v44, 0.0 }
 0x49d   :  { %v592_v27 = vpop.permute.xlu2 %591 }
 0x49e   :  { %3299 = vmatmul.msk.bf16.vlgmr.msrb.gmra.mxu1 %vm5224_vm11, %v592_v27 }
 0x4a1   :  { %v171_v29 = vpop.f32.mrf.mxu1 }
 0x4a5   :  { %v567_v34 = vpop.permute.xlu2 %566 }
 0x4a6   :  { %v573_v49 = vmul.f32 %v4185_v14, %v567_v34 }
 0x4a8   :  { %v585_v50 = vadd.f32 %v583_v28, %v573_v49 }
 0x4aa   :  { %v587_v52 = vadd.f32 %v4192_v18, %v585_v50 }
 0x4ad   :  { %v571_v35 = vpop.permute.xlu2 %570 }
 0x4ae   :  { %v574_v39 = vmul.f32 %v4185_v14, %v571_v35 }
 0x4b6   :  { %v581_v37 = vpop.permute.xlu2 %580 }
 0x4b7   :  { %v584_v40 = vmul.f32 %v4180_v13, %v581_v37 }
 0x4b9   :  { %v586_v42 = vadd.f32 %v584_v40, %v574_v39 }
 0x4bb   :  { %v4290_v45 = vadd.f32 %v4192_v18, %v586_v42 }
 0x51b   :  { %v605_v30 = vpop.f32.mrf.mxu1 }
 0x51c   :  { %v606_v31 = vadd.f32 %v4171_v6, %v605_v30 }
 0x51e   :  { %652 = vrot.lane.b32.xlu1 %v606_v31, %s4045_s30  ;;  %v610_v53 = vadd.f32 %v606_v31, %v587_v52 }
 0x520   :  { %v3300_v55 = vmul.f32 -1.442695, %v610_v53 }
 0x523   :  { %v607_v32 = vpop.f32.mrf.mxu1 }
 0x524   :  { %v608_v33 = vadd.f32 %v4171_v6, %v607_v32 }
 0x526   :  { %654 = vrot.lane.b32.xlu2 %v608_v33, %s4045_s30  ;;  %v611_v47 = vadd.f32 %v608_v33, %v4290_v45 }
 0x528   :  { %v3301_v51 = vmul.f32 -1.442695, %v611_v47 }
 0x52a   :  { %3861 = vpow2.f32 %v3301_v51 }
 0x530   :  { %v3862_v43 = vpop.eup %3861 }
 0x531   :  { %v619_v54 = vadd.f32 1.0, %v3862_v43 }
 0x533   :  { %3863 = vrcp.f32 %v619_v54  ;;  %v646_v3 = vand.u32 2147483648, %v619_v54  ;;  %vm640_vm9 = vweird.f32 %v619_v54  ;;  %v644_v7 = vand.u32 2147483647, %v619_v54 }
 0x534   :  { %3865 = vpow2.f32 %v3300_v55  ;;  %v195_v55 = vperm.slane %v4284_v38, 1 }
 0x535   :  { %v647_v10 = vor.u32 1.1754944e-38, %v646_v3  ;;  %vm645_vm13 = vcmp.eq.f32.partialorder %v644_v7, 8.507059e+37 }
 0x539   :  { %v3864_v56 = vpop.eup %3863 }
 0x53a   :  { %v3866_v57 = vpop.eup %3865  ;;  %v636_v58 = vmul.f32 %v3864_v56, %v619_v54  ;;  %vm641_vm8 = vweird.f32 %v3864_v56 }
 0x53b   :  { %v618_v59 = vadd.f32 1.0, %v3866_v57  ;;  %vm642_vm12 = vmor %vm640_vm9, %vm641_vm8  ;;  %v197_v57 = vperm.slane %v4284_v38, 2 }
 0x53c   :  { %v637_v60 = vsub.f32 1.0, %v636_v58 }
 0x53d   :  { %3867 = vrcp.f32 %v618_v59  ;;  %v631_v24 = vand.u32 2147483648, %v618_v59  ;;  %vm625_vm15 = vweird.f32 %v618_v59  ;;  %v629_v26 = vand.u32 2147483647, %v618_v59 }
 0x53e   :  { %v638_v61 = vmul.f32 %v3864_v56, %v637_v60 }
 0x53f   :  { %v632_v27 = vor.u32 1.1754944e-38, %v631_v24  ;;  %vm630_vm1 = vcmp.eq.f32.partialorder %v629_v26, 8.507059e+37 }
 0x540   :  { %v639_v62 = vadd.f32 %v3864_v56, %v638_v61 }
 0x542   :  { %v643_v8 = vsel %vm642_vm12, %v3864_v56, %v639_v62 }
 0x543   :  { %v3868_v63 = vpop.eup %3867  ;;  %v4297_v15 = vsel %vm645_vm13, %v647_v10, %v643_v8 }
 0x544   :  { %v621_v9 = vmul.f32 %v3868_v63, %v618_v59  ;;  %vm626_vm14 = vweird.f32 %v3868_v63  ;;  %v673_v3 = vsub.f32 1.0, %v4297_v15 }
 0x545   :  { %vm627_vm0 = vmor %vm625_vm15, %vm626_vm14 }
 0x546   :  { %v622_v17 = vsub.f32 1.0, %v621_v9  ;;  %v685_v9 = vmul.f32 %v4297_v15, %v4267_v25 }
 0x548   :  { %v623_v19 = vmul.f32 %v3868_v63, %v622_v17  ;;  %v4055_v17 = vmov 7  }
 0x549   :  { %3817 = vset.pattern.permute.xlu1 %v4055_v17  ;;  %3818 = vset.pattern.permute.xlu2 %v4055_v17 }
 0x54a   :  { %v624_v21 = vadd.f32 %v3868_v63, %v623_v19  ;;  %v4056_v19 = vmov 6  }
 0x54b   :  { %3816 = vset.pattern.permute.xlu0 %v4056_v19 }
 0x54c   :  { %v628_v11 = vsel %vm627_vm0, %v3868_v63, %v624_v21 }
 0x54d   :  { %v633_v30 = vsel %vm630_vm1, %v632_v27, %v628_v11 }
 0x54e   :  { %v672_v62 = vsub.f32 1.0, %v633_v30  ;;  %v684_v8 = vmul.f32 %v633_v30, %v4265_v20 }
 0x54f   :  { %174 = vadd.xlane.f32.xlu2 %v173_v46 }
 0x580   :  { %v655_v12 = vpop.permute.xlu2 %654 }
 0x581   :  { %v659_v16 = vmul.f32 %v655_v12, %v4297_v15 }
 0x583   :  { %664 = vrot.lane.b32.xlu0 %v659_v16, %s4045_s30 }
 0x590   :  { %v653_v29 = vpop.permute.xlu1 %652 }
 0x591   :  { %v658_v31 = vmul.f32 %v653_v29, %v633_v30 }
 0x593   :  { %662 = vrot.lane.b32.xlu1 %v658_v31, %s4045_s30 }
 0x5c2   :  { %v175_v32 = vpop.xlane.xlu2 %174 }
 0x5c3   :  { %v176_v33 = vmul.f32 %v175_v32, %v4247_v36 }
 0x5c5   :  { %v177_v34 = vsub.f32 %v170_v44, %v176_v33  ;;  %v3719_v44 = vld [vmem:[#allocation6 + $0x20] sm:$0xff] }
 0x5c6   :  { %231 = vmatpush.bf16.msra.mxu2 %v3719_v44 }
 0x5c7   :  { %v178_v35 = vmul.f32 %v177_v34, %v177_v34 }
 0x5c9   :  { %v179_v37 = vsel %vm5222_vm10, %v178_v35, 0.0 }
 0x5ca   :  { %180 = vadd.xlane.f32.xlu1 %v179_v37  ;;  %739 = vmatpush.bf16.msrb.mxu2 %v4141_v0 }
 0x5ce   :  { %740 = vmatpush.bf16.msrb.mxu2 %v4151_v2 }
 0x5e3   :  { %713 = vperm.xlu1 %3817, %v4146_v1  }
 0x5f5   :  { %v665_v41 = vpop.permute.xlu0 %664 }
 0x5f6   :  { %v669_v42 = vadd.f32 %v665_v41, %v4290_v45 }
 0x605   :  { %v663_v39 = vpop.permute.xlu1 %662 }
 0x606   :  { %v668_v40 = vadd.f32 %v663_v39, %v587_v52 }
 0x608   :  { %3869 = vtanh.f32 %v668_v40 }
 0x609   :  { %3871 = vtanh.f32 %v669_v42 }
 0x60e   :  { %v3870_v46 = vpop.eup %3869 }
 0x60f   :  { %676 = vrot.lane.b32.xlu0 %v3870_v46, %s4049_s28  ;;  %v3872_v47 = vpop.eup %3871 }
 0x617   :  { %678 = vrot.lane.b32.xlu0 %v3872_v47, %s4049_s28 }
 0x61f   :  { %703 = vperm.xlu0 %3816, %v4146_v1  }
 0x627   :  { %707 = vperm.xlu0 %3816, %v4161_v5  }
 0x63d   :  { %v181_v49 = vpop.xlane.xlu1 %180 }
 0x63e   :  { %v182_v28 = vmul.f32 %v181_v49, %v4247_v36 }
 0x640   :  { %v183_v51 = vadd.f32 1e-05, %v182_v28 }
 0x642   :  { %3873 = vrsqrt.f32 %v183_v51  ;;  %vm190_vm3 = vweird.f32 %v183_v51 }
 0x648   :  { %v3874_v45 = vpop.eup %3873 }
 0x649   :  { %v185_v50 = vmul.f32 %v3874_v45, %v183_v51  ;;  %vm191_vm2 = vweird.f32 %v3874_v45 }
 0x64a   :  { %vm192_vm4 = vmor %vm190_vm3, %vm191_vm2 }
 0x64b   :  { %v186_v52 = vmul.f32 %v3874_v45, %v185_v50 }
 0x64d   :  { %v187_v43 = vmul.f32 0.5, %v186_v52 }
 0x64f   :  { %v188_v53 = vsub.f32 1.5, %v187_v43 }
 0x651   :  { %v189_v54 = vmul.f32 %v3874_v45, %v188_v53 }
 0x653   :  { %v193_v56 = vsel %vm192_vm4, %v3874_v45, %v189_v54 }
 0x654   :  { %v194_v0 = vmul.f32 %v193_v56, %v177_v34 }
 0x655   :  { %v714_v39 = vpop.permute.xlu1 %713 }
 0x656   :  { %v196_v58 = vmul.f32 %v195_v55, %v194_v0  ;;  %v720_v40 = vmul.f32 %v4180_v13, %v714_v39 }
 0x658   :  { %v198_v59 = vadd.f32 %v197_v57, %v196_v58 }
 0x65a   :  { %v199_v2 = vmax.f32 %v198_v59, 0.0 }
 0x65c   :  { %v207_v60 = vpack.c.bf16 %v199_v2, %v199_v2 }
 0x65e   :  { %3283 = vmatmul.msk.bf16.vlgmr.msra.gmra.mxu2 %vm5224_vm11, %v207_v60 }
 0x681   :  { %v677_v61 = vpop.permute.xlu0 %676 }
 0x682   :  { %v682_v63 = vmul.f32 %v677_v61, %v672_v62 }
 0x684   :  { %v4317_v12 = vadd.f32 %v684_v8, %v682_v63 }
 0x689   :  { %v679_v7 = vpop.permute.xlu0 %678 }
 0x68a   :  { %v683_v10 = vmul.f32 %v679_v7, %v673_v3 }
 0x68c   :  { %v4319_v38 = vadd.f32 %v685_v9, %v683_v10 }
 0x68e   :  { %v726_v16 = vpack.c.bf16 %v4319_v38, %v4317_v12 }
 0x690   :  { %728 = vrot.lane.b32.xlu2 %v726_v16, %s4049_s28 }
 0x691   :  { %v704_v1 = vpop.permute.xlu0 %703 }
 0x692   :  { %v710_v41 = vmul.f32 %v4185_v14, %v704_v1 }
 0x694   :  { %v722_v46 = vadd.f32 %v720_v40, %v710_v41 }
 0x696   :  { %v724_v47 = vadd.f32 %v4192_v18, %v722_v46  ;;  %v3973_v46 = vld [vmem:[%s5210_s1] sm:$0xff] }
 0x698   :  { %717 = vperm.xlu2 %3818, %v4161_v5  }
 0x699   :  { %v708_v31 = vpop.permute.xlu0 %707 }
 0x69a   :  { %v711_v33 = vmul.f32 %v4185_v14, %v708_v31 }
 0x6e1   :  { %v4328_v15 = vpop.f32.mrf.mxu2 }
 0x6e9   :  { %v235_v21 = vpop.f32.mrf.mxu2 }
 0x6ea   :  { %v729_v24 = vpop.permute.xlu2 %728 }
 0x6eb   :  { %3302 = vmatmul.msk.bf16.vlgmr.msrb.gmra.mxu2 %vm5224_vm11, %v729_v24 }
 0x6f2   :  { %v718_v30 = vpop.permute.xlu2 %717 }
 0x6f3   :  { %v721_v32 = vmul.f32 %v4180_v13, %v718_v30 }
 0x6f5   :  { %v723_v34 = vadd.f32 %v721_v32, %v711_v33 }
 0x6f7   :  { %v725_v35 = vadd.f32 %v4192_v18, %v723_v34 }
 0x76e   :  { %v742_v26 = vpop.f32.mrf.mxu2 }
 0x76f   :  { %v743_v11 = vadd.f32 %v4171_v6, %v742_v26 }
 0x771   :  { %789 = vrot.lane.b32.xlu0 %v743_v11, %s4045_s30  ;;  %v747_v44 = vadd.f32 %v743_v11, %v724_v47 }
 0x773   :  { %v3303_v28 = vmul.f32 -1.442695, %v747_v44 }
 0x776   :  { %v744_v27 = vpop.f32.mrf.mxu2 }
 0x777   :  { %v745_v29 = vadd.f32 %v4171_v6, %v744_v27 }
 0x779   :  { %791 = vrot.lane.b32.xlu2 %v745_v29, %s4045_s30  ;;  %v748_v37 = vadd.f32 %v745_v29, %v725_v35 }
 0x77b   :  { %v3304_v42 = vmul.f32 -1.442695, %v748_v37 }
 0x77d   :  { %3875 = vpow2.f32 %v3304_v42  ;;  %v4057_v42 = vmov 8  }
 0x77e   :  { %3820 = vset.pattern.permute.xlu1 %v4057_v42  ;;  %3819 = vset.pattern.permute.xlu0 %v4057_v42 }
 0x783   :  { %v3876_v48 = vpop.eup %3875 }
 0x784   :  { %v756_v49 = vadd.f32 1.0, %v3876_v48 }
 0x786   :  { %3877 = vrcp.f32 %v756_v49  ;;  %v783_v56 = vand.u32 2147483648, %v756_v49  ;;  %vm777_vm6 = vweird.f32 %v756_v49  ;;  %v781_v0 = vand.u32 2147483647, %v756_v49 }
 0x787   :  { %3879 = vpow2.f32 %v3303_v28  ;;  %v265_v28 = vld [vmem:[%s5212_s3] sm:$0xff] }
 0x788   :  { %v784_v59 = vor.u32 1.1754944e-38, %v783_v56  ;;  %vm782_vm8 = vcmp.eq.f32.partialorder %v781_v0, 8.507059e+37 }
 0x78c   :  { %v3878_v51 = vpop.eup %3877 }
 0x78d   :  { %v3880_v45 = vpop.eup %3879  ;;  %v773_v50 = vmul.f32 %v3878_v51, %v756_v49  ;;  %vm778_vm5 = vweird.f32 %v3878_v51 }
 0x78e   :  { %v755_v52 = vadd.f32 1.0, %v3880_v45  ;;  %vm779_vm7 = vmor %vm777_vm6, %vm778_vm5 }
 0x78f   :  { %v774_v43 = vsub.f32 1.0, %v773_v50 }
 0x790   :  { %3881 = vrcp.f32 %v755_v52  ;;  %v768_v7 = vand.u32 2147483648, %v755_v52  ;;  %vm762_vm12 = vweird.f32 %v755_v52  ;;  %v766_v8 = vand.u32 2147483647, %v755_v52 }
 0x791   :  { %v775_v53 = vmul.f32 %v3878_v51, %v774_v43 }
 0x792   :  { %v769_v10 = vor.u32 1.1754944e-38, %v768_v7  ;;  %vm767_vm14 = vcmp.eq.f32.partialorder %v766_v8, 8.507059e+37 }
 0x793   :  { %v776_v54 = vadd.f32 %v3878_v51, %v775_v53 }
 0x795   :  { %v780_v57 = vsel %vm779_vm7, %v3878_v51, %v776_v54 }
 0x796   :  { %v3882_v55 = vpop.eup %3881  ;;  %v785_v60 = vsel %vm782_vm8, %v784_v59, %v780_v57 }
 0x797   :  { %v758_v58 = vmul.f32 %v3882_v55, %v755_v52  ;;  %vm763_vm9 = vweird.f32 %v3882_v55  ;;  %v810_v30 = vsub.f32 1.0, %v785_v60  ;;  %v822_v34 = vmul.f32 %v785_v60, %v4319_v38 }
 0x798   :  { %vm764_vm13 = vmor %vm762_vm12, %vm763_vm9 }
 0x799   :  { %v759_v62 = vsub.f32 1.0, %v758_v58 }
 0x79b   :  { %v760_v63 = vmul.f32 %v3882_v55, %v759_v62 }
 0x79d   :  { %v761_v3 = vadd.f32 %v3882_v55, %v760_v63  ;;  %v3976_v63 = vld [vmem:[%s5216_s7] ss:$0 sm:$0xff] }
 0x79f   :  { %v765_v9 = vsel %vm764_vm13, %v3882_v55, %v761_v3 }
 0x7a0   :  { %v770_v16 = vsel %vm767_vm14, %v769_v10, %v765_v9 }
 0x7a1   :  { %v809_v32 = vsub.f32 1.0, %v770_v16  ;;  %v821_v37 = vmul.f32 %v770_v16, %v4317_v12 }
 0x7d3   :  { %v792_v2 = vpop.permute.xlu2 %791 }
 0x7d4   :  { %v796_v61 = vmul.f32 %v792_v2, %v785_v60  ;;  %v3974_v60 = vld [vmem:[%s5216_s7 + $0x2] ss:$0 sm:$0xff] }
 0x7d6   :  { %801 = vrot.lane.b32.xlu2 %v796_v61, %s4045_s30 }
 0x7e3   :  { %v790_v17 = vpop.permute.xlu0 %789 }
 0x7e4   :  { %v795_v19 = vmul.f32 %v790_v17, %v770_v16 }
 0x7e6   :  { %799 = vrot.lane.b32.xlu0 %v795_v19, %s4045_s30 }
 0x830   :  { %v802_v21 = vpop.permute.xlu2 %801 }
 0x831   :  { %v806_v24 = vadd.f32 %v802_v21, %v725_v35 }
 0x833   :  { %3883 = vtanh.f32 %v806_v24 }
 0x839   :  { %v3884_v26 = vpop.eup %3883 }
 0x83a   :  { %815 = vrot.lane.b32.xlu1 %v3884_v26, %s4049_s28 }
 0x842   :  { %844 = vperm.xlu1 %3820, %v4161_v5  }
 0x858   :  { %v800_v11 = vpop.permute.xlu0 %799 }
 0x859   :  { %v805_v27 = vadd.f32 %v800_v11, %v724_v47  ;;  %v4058_v47 = vmov 9  }
 0x85a   :  { %3821 = vset.pattern.permute.xlu2 %v4058_v47  ;;  %3822 = vset.pattern.permute.xlu1 %v4058_v47 }
 0x85b   :  { %3885 = vtanh.f32 %v805_v27  ;;  %854 = vperm.xlu1 %3822, %v4161_v5   ;;  %v4369_v5 = vadd.s32 4294967295, %v265_v28 }
 0x85d   :  { %vm414_vm15 = vcmp.eq.s32.totalorder %v4369_v5, 0  ;;  %vm825_vm1 = vcmp.eq.s32.totalorder %v4369_v5, 3  ;;  %vm688_vm7 = vcmp.eq.s32.totalorder %v4369_v5, 2 }
 0x85e   :  { %v416_v50 = vsel %vm414_vm15, 1, %v4048_v4  ;;  %v827_v24 = vsel %vm825_vm1, 1, %v4048_v4  ;;  %v690_v47 = vsel %vm688_vm7, 1, %v4048_v4  ;;  %vm551_vm15 = vcmp.eq.s32.totalorder %v4369_v5, 1 }
 0x85f   :  { %vm962_vm1 = vcmp.eq.s32.totalorder %v4369_v5, 4 }
 0x861   :  { %v3886_v29 = vpop.eup %3885 }
 0x862   :  { %813 = vrot.lane.b32.xlu0 %v3886_v29, %s4049_s28  ;;  %v266_v29 = vld [vmem:[%s5212_s3 + $0x8] sm:$0xff] }
 0x863   :  { %3824 = vset.pattern.permute.xlu1 %v4048_v4 }
 0x86a   :  { %840 = vperm.xlu0 %3819, %v3973_v46  }
 0x872   :  { %3823 = vset.pattern.permute.xlu0 %v4048_v4 }
 0x8ac   :  { %v816_v1 = vpop.permute.xlu1 %815 }
 0x8ad   :  { %v820_v31 = vmul.f32 %v816_v1, %v810_v30 }
 0x8af   :  { %v4347_v39 = vadd.f32 %v822_v34, %v820_v31 }
 0x8b4   :  { %v845_v57 = vpop.permute.xlu1 %844 }
 0x8b5   :  { %v848_v61 = vmul.f32 %v3974_v60, %v845_v57 }
 0x8cd   :  { %v855_v2 = vpop.permute.xlu1 %854 }
 0x8d4   :  { %v814_v33 = vpop.permute.xlu0 %813 }
 0x8d5   :  { %v819_v35 = vmul.f32 %v814_v33, %v809_v32  ;;  %v3285_v33 = vadd.s32 4294967295, %v266_v29 }
 0x8d7   :  { %v4349_v40 = vadd.f32 %v821_v37, %v819_v35  ;;  %vm415_vm5 = vcmp.eq.s32.totalorder %v3285_v33, 0  ;;  %vm552_vm6 = vcmp.eq.s32.totalorder %v3285_v33, 1  ;;  %vm826_vm13 = vcmp.eq.s32.totalorder %v3285_v33, 3 }
 0x8d8   :  { %v417_v34 = vsel %vm415_vm5, 1, %v4048_v4  ;;  %vm965_vm5 = vcmp.lt.s32.totalorder %v3285_v33, 0 }
 0x8d9   :  { %v863_v41 = vpack.c.bf16 %v4347_v39, %v4349_v40 }
 0x8db   :  { %865 = vrot.lane.b32.xlu2 %v863_v41, %s4049_s28  ;;  %v554_v41 = vsel %vm552_vm6, 1, %v4048_v4 }
 0x8dc   :  { %v841_v43 = vpop.permute.xlu0 %840 }
 0x8dd   :  { %v847_v54 = vmul.f32 %v4185_v14, %v841_v43 }
 0x8e3   :  { %850 = vperm.xlu2 %3821, %v3973_v46  }
 0x8eb   :  { %3825 = vset.pattern.permute.xlu2 %v4048_v4 }
 0x935   :  { %v866_v48 = vpop.permute.xlu2 %865 }
 0x936   :  { %3305 = vmatmul.msk.bf16.vlgmr.msrb.gmra.mxu3 %vm5224_vm11, %v866_v48 }
 0x93d   :  { %v851_v52 = vpop.permute.xlu2 %850 }
 0x93e   :  { %v857_v53 = vmul.f32 %v4180_v13, %v851_v52  ;;  %v3975_v13 = vld [vmem:[%s5216_s7 + $0x3] ss:$0 sm:$0xff]  ;;  %v828_v52 = vsel %vm826_vm13, 1, %v4048_v4 }
 0x93f   :  { %v858_v14 = vmul.f32 %v3975_v13, %v855_v2 }
 0x940   :  { %v859_v55 = vadd.f32 %v857_v53, %v847_v54  ;;  %v553_v53 = vsel %vm551_vm15, 1, %v4048_v4 }
 0x942   :  { %v4377_v56 = vadd.f32 %v4192_v18, %v859_v55  ;;  %v860_v18 = vadd.f32 %v858_v14, %v848_v61  ;;  %v3723_v14 = vld [vmem:[%s5215_s6 + $0x10] sm:$0xff] }
 0x944   :  { %v4389_v3 = vadd.f32 %v3976_v63, %v860_v18 }
 0x9b9   :  { %v879_v44 = vpop.f32.mrf.mxu3 }
 0x9ba   :  { %v880_v49 = vadd.f32 %v4171_v6, %v879_v44 }
 0x9bc   :  { %926 = vrot.lane.b32.xlu2 %v880_v49, %s4045_s30 }
 0x9c1   :  { %v881_v51 = vpop.f32.mrf.mxu3 }
 0x9c2   :  { %v882_v45 = vadd.f32 %v4171_v6, %v881_v51  ;;  %v884_v6 = vadd.f32 %v880_v49, %v4377_v56 }
 0x9c4   :  { %928 = vrot.lane.b32.xlu0 %v882_v45, %s4045_s30  ;;  %v3306_v0 = vmul.f32 -1.442695, %v884_v6  ;;  %v885_v8 = vadd.f32 %v882_v45, %v4389_v3 }
 0x9c6   :  { %3887 = vpow2.f32 %v3306_v0  ;;  %v3307_v10 = vmul.f32 -1.442695, %v885_v8 }
 0x9cc   :  { %419 = vperm.xlu0 %3823, %v416_v50   ;;  %v3888_v58 = vpop.eup %3887 }
 0x9cd   :  { %v892_v59 = vadd.f32 1.0, %v3888_v58 }
 0x9cf   :  { %3889 = vrcp.f32 %v892_v59  ;;  %v905_v19 = vand.u32 2147483648, %v892_v59  ;;  %vm899_vm2 = vweird.f32 %v892_v59  ;;  %v903_v21 = vand.u32 2147483647, %v892_v59 }
 0x9d0   :  { %3891 = vpow2.f32 %v3307_v10 }
 0x9d1   :  { %v906_v27 = vor.u32 1.1754944e-38, %v905_v19  ;;  %vm904_vm4 = vcmp.eq.f32.partialorder %v903_v21, 8.507059e+37 }
 0x9d4   :  { %830 = vperm.xlu0 %3823, %v827_v24  }
 0x9d5   :  { %v3890_v62 = vpop.eup %3889 }
 0x9d6   :  { %v895_v7 = vmul.f32 %v3890_v62, %v892_v59  ;;  %vm900_vm0 = vweird.f32 %v3890_v62  ;;  %v3892_v26 = vpop.eup %3891 }
 0x9d7   :  { %vm901_vm3 = vmor %vm899_vm2, %vm900_vm0  ;;  %v893_v1 = vadd.f32 1.0, %v3892_v26  ;;  %vm689_vm0 = vcmp.eq.s32.totalorder %v3285_v33, 2  ;;  %vm964_vm2 = vcmp.lt.s32.totalorder %v4369_v5, 0  ;;  %v3724_v5 = vld [vmem:[%s5215_s6 + $0x18] sm:$0xff] }
 0x9d8   :  { %v896_v9 = vsub.f32 1.0, %v895_v7  ;;  %v691_v54 = vsel %vm689_vm0, 1, %v4048_v4  ;;  %1012 = vmatpush.bf16.msra.mxu0 %v3724_v5 }
 0x9d9   :  { %3893 = vrcp.f32 %v893_v1  ;;  %v920_v44 = vand.u32 2147483648, %v893_v1  ;;  %vm914_vm9 = vweird.f32 %v893_v1  ;;  %v918_v49 = vand.u32 2147483647, %v893_v1 }
 0x9da   :  { %v897_v16 = vmul.f32 %v3890_v62, %v896_v9 }
 0x9db   :  { %v921_v51 = vor.u32 1.1754944e-38, %v920_v44  ;;  %vm919_vm14 = vcmp.eq.f32.partialorder %v918_v49, 8.507059e+37 }
 0x9dc   :  { %v898_v17 = vadd.f32 %v3890_v62, %v897_v16  ;;  %1013 = vmatpush.bf16.msra.mxu0 %v3723_v14 }
 0x9de   :  { %v902_v11 = vsel %vm901_vm3, %v3890_v62, %v898_v17  ;;  %vm966_vm3 = vmor %vm962_vm1, %vm964_vm2 }
 0x9df   :  { %v4397_v31 = vsel %vm904_vm4, %v906_v27, %v902_v11  ;;  %v3894_v37 = vpop.eup %3893  ;;  %v968_v59 = vsel %vm966_vm3, 1, %v4048_v4  ;;  %vm963_vm4 = vcmp.eq.s32.totalorder %v3285_v33, 4  ;;  %vm5223_vm3 = vcmask 130048  }
 0x9e0   :  { %v910_v35 = vmul.f32 %v3894_v37, %v893_v1  ;;  %vm915_vm8 = vweird.f32 %v3894_v37  ;;  %vm967_vm6 = vmor %vm963_vm4, %vm965_vm5  ;;  %v946_v8 = vsub.f32 1.0, %v4397_v31  ;;  %v958_v26 = vmul.f32 %v4397_v31, %v4349_v40 }
 0x9e1   :  { %vm916_vm12 = vmor %vm914_vm9, %vm915_vm8 }
 0x9e2   :  { %v911_v42 = vsub.f32 1.0, %v910_v35 }
 0x9e4   :  { %v912_v46 = vmul.f32 %v3894_v37, %v911_v42 }
 0x9e6   :  { %v913_v48 = vadd.f32 %v3894_v37, %v912_v46 }
 0x9e8   :  { %v917_v28 = vsel %vm916_vm12, %v3894_v37, %v913_v48 }
 0x9e9   :  { %v922_v45 = vsel %vm919_vm14, %v921_v51, %v917_v28 }
 0x9ea   :  { %v947_v9 = vsub.f32 1.0, %v922_v45  ;;  %v959_v11 = vmul.f32 %v922_v45, %v4347_v39 }
 0xa16   :  { %v927_v30 = vpop.permute.xlu2 %926 }
 0xa17   :  { %v932_v32 = vmul.f32 %v927_v30, %v4397_v31 }
 0xa19   :  { %936 = vrot.lane.b32.xlu1 %v932_v32, %s4045_s30 }
 0xa21   :  { %422 = vperm.xlu1 %3824, %v417_v34  }
 0xa29   :  { %559 = vperm.xlu1 %3824, %v554_v41  }
 0xa31   :  { %693 = vperm.xlu1 %3824, %v690_v47  }
 0xa36   :  { %v929_v50 = vpop.permute.xlu0 %928 }
 0xa37   :  { %v933_v43 = vmul.f32 %v929_v50, %v922_v45  ;;  %v1020_v45 = vlaneseq }
 0xa39   :  { %833 = vperm.xlu1 %3824, %v828_v52   ;;  %938 = vrot.lane.b32.xlu2 %v933_v43, %s4045_s30  ;;  %v4454_v50 = vand.u32 127, %v1020_v45  ;;  %v4459_v43 = vshrl.u32 %v1020_v45, 7 }
 0xa3b   :  { %v4457_v52 = vshra.s32 %v4454_v50, 3 }
 0xa3d   :  { %vm1031_vm4 = vcmp.eq.s32.totalorder %v4457_v52, 0 }
 0xa3e   :  { %v420_v18 = vpop.permute.xlu0 %419 }
 0xa3f   :  { %vm424_vm7 = vcmp.eq.s32.totalorder %v420_v18, 1 }
 0xa40   :  { %v426_v16 = vsel %vm424_vm7, %v4209_v22, 0.0 }
 0xa41   :  { %556 = vperm.xlu2 %3825, %v553_v53  }
 0xa46   :  { %v831_v63 = vpop.permute.xlu0 %830 }
 0xa47   :  { %vm835_vm15 = vcmp.eq.s32.totalorder %v831_v63, 1 }
 0xa49   :  { %696 = vperm.xlu2 %3825, %v691_v54   ;;  %v1033_v54 = vstv %s4452_s14 }
 0xa8b   :  { %v937_v55 = vpop.permute.xlu1 %936 }
 0xa8c   :  { %v942_v6 = vadd.f32 %v937_v55, %v4377_v56  ;;  %v969_v56 = vsel %vm967_vm6, 1, %v4048_v4  ;;  %v1026_v55 = vand.u32 7, %v4454_v50 }
 0xa8e   :  { %3895 = vtanh.f32 %v942_v6  ;;  %v1027_v6 = vshra.s32 %v4459_v43, 3 }
 0xa90   :  { %vm4471_vm5 = vcmp.eq.s32.totalorder %v1027_v6, %v4457_v52 }
 0xa93   :  { %v939_v0 = vpop.permute.xlu2 %938  ;;  %v423_v60 = vpop.permute.xlu1 %422 }
 0xa94   :  { %v3896_v57 = vpop.eup %3895  ;;  %v943_v58 = vadd.f32 %v939_v0, %v4389_v3  ;;  %vm425_vm9 = vcmp.eq.s32.totalorder %v423_v60, 1 }
 0xa95   :  { %950 = vrot.lane.b32.xlu2 %v3896_v57, %s4049_s28  ;;  %v427_v27 = vsel %vm425_vm9, %v4211_v23, 0.0 }
 0xa96   :  { %3897 = vtanh.f32 %v943_v58 }
 0xa9b   :  { %v557_v61 = vpop.permute.xlu2 %556  ;;  %v560_v13 = vpop.permute.xlu1 %559 }
 0xa9c   :  { %v3898_v2 = vpop.eup %3897  ;;  %vm561_vm8 = vcmp.eq.s32.totalorder %v557_v61, 1  ;;  %vm562_vm13 = vcmp.eq.s32.totalorder %v560_v13, 1 }
 0xa9d   :  { %971 = vperm.xlu2 %3825, %v968_v59   ;;  %952 = vrot.lane.b32.xlu0 %v3898_v2, %s4049_s28  ;;  %v563_v24 = vsel %vm561_vm8, %v4265_v20, %v426_v16  ;;  %v564_v22 = vsel %vm562_vm13, %v4267_v25, %v427_v27  ;;  %v4482_v59 = vadd.s32 8, %v4459_v43 }
 0xa9f   :  { %v1028_v2 = vshra.s32 %v4482_v59, 3 }
 0xaa1   :  { %vm1030_vm8 = vcmp.eq.s32.totalorder %v1028_v2, %v4457_v52 }
 0xaa3   :  { %v697_v62 = vpop.permute.xlu2 %696  ;;  %v694_v3 = vpop.permute.xlu1 %693 }
 0xaa4   :  { %vm698_vm12 = vcmp.eq.s32.totalorder %v694_v3, 1  ;;  %vm699_vm14 = vcmp.eq.s32.totalorder %v697_v62, 1 }
 0xaa5   :  { %974 = vperm.xlu0 %3823, %v969_v56   ;;  %v700_v29 = vsel %vm698_vm12, %v4317_v12, %v563_v24  ;;  %v701_v1 = vsel %vm699_vm14, %v4319_v38, %v564_v22  ;;  %v3830_v38 = vld [vmem:[%s5216_s7 + $0x4] ss:$0 sm:$0xff]  ;;  %s4450_s7 = sld [smem:[#allocation2]] }
 0xaa6   :  { %v837_v33 = vsel %vm835_vm15, %v4349_v40, %v700_v29 }
 0xaab   :  { %v834_v10 = vpop.permute.xlu1 %833  ;;  %v1032_v53 = vstv %s4450_s7  ;;  %s3251_s7 = sshll.u32 %s5221_s12, 4  ;;  %s3252_s7 = int_to_ptr.hbm [resolvable:$true] %s3251_s7 }
 0xaac   :  { %vm836_vm0 = vcmp.eq.s32.totalorder %v834_v10, 1  ;;  %v1034_v0 = vsel %vm1031_vm4, %v1032_v53, %v1033_v54 }
 0xaad   :  { %v838_v31 = vsel %vm836_vm0, %v4347_v39, %v701_v1  ;;  %vm4477_vm6 = vcmp.lt.s32.totalorder %v1026_v55, %v1034_v0 }
 0xaae   :  { %vm1036_vm7 = vmand %vm4471_vm5, %vm4477_vm6 }
 0xaaf   :  { %vm1037_vm9 = vmand %vm1030_vm8, %vm4477_vm6 }
 0xaef   :  { %v951_v7 = vpop.permute.xlu2 %950 }
 0xaf0   :  { %v956_v17 = vmul.f32 %v951_v7, %v946_v8 }
 0xaf2   :  { %v960_v30 = vadd.f32 %v958_v26, %v956_v17 }
 0xaf7   :  { %v972_v19 = vpop.permute.xlu2 %971 }
 0xaf8   :  { %vm976_vm1 = vcmp.eq.s32.totalorder %v972_v19, 1 }
 0xaf9   :  { %v978_v34 = vsel %vm976_vm1, %v960_v30, %v837_v33 }
 0xb0f   :  { %v953_v4 = vpop.permute.xlu0 %952 }
 0xb10   :  { %v957_v21 = vmul.f32 %v953_v4, %v947_v9 }
 0xb12   :  { %v961_v32 = vadd.f32 %v959_v11, %v957_v21 }
 0xb17   :  { %v975_v20 = vpop.permute.xlu0 %974 }
 0xb18   :  { %vm977_vm2 = vcmp.eq.s32.totalorder %v975_v20, 1 }
 0xb19   :  { %v979_v37 = vsel %vm977_vm2, %v961_v32, %v838_v31 }
 0xb1a   :  { %v985_v23 = vpack.c.bf16 %v979_v37, %v978_v34 }
 0xb1c   :  { %989 = vrot.lane.b32.xlu1 %v985_v23, %s4049_s28 }
 0xb8e   :  { %v990_v12 = vpop.permute.xlu1 %989 }
 0xb8f   :  { %3320 = vmatmul.msk.bf16.vlgmr.msra.gmra.mxu0 %vm5224_vm11, %v990_v12 }
 0xc0c   :  { %v1015_v25 = vpop.f32.mrf.mxu0 }
 0xc0d   :  { %v1016_v35 = vadd.f32 %v3830_v38, %v1015_v25 }
 0xc0f   :  { %v1038_v40 = vmul.f32 0.25, %v1016_v35 }
 0xc14   :  { %v1017_v41 = vpop.f32.mrf.mxu0 }
 0xc15   :  { %v1018_v42 = vadd.f32 %v3830_v38, %v1017_v41 }
 0xc17   :  { %v1039_v46 = vmul.f32 0.25, %v1018_v42  ;;  %v4441_v39 = vpack.c.bf16 %v1018_v42, %v1016_v35 }
 0xc19   :  { %1144 = vrot.lane.b32.xlu0 %v4441_v39, %s4059_s0  ;;  %1043 = vrot.lane.b32.xlu2 %v4441_v39, %s4049_s28  ;;  %v1040_v47 = vpack.c.bf16 %v1039_v46, %v1038_v40 }
 0xc1b   :  { %1142 = vrot.lane.b32.xlu1 %v1040_v47, %s4060_s2 }
 0xc73   :  { %v1044_v48 = vpop.permute.xlu2 %1043 }
 0xc74   :  { %v1050_v44 = vsel %vm5223_vm3, %v1044_v48, 0 }
 0xc75   :  { %1059 = vmatpush.bf16.xpose.msra.mxu1 %v1050_v44 }
 0xc7c   :  { %3321 = vmatmul.msk.bf16.vlgmr.msra.gmra.mxu1 %vm5223_vm3, %v1040_v47 }
 0xc8b   :  { %v1145_v49 = vpop.permute.xlu0 %1144 }
 0xc8c   :  { %v1150_v28 = vsel %vm5223_vm3, %v1145_v49, 0 }
 0xc8d   :  { %1159 = vmatpush.bf16.xpose.msra.mxu3 %v1150_v28  ;;  %v1143_v51 = vpop.permute.xlu1 %1142 }
 0xc94   :  { %3323 = vmatmul.msk.bf16.vlgmr.msra.gmra.mxu3 %vm5223_vm3, %v1143_v51 }
 0xcf9   :  { %v1061_v56 = vpop.f32.mrf.mxu1 }
 0xcfa   :  { %v1066_v60 = vsel %vm1036_vm7, %v1061_v56, -1e+09 }
 0xcfb   :  { %v1068_v61 = vsel %vm5223_vm3, %v1066_v60, -inf }
 0xcfc   :  { %1069 = vmax.xlane.f32.xlu2 %v1068_v61 }
 0xd01   :  { %v1063_v5 = vpop.f32.mrf.mxu1 }
 0xd02   :  { %v1067_v13 = vsel %vm1037_vm9, %v1063_v5, -1e+09 }
 0xd03   :  { %v1071_v14 = vsel %vm5223_vm3, %v1067_v13, -inf }
 0xd04   :  { %1072 = vmax.xlane.f32.xlu0 %v1071_v14 }
 0xd17   :  { %v1161_v18 = vpop.f32.mrf.mxu3 }
 0xd18   :  { %v1166_v62 = vsel %vm1036_vm7, %v1161_v18, -1e+09 }
 0xd19   :  { %v1168_v63 = vsel %vm5223_vm3, %v1166_v62, -inf }
 0xd1a   :  { %1169 = vmax.xlane.f32.xlu1 %v1168_v63 }
 0xd1f   :  { %v1163_v3 = vpop.f32.mrf.mxu3 }
 0xd20   :  { %v1167_v7 = vsel %vm1037_vm9, %v1163_v3, -1e+09 }
 0xd21   :  { %v1171_v4 = vsel %vm5223_vm3, %v1167_v7, -inf }
 0xd22   :  { %1172 = vmax.xlane.f32.xlu2 %v1171_v4 }
 0xd6f   :  { %v1070_v8 = vpop.xlane.xlu2 %1069 }
 0xd70   :  { %v1074_v9 = vsub.f32 %v1066_v60, %v1070_v8 }
 0xd72   :  { %v1076_v10 = vmul.f32 1.442695, %v1074_v9 }
 0xd74   :  { %3899 = vpow2.f32 %v1076_v10 }
 0xd77   :  { %v1073_v16 = vpop.xlane.xlu0 %1072 }
 0xd78   :  { %v1075_v17 = vsub.f32 %v1067_v13, %v1073_v16 }
 0xd7a   :  { %v3900_v19 = vpop.eup %3899  ;;  %v1078_v21 = vmul.f32 1.442695, %v1075_v17 }
 0xd7b   :  { %v1080_v24 = vsel %vm5223_vm3, %v3900_v19, 0.0 }
 0xd7c   :  { %3901 = vpow2.f32 %v1078_v21  ;;  %1081 = vadd.xlane.f32.xlu0 %v1080_v24 }
 0xd82   :  { %v3902_v26 = vpop.eup %3901 }
 0xd83   :  { %v1083_v11 = vsel %vm5223_vm3, %v3902_v26, 0.0 }
 0xd84   :  { %1084 = vadd.xlane.f32.xlu1 %v1083_v11 }
 0xd8d   :  { %v1170_v27 = vpop.xlane.xlu1 %1169 }
 0xd8e   :  { %v1174_v29 = vsub.f32 %v1166_v62, %v1170_v27 }
 0xd90   :  { %v1176_v22 = vmul.f32 1.442695, %v1174_v29 }
 0xd92   :  { %3903 = vpow2.f32 %v1176_v22 }
 0xd95   :  { %v1173_v1 = vpop.xlane.xlu2 %1172 }
 0xd96   :  { %v1175_v30 = vsub.f32 %v1167_v7, %v1173_v1 }
 0xd98   :  { %v4498_v32 = vpop.eup %3903  ;;  %v1178_v20 = vmul.f32 1.442695, %v1175_v30 }
 0xd99   :  { %v1180_v33 = vsel %vm5223_vm3, %v4498_v32, 0.0 }
 0xd9a   :  { %3905 = vpow2.f32 %v1178_v20  ;;  %1181 = vadd.xlane.f32.xlu2 %v1180_v33 }
 0xd9d   :  { %1117 = vrot.lane.b32.xlu1 %v4441_v39, %s4045_s30 }
 0xda0   :  { %v4504_v31 = vpop.eup %3905 }
 0xda1   :  { %v1183_v34 = vsel %vm5223_vm3, %v4504_v31, 0.0 }
 0xda2   :  { %1184 = vadd.xlane.f32.xlu0 %v1183_v34  ;;  %v3725_v34 = vld [vmem:[#allocation6 + $0x30] sm:$0xff] }
 0xdb2   :  { %1217 = vrot.lane.b32.xlu2 %v4441_v39, %s4061_s4 }
 0xdef   :  { %v1082_v37 = vpop.xlane.xlu0 %1081 }
 0xdf0   :  { %3907 = vrcp.f32 %v1082_v37  ;;  %v1097_v39 = vand.u32 2147483648, %v1082_v37  ;;  %vm1091_vm0 = vweird.f32 %v1082_v37  ;;  %v1095_v28 = vand.u32 2147483647, %v1082_v37 }
 0xdf2   :  { %v1098_v0 = vor.u32 1.1754944e-38, %v1097_v39  ;;  %vm1096_vm4 = vcmp.eq.f32.partialorder %v1095_v28, 8.507059e+37 }
 0xdf6   :  { %v3908_v23 = vpop.eup %3907 }
 0xdf7   :  { %v1085_v12 = vpop.xlane.xlu1 %1084  ;;  %v1087_v25 = vmul.f32 %v3908_v23, %v1082_v37  ;;  %vm1092_vm13 = vweird.f32 %v3908_v23  ;;  %v3726_v37 = vld [vmem:[#allocation6 + $0x38] sm:$0xff] }
 0xdf8   :  { %3909 = vrcp.f32 %v1085_v12  ;;  %v1112_v47 = vand.u32 2147483648, %v1085_v12  ;;  %vm1106_vm14 = vweird.f32 %v1085_v12  ;;  %v1110_v49 = vand.u32 2147483647, %v1085_v12  ;;  %vm1093_vm1 = vmor %vm1091_vm0, %vm1092_vm13  ;;  %1256 = vmatpush.bf16.msrb.mxu1 %v3726_v37 }
 0xdf9   :  { %v1088_v38 = vsub.f32 1.0, %v1087_v25 }
 0xdfa   :  { %v1113_v45 = vor.u32 1.1754944e-38, %v1112_v47  ;;  %vm1111_vm2 = vcmp.eq.f32.partialorder %v1110_v49, 8.507059e+37  ;;  %v3831_v47 = vld [vmem:[%s5214_s5 + $0xc] ss:$0 sm:$0xff] }
 0xdfb   :  { %v1089_v42 = vmul.f32 %v3908_v23, %v1088_v38 }
 0xdfd   :  { %v1090_v48 = vadd.f32 %v3908_v23, %v1089_v42 }
 0xdfe   :  { %v3910_v35 = vpop.eup %3909 }
 0xdff   :  { %v1102_v41 = vmul.f32 %v3910_v35, %v1085_v12  ;;  %vm1107_vm12 = vweird.f32 %v3910_v35  ;;  %v1094_v6 = vsel %vm1093_vm1, %v3908_v23, %v1090_v48 }
 0xe00   :  { %vm1108_vm15 = vmor %vm1106_vm14, %vm1107_vm12  ;;  %v1099_v58 = vsel %vm1096_vm4, %v1098_v0, %v1094_v6 }
 0xe01   :  { %v1103_v40 = vsub.f32 1.0, %v1102_v41  ;;  %v1100_v60 = vmul.f32 %v3900_v19, %v1099_v58 }
 0xe03   :  { %v1104_v46 = vmul.f32 %v3910_v35, %v1103_v40 }
 0xe05   :  { %v1105_v44 = vadd.f32 %v3910_v35, %v1104_v46 }
 0xe07   :  { %v1109_v51 = vsel %vm1108_vm15, %v3910_v35, %v1105_v44 }
 0xe08   :  { %v1114_v57 = vsel %vm1111_vm2, %v1113_v45, %v1109_v51  ;;  %v3336_v45 = vld [vmem:[%s5214_s5 + $0x10] sm:$0x7] }
 0xe09   :  { %v1115_v2 = vmul.f32 %v3902_v26, %v1114_v57  ;;  %v1299_v6 = vperm.slane %v3336_v45, 0 }
 0xe0b   :  { %v1116_v5 = vpack.c.bf16 %v1115_v2, %v1100_v60 }
 0xe0d   :  { %v1182_v56 = vpop.xlane.xlu2 %1181 }
 0xe0e   :  { %3911 = vrcp.f32 %v1182_v56  ;;  %v1197_v9 = vand.u32 2147483648, %v1182_v56  ;;  %vm1191_vm6 = vweird.f32 %v1182_v56  ;;  %v1195_v10 = vand.u32 2147483647, %v1182_v56 }
 0xe0f   :  { %v1118_v61 = vpop.permute.xlu1 %1117 }
 0xe10   :  { %1130 = vmatpush.bf16.msra.mxu2 %v1118_v61  ;;  %v1198_v26 = vor.u32 1.1754944e-38, %v1197_v9  ;;  %vm1196_vm9 = vcmp.eq.f32.partialorder %v1195_v10, 8.507059e+37  ;;  %v3730_v9 = vld [vmem:[#allocation6 + $0x58] sm:$0xff] }
 0xe13   :  { %3322 = vmatmul.msk.bf16.vlgmr.msra.gmra.mxu2 %vm5223_vm3, %v1116_v5 }
 0xe14   :  { %v3912_v13 = vpop.eup %3911  ;;  %1279 = vmatpush.bf16.msrb.mxu2 %v3725_v34 }
 0xe15   :  { %v1187_v14 = vmul.f32 %v3912_v13, %v1182_v56  ;;  %v1185_v18 = vpop.xlane.xlu0 %1184  ;;  %v1218_v62 = vpop.permute.xlu2 %1217  ;;  %vm1192_vm5 = vweird.f32 %v3912_v13 }
 0xe16   :  { %3913 = vrcp.f32 %v1185_v18  ;;  %1230 = vmatpush.bf16.msrb.mxu0 %v1218_v62  ;;  %vm1193_vm7 = vmor %vm1191_vm6, %vm1192_vm5  ;;  %v1212_v17 = vand.u32 2147483648, %v1185_v18  ;;  %v1210_v24 = vand.u32 2147483647, %v1185_v18  ;;  %vm1206_vm12 = vweird.f32 %v1185_v18 }
 0xe17   :  { %v1188_v63 = vsub.f32 1.0, %v1187_v14 }
 0xe18   :  { %v1213_v29 = vor.u32 1.1754944e-38, %v1212_v17  ;;  %vm1211_vm14 = vcmp.eq.f32.partialorder %v1210_v24, 8.507059e+37  ;;  %v3729_v17 = vld [vmem:[#allocation6 + $0x50] sm:$0xff] }
 0xe19   :  { %v1189_v3 = vmul.f32 %v3912_v13, %v1188_v63 }
 0xe1a   :  { %1411 = vmatpush.bf16.msra.mxu0 %v3730_v9  ;;  %v3732_v9 = vld [vmem:[#allocation6 + $0x68] sm:$0xff] }
 0xe1b   :  { %v1190_v4 = vadd.f32 %v3912_v13, %v1189_v3  ;;  %1501 = vmatpush.bf16.msra.mxu1 %v3732_v9 }
 0xe1c   :  { %v3914_v7 = vpop.eup %3913 }
 0xe1d   :  { %v1202_v8 = vmul.f32 %v3914_v7, %v1185_v18  ;;  %v1194_v19 = vsel %vm1193_vm7, %v3912_v13, %v1190_v4  ;;  %vm1207_vm8 = vweird.f32 %v3914_v7 }
 0xe1e   :  { %v1199_v27 = vsel %vm1196_vm9, %v1198_v26, %v1194_v19  ;;  %vm1208_vm13 = vmor %vm1206_vm12, %vm1207_vm8  ;;  %1412 = vmatpush.bf16.msra.mxu0 %v3729_v17  ;;  %v3731_v17 = vld [vmem:[#allocation6 + $0x60] sm:$0xff] }
 0xe1f   :  { %v1203_v16 = vsub.f32 1.0, %v1202_v8  ;;  %v1200_v30 = vmul.f32 %v4498_v32, %v1199_v27  ;;  %v3728_v32 = vld [vmem:[#allocation6 + $0x48] sm:$0xff]  ;;  %1502 = vmatpush.bf16.msra.mxu1 %v3731_v17 }
 0xe20   :  { %1321 = vmatpush.bf16.msrb.mxu3 %v3728_v32 }
 0xe21   :  { %v1204_v21 = vmul.f32 %v3914_v7, %v1203_v16 }
 0xe23   :  { %v1205_v11 = vadd.f32 %v3914_v7, %v1204_v21 }
 0xe25   :  { %v1209_v22 = vsel %vm1208_vm13, %v3914_v7, %v1205_v11 }
 0xe26   :  { %v1214_v1 = vsel %vm1211_vm14, %v1213_v29, %v1209_v22 }
 0xe27   :  { %v1215_v20 = vmul.f32 %v4504_v31, %v1214_v1  ;;  %v3727_v31 = vld [vmem:[#allocation6 + $0x40] sm:$0xff] }
 0xe28   :  { %1322 = vmatpush.bf16.msrb.mxu3 %v3727_v31 }
 0xe29   :  { %v1216_v33 = vpack.c.bf16 %v1215_v20, %v1200_v30 }
 0xe2b   :  { %3324 = vmatmul.msk.bf16.vlgmr.msrb.gmra.mxu0 %vm5223_vm3, %v1216_v33 }
 0xe96   :  { %v1132_v23 = vpop.f32.mrf.mxu2 }
 0xe9e   :  { %v1134_v12 = vpop.f32.mrf.mxu2 }
 0xe9f   :  { %v1140_v25 = vpack.c.bf16 %v1134_v12, %v1132_v23  ;;  %v1373_v23 = vperm.slane %v3336_v45, 1 }
 0xea1   :  { %3334 = vmatmul.msk.bf16.vlgmr.msrb.gmra.mxu2 %vm5223_vm3, %v1140_v25 }
 0xea8   :  { %v1232_v38 = vpop.f32.mrf.mxu0 }
 0xeb0   :  { %v1234_v35 = vpop.f32.mrf.mxu0 }
 0xeb1   :  { %v1239_v41 = vpack.c.bf16 %v1234_v35, %v1232_v38  ;;  %v1376_v35 = vperm.slane %v3336_v45, 2 }
 0xeb3   :  { %3329 = vmatmul.msk.bf16.vlgmr.msrb.gmra.mxu1 %vm5223_vm3, %v1239_v41 }
 0xf24   :  { %v1281_v42 = vpop.f32.mrf.mxu2 }
 0xf2c   :  { %v1283_v48 = vpop.f32.mrf.mxu2 }
 0xf30   :  { %v1258_v40 = vpop.f32.mrf.mxu1 }
 0xf31   :  { %v1282_v46 = vadd.f32 %v1281_v42, %v1258_v40 }
 0xf33   :  { %v1289_v39 = vadd.f32 %v3831_v47, %v1282_v46 }
 0xf38   :  { %v1260_v44 = vpop.f32.mrf.mxu1 }
 0xf39   :  { %v1284_v49 = vadd.f32 %v1283_v48, %v1260_v44 }
 0xf3b   :  { %v1290_v28 = vadd.f32 %v3831_v47, %v1284_v49  ;;  %v4534_v49 = vld [vmem:[%s5214_s5 + $0x14] sm:$0x7] }
 0xf3d   :  { %v1298_v51 = vpack.c.bf16 %v1290_v28, %v1289_v39  ;;  %v1389_v39 = vperm.slane %v4534_v49, 0 }
 0xf3f   :  { %3345 = vmatmul.msk.bf16.vlgmr.msrb.gmra.mxu3 %vm5224_vm11, %v1298_v51 }
 0xfc2   :  { %v1324_v0 = vpop.f32.mrf.mxu3 }
 0xfc3   :  { %v1325_v57 = vadd.f32 %v1324_v0, %v1299_v6 }
 0xfc5   :  { %v1329_v58 = vsel %vm5224_vm11, %v1325_v57, 0.0 }
 0xfc6   :  { %1330 = vadd.xlane.f32.xlu0 %v1329_v58 }
 0xfca   :  { %v1326_v2 = vpop.f32.mrf.mxu3 }
 0xfcb   :  { %v1327_v56 = vadd.f32 %v1326_v2, %v1299_v6 }
 0xfcd   :  { %v1332_v60 = vsel %vm5224_vm11, %v1327_v56, 0.0 }
 0xfce   :  { %1333 = vadd.xlane.f32.xlu0 %v1332_v60 }
0x1039   :  { %v1331_v61 = vpop.xlane.xlu0 %1330 }
0x103a   :  { %v1335_v5 = vmul.f32 %v1331_v61, %v4247_v36 }
0x103c   :  { %v1337_v13 = vsub.f32 %v1325_v57, %v1335_v5 }
0x103e   :  { %v1339_v14 = vmul.f32 %v1337_v13, %v1337_v13 }
0x1040   :  { %v1341_v18 = vsel %vm5224_vm11, %v1339_v14, 0.0 }
0x1041   :  { %1342 = vadd.xlane.f32.xlu0 %v1341_v18  ;;  %v1334_v62 = vpop.xlane.xlu0 %1333  ;;  %v4545_v18 = vld [vmem:[%s5214_s5 + $0x8] sm:$0x7] }
0x1042   :  { %v1336_v63 = vmul.f32 %v1334_v62, %v4247_v36 }
0x1044   :  { %v1338_v3 = vsub.f32 %v1327_v56, %v1336_v63  ;;  %v208_v63 = vperm.slane %v4545_v18, 0 }
0x1046   :  { %v1340_v7 = vmul.f32 %v1338_v3, %v1338_v3 }
0x1048   :  { %v1344_v4 = vsel %vm5224_vm11, %v1340_v7, 0.0  ;;  %v234_v7 = vadd.f32 %v4328_v15, %v208_v63 }
0x1049   :  { %1345 = vadd.xlane.f32.xlu1 %v1344_v4 }
0x104a   :  { %v237_v4 = vsel %vm5222_vm10, %v234_v7, 0.0 }
0x10b4   :  { %v1343_v8 = vpop.xlane.xlu0 %1342 }
0x10b5   :  { %v1347_v10 = vmul.f32 %v1343_v8, %v4247_v36 }
0x10b7   :  { %v1349_v16 = vadd.f32 1e-05, %v1347_v10 }
0x10b9   :  { %3915 = vrsqrt.f32 %v1349_v16  ;;  %vm1357_vm0 = vweird.f32 %v1349_v16 }
0x10bc   :  { %v1346_v19 = vpop.xlane.xlu1 %1345 }
0x10bd   :  { %v1348_v21 = vmul.f32 %v1346_v19, %v4247_v36 }
0x10bf   :  { %v3916_v24 = vpop.eup %3915  ;;  %v1350_v26 = vadd.f32 1e-05, %v1348_v21 }
0x10c0   :  { %v1352_v11 = vmul.f32 %v3916_v24, %v1349_v16  ;;  %vm1358_vm15 = vweird.f32 %v3916_v24 }
0x10c1   :  { %3917 = vrsqrt.f32 %v1350_v26  ;;  %vm1359_vm1 = vmor %vm1357_vm0, %vm1358_vm15  ;;  %vm1367_vm4 = vweird.f32 %v1350_v26 }
0x10c2   :  { %v1353_v27 = vmul.f32 %v3916_v24, %v1352_v11 }
0x10c4   :  { %v1354_v29 = vmul.f32 0.5, %v1353_v27 }
0x10c6   :  { %v1355_v22 = vsub.f32 1.5, %v1354_v29 }
0x10c7   :  { %v3918_v1 = vpop.eup %3917 }
0x10c8   :  { %v1356_v30 = vmul.f32 %v3916_v24, %v1355_v22  ;;  %v1362_v20 = vmul.f32 %v3918_v1, %v1350_v26  ;;  %vm1368_vm2 = vweird.f32 %v3918_v1 }
0x10c9   :  { %vm1369_vm5 = vmor %vm1367_vm4, %vm1368_vm2 }
0x10ca   :  { %v1360_v33 = vsel %vm1359_vm1, %v3916_v24, %v1356_v30  ;;  %v1363_v34 = vmul.f32 %v3918_v1, %v1362_v20 }
0x10cb   :  { %v1371_v12 = vmul.f32 %v1360_v33, %v1337_v13 }
0x10cc   :  { %v1364_v37 = vmul.f32 0.5, %v1363_v34 }
0x10cd   :  { %v1374_v41 = vmul.f32 %v1373_v23, %v1371_v12 }
0x10ce   :  { %v1365_v25 = vsub.f32 1.5, %v1364_v37 }
0x10cf   :  { %v1377_v42 = vadd.f32 %v1376_v35, %v1374_v41 }
0x10d0   :  { %v1366_v38 = vmul.f32 %v3918_v1, %v1365_v25 }
0x10d1   :  { %v1379_v47 = vmax.f32 %v1377_v42, 0.0  ;;  %v1466_v42 = vperm.slane %v4534_v49, 2 }
0x10d2   :  { %v1370_v32 = vsel %vm1369_vm5, %v3918_v1, %v1366_v38 }
0x10d3   :  { %v1372_v31 = vmul.f32 %v1370_v32, %v1338_v3 }
0x10d5   :  { %v1375_v40 = vmul.f32 %v1373_v23, %v1372_v31 }
0x10d7   :  { %v1378_v46 = vadd.f32 %v1376_v35, %v1375_v40  ;;  %v1463_v35 = vperm.slane %v4534_v49, 1  ;;  %v3737_v49 = vld [vmem:[%s5217_s8] sm:$0xff] }
0x10d9   :  { %v1380_v48 = vmax.f32 %v1378_v46, 0.0 }
0x10db   :  { %v1388_v44 = vpack.c.bf16 %v1380_v48, %v1379_v47 }
0x10dd   :  { %3355 = vmatmul.msk.bf16.vlgmr.msra.gmra.mxu0 %vm5224_vm11, %v1388_v44 }
0x115a   :  { %v1414_v28 = vpop.f32.mrf.mxu0 }
0x115b   :  { %v1415_v51 = vadd.f32 %v1414_v28, %v1389_v39 }
0x115d   :  { %v1419_v45 = vsel %vm5224_vm11, %v1415_v51, 0.0 }
0x115e   :  { %1420 = vadd.xlane.f32.xlu2 %v1419_v45 }
0x1162   :  { %v1416_v6 = vpop.f32.mrf.mxu0 }
0x1163   :  { %v1417_v0 = vadd.f32 %v1416_v6, %v1389_v39  ;;  %v3738_v6 = vld [vmem:[%s5217_s8 + $0x8] sm:$0xff] }
0x1164   :  { %1782 = vmatpush.bf16.msrb.mxu0 %v3738_v6 }
0x1165   :  { %v1422_v57 = vsel %vm5224_vm11, %v1417_v0, 0.0 }
0x1166   :  { %1423 = vadd.xlane.f32.xlu0 %v1422_v57 }
0x1168   :  { %1783 = vmatpush.bf16.msrb.mxu0 %v3737_v49 }
0x11d1   :  { %v1421_v58 = vpop.xlane.xlu2 %1420 }
0x11d2   :  { %v1425_v2 = vmul.f32 %v1421_v58, %v4247_v36 }
0x11d4   :  { %v1427_v56 = vsub.f32 %v1415_v51, %v1425_v2  ;;  %v4566_v2 = vshra.s32 %v4454_v50, 5 }
0x11d6   :  { %v1429_v60 = vmul.f32 %v1427_v56, %v1427_v56 }
0x11d8   :  { %v1431_v61 = vsel %vm5224_vm11, %v1429_v60, 0.0  ;;  %v1693_v60 = vadd.s32 48, %v4459_v43 }
0x11d9   :  { %v1424_v5 = vpop.xlane.xlu0 %1423  ;;  %1432 = vadd.xlane.f32.xlu0 %v1431_v61 }
0x11da   :  { %v1426_v13 = vmul.f32 %v1424_v5, %v4247_v36  ;;  %v1701_v5 = vshra.s32 %v1693_v60, 5 }
0x11dc   :  { %v1428_v14 = vsub.f32 %v1417_v0, %v1426_v13  ;;  %vm4576_vm15 = vcmp.eq.s32.totalorder %v1701_v5, %v4566_v2 }
0x11de   :  { %v1430_v62 = vmul.f32 %v1428_v14, %v1428_v14 }
0x11e0   :  { %v1434_v3 = vsel %vm5224_vm11, %v1430_v62, 0.0 }
0x11e1   :  { %1435 = vadd.xlane.f32.xlu0 %v1434_v3  ;;  %v4062_v3 = vmov 0.03125  }
0x11e9   :  { %238 = vadd.xlane.f32.xlu0 %v237_v4 }
0x124c   :  { %v1433_v8 = vpop.xlane.xlu0 %1432 }
0x124d   :  { %v1437_v10 = vmul.f32 %v1433_v8, %v4247_v36 }
0x124f   :  { %v1439_v16 = vadd.f32 1e-05, %v1437_v10  ;;  %v259_v10 = vperm.slane %v4545_v18, 1 }
0x1251   :  { %3919 = vrsqrt.f32 %v1439_v16  ;;  %vm1447_vm7 = vweird.f32 %v1439_v16 }
0x1254   :  { %v1436_v19 = vpop.xlane.xlu0 %1435 }
0x1255   :  { %v1438_v21 = vmul.f32 %v1436_v19, %v4247_v36  ;;  %v261_v19 = vperm.slane %v4545_v18, 2  ;;  %v1692_v18 = vadd.s32 40, %v4459_v43 }
0x1257   :  { %v3920_v24 = vpop.eup %3919  ;;  %v1440_v26 = vadd.f32 1e-05, %v1438_v21 }
0x1258   :  { %v1442_v11 = vmul.f32 %v3920_v24, %v1439_v16  ;;  %vm1448_vm6 = vweird.f32 %v3920_v24  ;;  %v4596_v16 = vld [vmem:[%s5214_s5 + $0x18] sm:$0x7] }
0x1259   :  { %3921 = vrsqrt.f32 %v1440_v26  ;;  %vm1449_vm8 = vmor %vm1447_vm7, %vm1448_vm6  ;;  %vm1457_vm12 = vweird.f32 %v1440_v26 }
0x125a   :  { %v1443_v15 = vmul.f32 %v3920_v24, %v1442_v11 }
0x125c   :  { %v1444_v27 = vmul.f32 0.5, %v1443_v15  ;;  %v239_v29 = vpop.xlane.xlu0 %238 }
0x125d   :  { %v240_v22 = vmul.f32 %v239_v29, %v4247_v36 }
0x125e   :  { %v1445_v1 = vsub.f32 1.5, %v1444_v27 }
0x125f   :  { %v3922_v30 = vpop.eup %3921  ;;  %v241_v20 = vsub.f32 %v234_v7, %v240_v22 }
0x1260   :  { %v1446_v33 = vmul.f32 %v3920_v24, %v1445_v1  ;;  %v1452_v34 = vmul.f32 %v3922_v30, %v1440_v26  ;;  %vm1458_vm9 = vweird.f32 %v3922_v30 }
0x1261   :  { %v242_v37 = vmul.f32 %v241_v20, %v241_v20  ;;  %vm1459_vm13 = vmor %vm1457_vm12, %vm1458_vm9  ;;  %vm5225_vm12 = vcmask 523264  }
0x1262   :  { %v1450_v23 = vsel %vm1449_vm8, %v3920_v24, %v1446_v33  ;;  %v1453_v12 = vmul.f32 %v3922_v30, %v1452_v34  ;;  %v1479_v24 = vperm.slane %v4596_v16, 0  ;;  %v1691_v34 = vadd.s32 32, %v4459_v43 }
0x1263   :  { %v243_v25 = vsel %vm5222_vm10, %v242_v37, 0.0  ;;  %v1461_v41 = vmul.f32 %v1450_v23, %v1427_v56  ;;  %v1694_v56 = vadd.s32 56, %v4459_v43  ;;  %v5040_v37 = vld [vmem:[%s5220_s11] sm:$0x7] }
0x1264   :  { %v1454_v38 = vmul.f32 0.5, %v1453_v12  ;;  %244 = vadd.xlane.f32.xlu0 %v243_v25  ;;  %v1699_v23 = vshra.s32 %v1691_v34, 5  ;;  %v1690_v12 = vadd.s32 24, %v4459_v43  ;;  %v1696_v25 = vshra.s32 %v4482_v59, 5 }
0x1265   :  { %v1464_v40 = vmul.f32 %v1463_v35, %v1461_v41  ;;  %v1702_v61 = vshra.s32 %v1694_v56, 5  ;;  %v1689_v41 = vadd.s32 16, %v4459_v43 }
0x1266   :  { %v1455_v32 = vsub.f32 1.5, %v1454_v38  ;;  %vm4622_vm5 = vcmp.eq.s32.totalorder %v1699_v23, %v4566_v2  ;;  %vm4645_vm7 = vcmp.eq.s32.totalorder %v1696_v25, %v4566_v2  ;;  %v1556_v23 = vperm.slane %v4596_v16, 2 }
0x1267   :  { %v1467_v48 = vadd.f32 %v1466_v42, %v1464_v40  ;;  %vm4571_vm14 = vcmp.eq.s32.totalorder %v1702_v61, %v4566_v2  ;;  %v1697_v59 = vshra.s32 %v1689_v41, 5  ;;  %v1695_v40 = vshra.s32 %v4459_v43, 5 }
0x1268   :  { %v1456_v31 = vmul.f32 %v3922_v30, %v1455_v32  ;;  %3396 = vmatpush.msk.msrb.mxu1 %vm4571_vm14, %v4062_v3  ;;  %3431 = vmatpush.msk.msra.mxu0 %vm4571_vm14, %v4062_v3  ;;  %v1975_v32 = vperm.slane %v5040_v37, 0 }
0x1269   :  { %v1469_v28 = vmax.f32 %v1467_v48, 0.0  ;;  %vm4650_vm8 = vcmp.eq.s32.totalorder %v1697_v59, %v4566_v2  ;;  %vm4668_vm9 = vcmp.eq.s32.totalorder %v1695_v40, %v4566_v2 }
0x126a   :  { %v1460_v46 = vsel %vm1459_vm13, %v3922_v30, %v1456_v31  ;;  %3397 = vmatpush.msk.msrb.mxu1 %vm4576_vm15, %v4062_v3  ;;  %3432 = vmatpush.msk.msra.mxu0 %vm4576_vm15, %v4062_v3 }
0x126b   :  { %v1462_v47 = vmul.f32 %v1460_v46, %v1428_v14 }
0x126d   :  { %v1465_v44 = vmul.f32 %v1463_v35, %v1462_v47  ;;  %v1698_v35 = vshra.s32 %v1690_v12, 5 }
0x126f   :  { %v1468_v39 = vadd.f32 %v1466_v42, %v1465_v44  ;;  %vm4634_vm6 = vcmp.eq.s32.totalorder %v1698_v35, %v4566_v2 }
0x1271   :  { %v1470_v51 = vmax.f32 %v1468_v39, 0.0  ;;  %v4706_v39 = vld [vmem:[%s5218_s9] sm:$0x7] }
0x1273   :  { %v1478_v45 = vpack.c.bf16 %v1470_v51, %v1469_v28 }
0x1275   :  { %3365 = vmatmul.msk.bf16.vlgmr.msra.gmra.mxu1 %vm5224_vm11, %v1478_v45  ;;  %v1760_v45 = vperm.slane %v4706_v39, 0 }
0x12d7   :  { %v245_v0 = vpop.xlane.xlu0 %244 }
0x12d8   :  { %v246_v57 = vmul.f32 %v245_v0, %v4247_v36 }
0x12da   :  { %v247_v58 = vadd.f32 1e-05, %v246_v57 }
0x12dc   :  { %3923 = vrsqrt.f32 %v247_v58  ;;  %vm254_vm1 = vweird.f32 %v247_v58 }
0x12e2   :  { %v3924_v13 = vpop.eup %3923 }
0x12e3   :  { %v249_v63 = vmul.f32 %v3924_v13, %v247_v58  ;;  %vm255_vm0 = vweird.f32 %v3924_v13 }
0x12e4   :  { %vm256_vm2 = vmor %vm254_vm1, %vm255_vm0 }
0x12e5   :  { %v250_v7 = vmul.f32 %v3924_v13, %v249_v63 }
0x12e7   :  { %v251_v4 = vmul.f32 0.5, %v250_v7 }
0x12e9   :  { %v252_v8 = vsub.f32 1.5, %v251_v4  ;;  %v3733_v4 = vld [vmem:[#allocation6 + $0x70] sm:$0xff] }
0x12eb   :  { %v253_v9 = vmul.f32 %v3924_v13, %v252_v8 }
0x12ed   :  { %v257_v17 = vsel %vm256_vm2, %v3924_v13, %v253_v9  ;;  %v3734_v13 = vld [vmem:[#allocation6 + $0x78] sm:$0xff] }
0x12ee   :  { %v258_v21 = vmul.f32 %v257_v17, %v241_v20  ;;  %v1700_v20 = vshra.s32 %v1692_v18, 5  ;;  %1591 = vmatpush.bf16.msra.mxu2 %v3734_v13 }
0x12f0   :  { %v260_v26 = vmul.f32 %v259_v10, %v258_v21  ;;  %vm4609_vm4 = vcmp.eq.s32.totalorder %v1700_v20, %v4566_v2 }
0x12f1   :  { %3398 = vmatpush.msk.msrb.mxu1 %vm4609_vm4, %v4062_v3  ;;  %3433 = vmatpush.msk.msra.mxu0 %vm4609_vm4, %v4062_v3 }
0x12f2   :  { %v1504_v11 = vpop.f32.mrf.mxu1  ;;  %v262_v15 = vadd.f32 %v261_v19, %v260_v26  ;;  %1592 = vmatpush.bf16.msra.mxu2 %v3733_v4 }
0x12f3   :  { %v1505_v27 = vadd.f32 %v1504_v11, %v1479_v24  ;;  %3399 = vmatpush.msk.msrb.mxu1 %vm4622_vm5, %v4062_v3  ;;  %3434 = vmatpush.msk.msra.mxu0 %vm4622_vm5, %v4062_v3 }
0x12f4   :  { %v4600_v29 = vpack.c.bf16 %v262_v15, %v262_v15 }
0x12f5   :  { %v1509_v22 = vsel %vm5224_vm11, %v1505_v27, 0.0  ;;  %3400 = vmatpush.msk.msrb.mxu1 %vm4634_vm6, %v4062_v3  ;;  %3435 = vmatpush.msk.msra.mxu0 %vm4634_vm6, %v4062_v3 }
0x12f6   :  { %1510 = vadd.xlane.f32.xlu1 %v1509_v22  ;;  %3395 = vmatmul.msk.bf16.vlgmr.msrb.gmra.mxu0 %vm5224_vm11, %v4600_v29 }
0x12f7   :  { %3401 = vmatpush.msk.msrb.mxu1 %vm4650_vm8, %v4062_v3  ;;  %3436 = vmatpush.msk.msra.mxu0 %vm4650_vm8, %v4062_v3 }
0x12f8   :  { %3405 = vmatpush.msk.msrb.mxu2 %vm4571_vm14, %v4062_v3 }
0x12f9   :  { %3402 = vmatpush.msk.msrb.mxu1 %vm4645_vm7, %v4062_v3  ;;  %3437 = vmatpush.msk.msra.mxu0 %vm4645_vm7, %v4062_v3 }
0x12fa   :  { %v1506_v1 = vpop.f32.mrf.mxu1  ;;  %3406 = vmatpush.msk.msrb.mxu2 %vm4576_vm15, %v4062_v3 }
0x12fb   :  { %v1507_v30 = vadd.f32 %v1506_v1, %v1479_v24  ;;  %3403 = vmatpush.msk.msrb.mxu1 %vm4668_vm9, %v4062_v3  ;;  %3438 = vmatpush.msk.msra.mxu0 %vm4668_vm9, %v4062_v3 }
0x12fc   :  { %3407 = vmatpush.msk.msrb.mxu2 %vm4609_vm4, %v4062_v3 }
0x12fd   :  { %v1512_v33 = vsel %vm5224_vm11, %v1507_v30, 0.0  ;;  %3440 = vmatpush.msk.msra.mxu1 %vm4571_vm14, %v4062_v3 }
0x12fe   :  { %1513 = vadd.xlane.f32.xlu2 %v1512_v33  ;;  %3408 = vmatpush.msk.msrb.mxu2 %vm4622_vm5, %v4062_v3  ;;  %v1553_v33 = vperm.slane %v4596_v16, 1  ;;  %v4750_v16 = vld [vmem:[%s5214_s5 + $0x1c] sm:$0x7] }
0x12ff   :  { %3441 = vmatpush.msk.msra.mxu1 %vm4576_vm15, %v4062_v3 }
0x1300   :  { %3409 = vmatpush.msk.msrb.mxu2 %vm4634_vm6, %v4062_v3 }
0x1301   :  { %3442 = vmatpush.msk.msra.mxu1 %vm4609_vm4, %v4062_v3 }
0x1302   :  { %3410 = vmatpush.msk.msrb.mxu2 %vm4650_vm8, %v4062_v3 }
0x1303   :  { %3443 = vmatpush.msk.msra.mxu1 %vm4622_vm5, %v4062_v3 }
0x1304   :  { %3411 = vmatpush.msk.msrb.mxu2 %vm4645_vm7, %v4062_v3 }
0x1305   :  { %3444 = vmatpush.msk.msra.mxu1 %vm4634_vm6, %v4062_v3 }
0x1306   :  { %3412 = vmatpush.msk.msrb.mxu2 %vm4668_vm9, %v4062_v3 }
0x1307   :  { %3445 = vmatpush.msk.msra.mxu1 %vm4650_vm8, %v4062_v3 }
0x1309   :  { %3446 = vmatpush.msk.msra.mxu1 %vm4645_vm7, %v4062_v3 }
0x130b   :  { %3447 = vmatpush.msk.msra.mxu1 %vm4668_vm9, %v4062_v3 }
0x1369   :  { %v1511_v47 = vpop.xlane.xlu1 %1510 }
0x136a   :  { %v1515_v48 = vmul.f32 %v1511_v47, %v4247_v36 }
0x136c   :  { %v1517_v44 = vsub.f32 %v1505_v27, %v1515_v48 }
0x136e   :  { %v1519_v28 = vmul.f32 %v1517_v44, %v1517_v44 }
0x1370   :  { %v1521_v51 = vsel %vm5224_vm11, %v1519_v28, 0.0 }
0x1371   :  { %v1514_v6 = vpop.xlane.xlu2 %1513  ;;  %1522 = vadd.xlane.f32.xlu0 %v1521_v51 }
0x1372   :  { %v1516_v49 = vmul.f32 %v1514_v6, %v4247_v36  ;;  %v1569_v6 = vperm.slane %v4750_v16, 0 }
0x1373   :  { %v1785_v0 = vpop.f32.mrf.mxu0 }
0x1374   :  { %v1518_v57 = vsub.f32 %v1507_v30, %v1516_v49  ;;  %v1786_v58 = vadd.f32 %v1785_v0, %v1760_v45 }
0x1376   :  { %3404 = vmatmul.msk.f32.vlgmr.msrb.gmra.mxu1 %vm5225_vm12, %v1786_v58  ;;  %v1520_v56 = vmul.f32 %v1518_v57, %v1518_v57 }
0x1378   :  { %v1524_v60 = vsel %vm5224_vm11, %v1520_v56, 0.0 }
0x1379   :  { %1525 = vadd.xlane.f32.xlu1 %v1524_v60 }
0x137b   :  { %v1787_v61 = vpop.f32.mrf.mxu0 }
0x13e4   :  { %v1523_v5 = vpop.xlane.xlu0 %1522 }
0x13e5   :  { %v1527_v63 = vmul.f32 %v1523_v5, %v4247_v36 }
0x13e7   :  { %v1529_v7 = vadd.f32 1e-05, %v1527_v63 }
0x13e9   :  { %3925 = vrsqrt.f32 %v1529_v7  ;;  %vm1537_vm0 = vweird.f32 %v1529_v7 }
0x13ec   :  { %v1526_v8 = vpop.xlane.xlu1 %1525 }
0x13ed   :  { %v1528_v9 = vmul.f32 %v1526_v8, %v4247_v36 }
0x13ef   :  { %v3926_v10 = vpop.eup %3925  ;;  %v1530_v17 = vadd.f32 1e-05, %v1528_v9 }
0x13f0   :  { %v1532_v19 = vmul.f32 %v3926_v10, %v1529_v7  ;;  %vm1538_vm13 = vweird.f32 %v3926_v10 }
0x13f1   :  { %3927 = vrsqrt.f32 %v1530_v17  ;;  %vm1539_vm1 = vmor %vm1537_vm0, %vm1538_vm13  ;;  %vm1547_vm10 = vweird.f32 %v1530_v17 }
0x13f2   :  { %v1533_v21 = vmul.f32 %v3926_v10, %v1532_v19 }
0x13f3   :  { %v1810_v51 = vpop.f32.mrf.mxu1 }
0x13f4   :  { %v1534_v24 = vmul.f32 0.5, %v1533_v21 }
0x13f6   :  { %v1535_v26 = vsub.f32 1.5, %v1534_v24  ;;  %v3736_v24 = vld [vmem:[#allocation6 + $0x88] sm:$0xff] }
0x13f7   :  { %v3928_v11 = vpop.eup %3927  ;;  %1681 = vmatpush.bf16.msra.mxu3 %v3736_v24 }
0x13f8   :  { %v1536_v15 = vmul.f32 %v3926_v10, %v1535_v26  ;;  %v1542_v27 = vmul.f32 %v3928_v11, %v1530_v17  ;;  %vm1548_vm2 = vweird.f32 %v3928_v11 }
0x13f9   :  { %vm1549_vm3 = vmor %vm1547_vm10, %vm1548_vm2 }
0x13fa   :  { %v1540_v22 = vsel %vm1539_vm1, %v3926_v10, %v1536_v15  ;;  %v1543_v1 = vmul.f32 %v3928_v11, %v1542_v27  ;;  %v3735_v27 = vld [vmem:[#allocation6 + $0x80] sm:$0xff] }
0x13fb   :  { %v1551_v18 = vmul.f32 %v1540_v22, %v1517_v44  ;;  %v4742_v44 = vsub.f32 %v1786_v58, %v1810_v51  ;;  %1682 = vmatpush.bf16.msra.mxu3 %v3735_v27 }
0x13fc   :  { %v1544_v30 = vmul.f32 0.5, %v1543_v1  ;;  %v3742_v1 = vld [vmem:[%s5217_s8 + $0x28] sm:$0xff] }
0x13fd   :  { %v1554_v12 = vmul.f32 %v1553_v33, %v1551_v18  ;;  %v1814_v45 = vmul.f32 %v4742_v44, %v4742_v44 }
0x13fe   :  { %v1545_v20 = vsub.f32 1.5, %v1544_v30 }
0x13ff   :  { %v1557_v41 = vadd.f32 %v1556_v23, %v1554_v12  ;;  %1895 = vmatpush.bf16.msrb.mxu3 %v3742_v1 }
0x1400   :  { %v1546_v34 = vmul.f32 %v3928_v11, %v1545_v20 }
0x1401   :  { %v1559_v47 = vmax.f32 %v1557_v41, 0.0 }
0x1402   :  { %v1550_v25 = vsel %vm1549_vm3, %v3928_v11, %v1546_v34 }
0x1403   :  { %v1552_v35 = vmul.f32 %v1550_v25, %v1518_v57  ;;  %v3740_v25 = vld [vmem:[%s5217_s8 + $0x18] sm:$0xff] }
0x1405   :  { %v1555_v59 = vmul.f32 %v1553_v33, %v1552_v35  ;;  %v3741_v33 = vld [vmem:[%s5217_s8 + $0x20] sm:$0xff] }
0x1406   :  { %1896 = vmatpush.bf16.msrb.mxu3 %v3741_v33  ;;  %v1727_v33 = vadd.s32 120, %v4459_v43 }
0x1407   :  { %v1558_v40 = vadd.f32 %v1556_v23, %v1555_v59 }
0x1409   :  { %v1560_v48 = vmax.f32 %v1558_v40, 0.0  ;;  %v3739_v40 = vld [vmem:[%s5217_s8 + $0x10] sm:$0xff] }
0x140a   :  { %1897 = vmatpush.bf16.msrb.mxu3 %v3740_v25  ;;  %v1723_v25 = vadd.s32 88, %v4459_v43 }
0x140b   :  { %v1568_v28 = vpack.c.bf16 %v1560_v48, %v1559_v47 }
0x140d   :  { %3375 = vmatmul.msk.bf16.vlgmr.msra.gmra.mxu2 %vm5224_vm11, %v1568_v28 }
0x140e   :  { %1898 = vmatpush.bf16.msrb.mxu3 %v3739_v40  ;;  %v1722_v40 = vadd.s32 80, %v4459_v43 }
0x141d   :  { %3413 = vmatmul.msk.f32.vlgmr.msrb.gmra.mxu2 %vm5225_vm12, %v1814_v45 }
0x1490   :  { %v1594_v49 = vpop.f32.mrf.mxu2 }
0x1491   :  { %v1595_v0 = vadd.f32 %v1594_v49, %v1569_v6 }
0x1493   :  { %v1599_v57 = vsel %vm5224_vm11, %v1595_v0, 0.0 }
0x1494   :  { %1600 = vadd.xlane.f32.xlu2 %v1599_v57  ;;  %v1643_v57 = vperm.slane %v4750_v16, 1 }
0x1498   :  { %v1596_v56 = vpop.f32.mrf.mxu2 }
0x1499   :  { %v1597_v58 = vadd.f32 %v1596_v56, %v1569_v6 }
0x149b   :  { %v1602_v60 = vsel %vm5224_vm11, %v1597_v58, 0.0 }
0x149c   :  { %1603 = vadd.xlane.f32.xlu0 %v1602_v60 }
0x14a0   :  { %v1835_v19 = vpop.f32.mrf.mxu2 }
0x14a1   :  { %v1836_v11 = vadd.f32 1e-05, %v1835_v19 }
0x1507   :  { %v1601_v61 = vpop.xlane.xlu2 %1600 }
0x1508   :  { %v1605_v5 = vmul.f32 %v1601_v61, %v4247_v36 }
0x150a   :  { %v1607_v13 = vsub.f32 %v1595_v0, %v1605_v5  ;;  %v1646_v5 = vperm.slane %v4750_v16, 2  ;;  %v1851_v16 = vperm.slane %v4706_v39, 2 }
0x150c   :  { %v1609_v63 = vmul.f32 %v1607_v13, %v1607_v13 }
0x150e   :  { %v1611_v7 = vsel %vm5224_vm11, %v1609_v63, 0.0 }
0x150f   :  { %v1604_v4 = vpop.xlane.xlu0 %1603  ;;  %1612 = vadd.xlane.f32.xlu1 %v1611_v7 }
0x1510   :  { %v1606_v8 = vmul.f32 %v1604_v4, %v4247_v36 }
0x1512   :  { %v1608_v9 = vsub.f32 %v1597_v58, %v1606_v8 }
0x1514   :  { %v1610_v10 = vmul.f32 %v1608_v9, %v1608_v9 }
0x1516   :  { %v1614_v17 = vsel %vm5224_vm11, %v1610_v10, 0.0 }
0x1517   :  { %1615 = vadd.xlane.f32.xlu2 %v1614_v17 }
0x1582   :  { %v1613_v21 = vpop.xlane.xlu1 %1612 }
0x1583   :  { %v1617_v26 = vmul.f32 %v1613_v21, %v4247_v36 }
0x1585   :  { %v1619_v15 = vadd.f32 1e-05, %v1617_v26  ;;  %v1849_v26 = vperm.slane %v4706_v39, 1  ;;  %v1726_v39 = vadd.s32 112, %v4459_v43 }
0x1587   :  { %3929 = vrsqrt.f32 %v1619_v15  ;;  %vm1627_vm3 = vweird.f32 %v1619_v15 }
0x1588   :  { %3931 = vrsqrt.f32 %v1836_v11 }
0x158a   :  { %v1616_v22 = vpop.xlane.xlu2 %1615 }
0x158b   :  { %v1618_v30 = vmul.f32 %v1616_v22, %v4247_v36 }
0x158d   :  { %v3930_v18 = vpop.eup %3929  ;;  %v1620_v20 = vadd.f32 1e-05, %v1618_v30 }
0x158e   :  { %v1622_v34 = vmul.f32 %v3930_v18, %v1619_v15  ;;  %v3932_v23 = vpop.eup %3931  ;;  %vm1628_vm10 = vweird.f32 %v3930_v18 }
0x158f   :  { %3933 = vrsqrt.f32 %v1620_v20  ;;  %v1839_v35 = vmul.f32 %v3932_v23, %v1836_v11  ;;  %vm1629_vm13 = vmor %vm1627_vm3, %vm1628_vm10  ;;  %vm1637_vm1 = vweird.f32 %v1620_v20  ;;  %vm1845_vm10 = vweird.f32 %v3932_v23 }
0x1590   :  { %v1623_v12 = vmul.f32 %v3930_v18, %v1622_v34  ;;  %vm1844_vm3 = vweird.f32 %v1836_v11  ;;  %v3744_v11 = vld [vmem:[%s5219_s10 + $0x8] sm:$0xff]  ;;  %v1735_v34 = vshra.s32 %v1727_v33, 5 }
0x1591   :  { %v1840_v48 = vmul.f32 %v3932_v23, %v1839_v35  ;;  %1997 = vmatpush.bf16.msrb.mxu0 %v3744_v11 }
0x1592   :  { %v1624_v41 = vmul.f32 0.5, %v1623_v12 }
0x1593   :  { %v1841_v49 = vmul.f32 0.5, %v1840_v48  ;;  %v3749_v48 = vld [vmem:[%s5219_s10 + $0x30] sm:$0xff] }
0x1594   :  { %v1625_v59 = vsub.f32 1.5, %v1624_v41 }
0x1595   :  { %v3934_v47 = vpop.eup %3933  ;;  %v1842_v60 = vsub.f32 1.5, %v1841_v49  ;;  %v1720_v49 = vadd.s32 64, %v4459_v43 }
0x1596   :  { %v1626_v28 = vmul.f32 %v3930_v18, %v1625_v59  ;;  %v1632_v51 = vmul.f32 %v3934_v47, %v1620_v20  ;;  %vm1638_vm0 = vweird.f32 %v3934_v47  ;;  %v1724_v20 = vadd.s32 96, %v4459_v43 }
0x1597   :  { %vm1639_vm2 = vmor %vm1637_vm1, %vm1638_vm0  ;;  %v1843_v8 = vmul.f32 %v3932_v23, %v1842_v60  ;;  %vm4792_vm0 = vcmp.eq.s32.totalorder %v1735_v34, %v4566_v2 }
0x1598   :  { %v1630_v45 = vsel %vm1629_vm13, %v3930_v18, %v1626_v28  ;;  %v1633_v6 = vmul.f32 %v3934_v47, %v1632_v51  ;;  %vm1846_vm13 = vmor %vm1844_vm3, %vm1845_vm10  ;;  %v1725_v18 = vadd.s32 104, %v4459_v43  ;;  %v1732_v59 = vshra.s32 %v1724_v20, 5  ;;  %3475 = vmatpush.msk.msra.mxu2 %vm4792_vm0, %v4062_v3  ;;  %3523 = vmatpush.msk.msrb.mxu1 %vm4792_vm0, %v4062_v3 }
0x1599   :  { %v1641_v56 = vmul.f32 %v1630_v45, %v1607_v13  ;;  %v1847_v21 = vsel %vm1846_vm13, %v3932_v23, %v1843_v8  ;;  %v1734_v23 = vshra.s32 %v1726_v39, 5  ;;  %v1731_v28 = vshra.s32 %v1723_v25, 5  ;;  %v3746_v45 = vld [vmem:[%s5219_s10 + $0x18] sm:$0xff] }
0x159a   :  { %v1634_v0 = vmul.f32 0.5, %v1633_v6  ;;  %v1848_v15 = vmul.f32 %v1847_v21, %v4742_v44  ;;  %v3743_v44 = vld [vmem:[%s5219_s10] sm:$0xff]  ;;  %v1733_v12 = vshra.s32 %v1725_v18, 5  ;;  %v1721_v51 = vadd.s32 72, %v4459_v43 }
0x159b   :  { %v1644_v63 = vmul.f32 %v1643_v57, %v1641_v56  ;;  %1998 = vmatpush.bf16.msrb.mxu0 %v3743_v44  ;;  %vm4797_vm1 = vcmp.eq.s32.totalorder %v1734_v23, %v4566_v2  ;;  %vm4821_vm10 = vcmp.eq.s32.totalorder %v1732_v59, %v4566_v2  ;;  %v1730_v6 = vshra.s32 %v1722_v40, 5  ;;  %v3752_v59 = vld [vmem:[%s5219_s10 + $0x48] sm:$0xff]  ;;  %v3751_v40 = vld [vmem:[%s5219_s10 + $0x40] sm:$0xff] }
0x159c   :  { %v1635_v58 = vsub.f32 1.5, %v1634_v0  ;;  %3476 = vmatpush.msk.msra.mxu2 %vm4797_vm1, %v4062_v3  ;;  %3524 = vmatpush.msk.msrb.mxu1 %vm4797_vm1, %v4062_v3  ;;  %vm4836_vm3 = vcmp.eq.s32.totalorder %v1731_v28, %v4566_v2  ;;  %v3748_v28 = vld [vmem:[%s5219_s10 + $0x28] sm:$0xff] }
0x159d   :  { %v1647_v10 = vadd.f32 %v1646_v5, %v1644_v63  ;;  %vm4850_vm13 = vcmp.eq.s32.totalorder %v1730_v6, %v4566_v2  ;;  %v5261_v63 = vmov 0 }
0x159e   :  { %v1636_v61 = vmul.f32 %v3934_v47, %v1635_v58  ;;  %v1728_v58 = vshra.s32 %v1720_v49, 5  ;;  %v3745_v49 = vld [vmem:[%s5219_s10 + $0x10] sm:$0xff] }
0x159f   :  { %v1649_v13 = vmax.f32 %v1647_v10, 0.0 }
0x15a0   :  { %v1640_v7 = vsel %vm1639_vm2, %v3934_v47, %v1636_v61  ;;  %vm4806_vm2 = vcmp.eq.s32.totalorder %v1733_v12, %v4566_v2 }
0x15a1   :  { %v1642_v4 = vmul.f32 %v1640_v7, %v1608_v9  ;;  %v1850_v9 = vmul.f32 %v1849_v26, %v1848_v15  ;;  %3477 = vmatpush.msk.msra.mxu2 %vm4806_vm2, %v4062_v3  ;;  %3525 = vmatpush.msk.msrb.mxu1 %vm4806_vm2, %v4062_v3 }
0x15a3   :  { %v1645_v17 = vmul.f32 %v1643_v57, %v1642_v4  ;;  %v1852_v22 = vadd.f32 %v1851_v16, %v1850_v9  ;;  %v1729_v57 = vshra.s32 %v1721_v51, 5  ;;  %3478 = vmatpush.msk.msra.mxu2 %vm4821_vm10, %v4062_v3  ;;  %3526 = vmatpush.msk.msrb.mxu1 %vm4821_vm10, %v4062_v3  ;;  %v3747_v51 = vld [vmem:[%s5219_s10 + $0x20] sm:$0xff] }
0x15a5   :  { %v1648_v19 = vadd.f32 %v1646_v5, %v1645_v17  ;;  %v1853_v1 = vmax.f32 %v1852_v22, 0.0  ;;  %3479 = vmatpush.msk.msra.mxu2 %vm4836_vm3, %v4062_v3  ;;  %3527 = vmatpush.msk.msrb.mxu1 %vm4836_vm3, %v4062_v3  ;;  %v4877_v5 = vld [vmem:[%s5218_s9 + $0x4] sm:$0x7] }
0x15a6   :  { %v1863_v7 = vperm.slane %v4877_v5, 0  ;;  %v1963_v33 = vperm.slane %v4877_v5, 1  ;;  %v1965_v23 = vperm.slane %v4877_v5, 2 }
0x15a7   :  { %v1650_v24 = vmax.f32 %v1648_v19, 0.0  ;;  %v1862_v30 = vpack.c.bf16 %v1853_v1, %v1853_v1  ;;  %3480 = vmatpush.msk.msra.mxu2 %vm4850_vm13, %v4062_v3  ;;  %3528 = vmatpush.msk.msrb.mxu1 %vm4850_vm13, %v4062_v3 }
0x15a9   :  { %v1658_v27 = vpack.c.bf16 %v1650_v24, %v1649_v13 }
0x15ab   :  { %3385 = vmatmul.msk.bf16.vlgmr.msra.gmra.mxu3 %vm5224_vm11, %v1658_v27  ;;  %vm4864_vm11 = vcmp.eq.s32.totalorder %v1729_v57, %v4566_v2 }
0x15ac   :  { %3459 = vmatpush.msk.msra.mxu3 %vm4792_vm0, %v4062_v3  ;;  %3481 = vmatpush.msk.msra.mxu2 %vm4864_vm11, %v4062_v3 }
0x15ad   :  { %3529 = vmatpush.msk.msrb.mxu1 %vm4864_vm11, %v4062_v3 }
0x15ae   :  { %3460 = vmatpush.msk.msra.mxu3 %vm4797_vm1, %v4062_v3 }
0x15b0   :  { %3461 = vmatpush.msk.msra.mxu3 %vm4806_vm2, %v4062_v3 }
0x15b2   :  { %3462 = vmatpush.msk.msra.mxu3 %vm4821_vm10, %v4062_v3 }
0x15b4   :  { %3463 = vmatpush.msk.msra.mxu3 %vm4836_vm3, %v4062_v3 }
0x15b6   :  { %3464 = vmatpush.msk.msra.mxu3 %vm4850_vm13, %v4062_v3 }
0x15b8   :  { %3465 = vmatpush.msk.msra.mxu3 %vm4864_vm11, %v4062_v3 }
0x15bb   :  { %3430 = vmatmul.msk.bf16.vlgmr.msrb.gmra.mxu3 %vm5225_vm12, %v1862_v30  ;;  %vm4883_vm12 = vcmp.eq.s32.totalorder %v1728_v58, %v4566_v2  ;;  %v3376_v2 = vld [vmem:[%s5214_s5 + $0x20] sm:$0x7] }
0x15bc   :  { %v5262_v63 = vsel %vm4883_vm12, 4294967295, %v5261_v63  ;;  %3466 = vmatpush.msk.msra.mxu3 %vm4883_vm12, %v4062_v3  ;;  %3482 = vmatpush.msk.msra.mxu2 %vm4883_vm12, %v4062_v3  ;;  %v1659_v10 = vperm.slane %v3376_v2, 0 }
0x15bd   :  { %3530 = vmatpush.msk.msrb.mxu1 %vm4883_vm12, %v4062_v3  ;;  %vm5263_vm12 = vcmask 523264  }
0x15be   :  { %3467 = vmatpush.msk.msra.mxu3 %vm4571_vm14, %v4062_v3  ;;  %3483 = vmatpush.msk.msra.mxu2 %vm4571_vm14, %v4062_v3 }
0x15bf   :  { %3531 = vmatpush.msk.msrb.mxu1 %vm4571_vm14, %v4062_v3 }
0x15c0   :  { %3468 = vmatpush.msk.msra.mxu3 %vm4576_vm15, %v4062_v3  ;;  %3484 = vmatpush.msk.msra.mxu2 %vm4576_vm15, %v4062_v3 }
0x15c1   :  { %3532 = vmatpush.msk.msrb.mxu1 %vm4576_vm15, %v4062_v3 }
0x15c2   :  { %3469 = vmatpush.msk.msra.mxu3 %vm4609_vm4, %v4062_v3  ;;  %3485 = vmatpush.msk.msra.mxu2 %vm4609_vm4, %v4062_v3 }
0x15c3   :  { %3533 = vmatpush.msk.msrb.mxu1 %vm4609_vm4, %v4062_v3 }
0x15c4   :  { %3470 = vmatpush.msk.msra.mxu3 %vm4622_vm5, %v4062_v3  ;;  %3486 = vmatpush.msk.msra.mxu2 %vm4622_vm5, %v4062_v3 }
0x15c5   :  { %3534 = vmatpush.msk.msrb.mxu1 %vm4622_vm5, %v4062_v3 }
0x15c6   :  { %3471 = vmatpush.msk.msra.mxu3 %vm4634_vm6, %v4062_v3  ;;  %3487 = vmatpush.msk.msra.mxu2 %vm4634_vm6, %v4062_v3 }
0x15c7   :  { %3535 = vmatpush.msk.msrb.mxu1 %vm4634_vm6, %v4062_v3 }
0x15c8   :  { %3472 = vmatpush.msk.msra.mxu3 %vm4650_vm8, %v4062_v3  ;;  %3488 = vmatpush.msk.msra.mxu2 %vm4650_vm8, %v4062_v3 }
0x15c9   :  { %3536 = vmatpush.msk.msrb.mxu1 %vm4650_vm8, %v4062_v3 }
0x15ca   :  { %3473 = vmatpush.msk.msra.mxu3 %vm4645_vm7, %v4062_v3  ;;  %3489 = vmatpush.msk.msra.mxu2 %vm4645_vm7, %v4062_v3 }
0x15cb   :  { %3537 = vmatpush.msk.msrb.mxu1 %vm4645_vm7, %v4062_v3 }
0x15cc   :  { %3474 = vmatpush.msk.msra.mxu3 %vm4668_vm9, %v4062_v3  ;;  %3490 = vmatpush.msk.msra.mxu2 %vm4668_vm9, %v4062_v3 }
0x15cd   :  { %3538 = vmatpush.msk.msrb.mxu1 %vm4668_vm9, %v4062_v3 }
0x15ce   :  { %3539 = vmatpush.msk.msrb.mxu3 %vm4792_vm0, %v4062_v3  ;;  %vm5265_vm0 = vnez %v5262_v63 }
0x15d0   :  { %3540 = vmatpush.msk.msrb.mxu3 %vm4797_vm1, %v4062_v3 }
0x15d2   :  { %3541 = vmatpush.msk.msrb.mxu3 %vm4806_vm2, %v4062_v3 }
0x15d4   :  { %3542 = vmatpush.msk.msrb.mxu3 %vm4821_vm10, %v4062_v3 }
0x15d6   :  { %3543 = vmatpush.msk.msrb.mxu3 %vm4836_vm3, %v4062_v3 }
0x15d8   :  { %3544 = vmatpush.msk.msrb.mxu3 %vm4850_vm13, %v4062_v3 }
0x15da   :  { %3545 = vmatpush.msk.msrb.mxu3 %vm4864_vm11, %v4062_v3  ;;  %vm5266_vm11 = vcmask 523264  }
0x15dc   :  { %3546 = vmatpush.msk.msrb.mxu3 %vm5265_vm0, %v4062_v3 }
0x15de   :  { %3547 = vmatpush.msk.msrb.mxu3 %vm4571_vm14, %v4062_v3 }
0x15e0   :  { %3548 = vmatpush.msk.msrb.mxu3 %vm4576_vm15, %v4062_v3 }
0x15e2   :  { %3549 = vmatpush.msk.msrb.mxu3 %vm4609_vm4, %v4062_v3 }
0x15e4   :  { %3550 = vmatpush.msk.msrb.mxu3 %vm4622_vm5, %v4062_v3 }
0x15e6   :  { %3551 = vmatpush.msk.msrb.mxu3 %vm4634_vm6, %v4062_v3 }
0x15e8   :  { %3552 = vmatpush.msk.msrb.mxu3 %vm4650_vm8, %v4062_v3 }
0x15ea   :  { %3553 = vmatpush.msk.msrb.mxu3 %vm4645_vm7, %v4062_v3 }
0x15ec   :  { %3554 = vmatpush.msk.msrb.mxu3 %vm4668_vm9, %v4062_v3 }
0x162e   :  { %v1684_v47 = vpop.f32.mrf.mxu3 }
0x162f   :  { %v1685_v19 = vadd.f32 %v1684_v47, %v1659_v10  ;;  %v3750_v47 = vld [vmem:[%s5219_s10 + $0x38] sm:$0xff] }
0x1636   :  { %v1686_v60 = vpop.f32.mrf.mxu3 }
0x1637   :  { %v1687_v17 = vadd.f32 %v1686_v60, %v1659_v10 }
0x1639   :  { %v1974_v13 = vpack.c.bf16 %v1687_v17, %v1685_v19  ;;  %v2077_v19 = vperm.slane %v5040_v37, 1 }
0x163e   :  { %v1900_v4 = vpop.f32.mrf.mxu3 }
0x163f   :  { %v1901_v8 = vadd.f32 %v1900_v4, %v1863_v7 }
0x1641   :  { %3439 = vmatmul.msk.f32.vlgmr.msra.gmra.mxu0 %vm5263_vm12, %v1901_v8  ;;  %vm5264_vm12 = vcmask 261120  }
0x1642   :  { %2151 = vmatpush.bf16.msra.mxu0 %v3752_v59 }
0x1646   :  { %v1902_v21 = vpop.f32.mrf.mxu3  ;;  %2152 = vmatpush.bf16.msra.mxu0 %v3751_v40 }
0x1649   :  { %3458 = vmatmul.msk.bf16.vlgmr.msrb.gmra.mxu0 %vm5264_vm12, %v1974_v13 }
0x164a   :  { %2153 = vmatpush.bf16.msra.mxu0 %v3750_v47 }
0x164e   :  { %2154 = vmatpush.bf16.msra.mxu0 %v3749_v48 }
0x1652   :  { %2155 = vmatpush.bf16.msra.mxu0 %v3748_v28 }
0x1656   :  { %2156 = vmatpush.bf16.msra.mxu0 %v3747_v51 }
0x165a   :  { %2157 = vmatpush.bf16.msra.mxu0 %v3746_v45 }
0x165e   :  { %2158 = vmatpush.bf16.msra.mxu0 %v3745_v49 }
0x16be   :  { %v1924_v14 = vpop.f32.mrf.mxu0 }
0x16bf   :  { %v1927_v62 = vsub.f32 %v1901_v8, %v1924_v14 }
0x16c1   :  { %v1928_v38 = vmul.f32 %v1927_v62, %v1927_v62 }
0x16c3   :  { %3448 = vmatmul.msk.f32.vlgmr.msra.gmra.mxu1 %vm5266_vm11, %v1928_v38  ;;  %vm5267_vm11 = vcmask 261120  }
0x16c6   :  { %v2000_v42 = vpop.f32.mrf.mxu0 }
0x16c7   :  { %v2001_v24 = vadd.f32 %v2000_v42, %v1975_v32 }
0x16c9   :  { %2021 = vmatmul.f32.vlgmr.msra.gmra.mxu3 %v2001_v24 }
0x16ce   :  { %v2002_v31 = vpop.f32.mrf.mxu0 }
0x16cf   :  { %v2003_v26 = vadd.f32 %v2002_v31, %v1975_v32 }
0x16d1   :  { %2024 = vmatmul.f32.gmra.mxu3 %v2003_v26 }
0x1740   :  { %v1949_v46 = vpop.f32.mrf.mxu1 }
0x1741   :  { %v1950_v3 = vadd.f32 1e-05, %v1949_v46 }
0x1743   :  { %3935 = vrsqrt.f32 %v1950_v3  ;;  %vm1958_vm15 = vweird.f32 %v1950_v3 }
0x1749   :  { %v3936_v15 = vpop.eup %3935 }
0x174a   :  { %v1953_v27 = vmul.f32 %v3936_v15, %v1950_v3  ;;  %vm1959_vm14 = vweird.f32 %v3936_v15 }
0x174b   :  { %vm1960_vm4 = vmor %vm1958_vm15, %vm1959_vm14 }
0x174c   :  { %v1954_v16 = vmul.f32 %v3936_v15, %v1953_v27  ;;  %v2022_v9 = vpop.f32.mrf.mxu3  ;;  %v3449_v27 = vld [vmem:[%s5220_s11 + $0x4] sm:$0x7]  ;;  %vm5268_vm14 = vmmov %vm5267_vm11  ;;  %s4063_s11 = smov 32  }
0x174d   :  { %v2028_v22 = vsub.f32 %v2001_v24, %v2022_v9  ;;  %vm5269_vm15 = vmmov %vm5267_vm11 }
0x174e   :  { %v1955_v1 = vmul.f32 0.5, %v1954_v16  ;;  %v2102_v16 = vperm.slane %v3449_v27, 0 }
0x174f   :  { %v2030_v30 = vmul.f32 %v2028_v22, %v2028_v22 }
0x1750   :  { %v1956_v11 = vsub.f32 1.5, %v1955_v1 }
0x1751   :  { %2048 = vmatmul.f32.vlgmr.msra.gmra.mxu2 %v2030_v30 }
0x1752   :  { %v1957_v44 = vmul.f32 %v3936_v15, %v1956_v11 }
0x1754   :  { %v1961_v39 = vsel %vm1960_vm4, %v3936_v15, %v1957_v44  ;;  %v2025_v18 = vpop.f32.mrf.mxu3  ;;  %vm5270_vm4 = vmmov %vm5267_vm11 }
0x1755   :  { %v2029_v20 = vsub.f32 %v2003_v26, %v2025_v18  ;;  %v1962_v34 = vmul.f32 %v1961_v39, %v1927_v62  ;;  %v2080_v62 = vperm.slane %v5040_v37, 2 }
0x1757   :  { %v2031_v12 = vmul.f32 %v2029_v20, %v2029_v20  ;;  %v1964_v25 = vmul.f32 %v1963_v33, %v1962_v34 }
0x1759   :  { %2051 = vmatmul.f32.gmra.mxu2 %v2031_v12  ;;  %v1966_v35 = vadd.f32 %v1965_v23, %v1964_v25 }
0x175b   :  { %v5046_v41 = vpack.c.bf16 %v1966_v35, %v1966_v35 }
0x175d   :  { %2324 = vrot.lane.b32.xlu1 %v5046_v41, %s4049_s28 }
0x17d4   :  { %v2049_v6 = vpop.f32.mrf.mxu2 }
0x17d5   :  { %v2050_v0 = vadd.f32 1e-05, %v2049_v6 }
0x17d7   :  { %3937 = vrsqrt.f32 %v2050_v0  ;;  %vm2061_vm6 = vweird.f32 %v2050_v0 }
0x17dc   :  { %v2052_v57 = vpop.f32.mrf.mxu2 }
0x17dd   :  { %v3938_v56 = vpop.eup %3937  ;;  %v2053_v58 = vadd.f32 1e-05, %v2052_v57  ;;  %v2237_v57 = vperm.slane %v3449_v27, 1 }
0x17de   :  { %v2056_v60 = vmul.f32 %v3938_v56, %v2050_v0  ;;  %vm2062_vm5 = vweird.f32 %v3938_v56 }
0x17df   :  { %3939 = vrsqrt.f32 %v2053_v58  ;;  %vm2063_vm7 = vmor %vm2061_vm6, %vm2062_vm5  ;;  %vm2071_vm9 = vweird.f32 %v2053_v58  ;;  %vm2244_vm5 = vcmp.eq.s32.totalorder %v4459_v43, 0  ;;  %vm2243_vm6 = vcmp.eq.s32.totalorder %v4457_v52, %v4459_v43 }
0x17e0   :  { %v2057_v61 = vmul.f32 %v3938_v56, %v2056_v60 }
0x17e2   :  { %v2058_v5 = vmul.f32 0.5, %v2057_v61  ;;  %v2240_v61 = vperm.slane %v3449_v27, 2 }
0x17e4   :  { %v2059_v63 = vsub.f32 1.5, %v2058_v5 }
0x17e5   :  { %v3940_v7 = vpop.eup %3939 }
0x17e6   :  { %v2060_v2 = vmul.f32 %v3938_v56, %v2059_v63  ;;  %v2066_v4 = vmul.f32 %v3940_v7, %v2053_v58  ;;  %vm2072_vm8 = vweird.f32 %v3940_v7 }
0x17e7   :  { %vm2073_vm1 = vmor %vm2071_vm9, %vm2072_vm8  ;;  %vm2271_vm9 = vcmask 123904  }
0x17e8   :  { %v2064_v8 = vsel %vm2063_vm7, %v3938_v56, %v2060_v2  ;;  %v2067_v10 = vmul.f32 %v3940_v7, %v2066_v4 }
0x17e9   :  { %v2075_v21 = vmul.f32 %v2064_v8, %v2028_v22 }
0x17ea   :  { %v2068_v17 = vmul.f32 0.5, %v2067_v10 }
0x17eb   :  { %v2078_v38 = vmul.f32 %v2077_v19, %v2075_v21 }
0x17ec   :  { %v2069_v13 = vsub.f32 1.5, %v2068_v17  ;;  %v2325_v17 = vpop.permute.xlu1 %2324 }
0x17ed   :  { %v2081_v31 = vadd.f32 %v2080_v62, %v2078_v38  ;;  %v2245_v38 = vsel %vm2244_vm5, %v1032_v53, %v1033_v54  ;;  %vm5273_vm5 = vmmov %vm5270_vm4 }
0x17ee   :  { %v2070_v14 = vmul.f32 %v3940_v7, %v2069_v13  ;;  %vm2246_vm7 = vcmp.lt.s32.totalorder %v1026_v55, %v2245_v38 }
0x17ef   :  { %v2083_v46 = vmax.f32 %v2081_v31, 0.0  ;;  %vm2247_vm8 = vmand %vm2243_vm6, %vm2246_vm7 }
0x17f0   :  { %v2074_v32 = vsel %vm2073_vm1, %v3940_v7, %v2070_v14  ;;  %vm5274_vm6 = vmmov %vm5270_vm4 }
0x17f1   :  { %v2076_v42 = vmul.f32 %v2074_v32, %v2029_v20  ;;  %vm5275_vm7 = vmmov %vm5270_vm4 }
0x17f3   :  { %v2079_v24 = vmul.f32 %v2077_v19, %v2076_v42 }
0x17f5   :  { %v2082_v26 = vadd.f32 %v2080_v62, %v2079_v24 }
0x17f7   :  { %v2084_v3 = vmax.f32 %v2082_v26, 0.0 }
0x17f9   :  { %v2101_v15 = vpack.c.bf16 %v2084_v3, %v2083_v46 }
0x17fb   :  { %2159 = vmatmul.bf16.vlgmr.msra.gmra.mxu0 %v2101_v15 }
0x1878   :  { %v2160_v9 = vpop.f32.mrf.mxu0 }
0x1879   :  { %v2161_v22 = vadd.f32 %v2160_v9, %v2102_v16 }
0x187b   :  { %2181 = vmatmul.f32.vlgmr.msrb.gmra.mxu1 %v2161_v22 }
0x1880   :  { %v2162_v37 = vpop.f32.mrf.mxu0 }
0x1881   :  { %v2163_v1 = vadd.f32 %v2162_v37, %v2102_v16  ;;  %v3754_v37 = vld [vmem:[#allocation6 + $0x98] sm:$0xff] }
0x1883   :  { %2184 = vmatmul.f32.gmra.mxu1 %v2163_v1 }
0x18f8   :  { %v2182_v30 = vpop.f32.mrf.mxu1 }
0x18f9   :  { %v2188_v11 = vsub.f32 %v2161_v22, %v2182_v30  ;;  %v3756_v22 = vld [vmem:[#allocation6 + $0xa8] sm:$0xff] }
0x18fb   :  { %v2190_v44 = vmul.f32 %v2188_v11, %v2188_v11 }
0x18fd   :  { %2208 = vmatmul.f32.vlgmr.msrb.gmra.mxu3 %v2190_v44 }
0x1900   :  { %v2185_v33 = vpop.f32.mrf.mxu1 }
0x1901   :  { %v2189_v39 = vsub.f32 %v2163_v1, %v2185_v33 }
0x1903   :  { %v2191_v18 = vmul.f32 %v2189_v39, %v2189_v39 }
0x1905   :  { %2211 = vmatmul.f32.gmra.mxu3 %v2191_v18 }
0x1980   :  { %v2209_v20 = vpop.f32.mrf.mxu3 }
0x1981   :  { %v2210_v34 = vadd.f32 1e-05, %v2209_v20 }
0x1983   :  { %3941 = vrsqrt.f32 %v2210_v34  ;;  %vm2221_vm10 = vweird.f32 %v2210_v34 }
0x1988   :  { %v2212_v23 = vpop.f32.mrf.mxu3 }
0x1989   :  { %v3942_v12 = vpop.eup %3941  ;;  %v2213_v25 = vadd.f32 1e-05, %v2212_v23 }
0x198a   :  { %v2216_v35 = vmul.f32 %v3942_v12, %v2210_v34  ;;  %vm2222_vm2 = vweird.f32 %v3942_v12 }
0x198b   :  { %3943 = vrsqrt.f32 %v2213_v25  ;;  %vm2223_vm3 = vmor %vm2221_vm10, %vm2222_vm2  ;;  %vm2231_vm12 = vweird.f32 %v2213_v25 }
0x198c   :  { %v2217_v59 = vmul.f32 %v3942_v12, %v2216_v35 }
0x198e   :  { %v2218_v40 = vmul.f32 0.5, %v2217_v59 }
0x1990   :  { %v2219_v47 = vsub.f32 1.5, %v2218_v40 }
0x1991   :  { %v3944_v48 = vpop.eup %3943 }
0x1992   :  { %v2220_v28 = vmul.f32 %v3942_v12, %v2219_v47  ;;  %v2226_v51 = vmul.f32 %v3944_v48, %v2213_v25  ;;  %vm2232_vm13 = vweird.f32 %v3944_v48 }
0x1993   :  { %vm2233_vm0 = vmor %vm2231_vm12, %vm2232_vm13 }
0x1994   :  { %v2227_v45 = vmul.f32 %v3944_v48, %v2226_v51  ;;  %v2224_v6 = vsel %vm2223_vm3, %v3942_v12, %v2220_v28 }
0x1995   :  { %v2235_v56 = vmul.f32 %v2224_v6, %v2188_v11 }
0x1996   :  { %v2228_v49 = vmul.f32 0.5, %v2227_v45 }
0x1997   :  { %v2238_v5 = vmul.f32 %v2237_v57, %v2235_v56 }
0x1998   :  { %v2229_v0 = vsub.f32 1.5, %v2228_v49 }
0x1999   :  { %v2241_v2 = vadd.f32 %v2240_v61, %v2238_v5  ;;  %v3753_v5 = vld [vmem:[#allocation6 + $0x90] sm:$0xff] }
0x199a   :  { %v2230_v58 = vmul.f32 %v3944_v48, %v2229_v0 }
0x199c   :  { %v2234_v60 = vsel %vm2233_vm0, %v3944_v48, %v2230_v58  ;;  %vm5271_vm0 = vcmask 130048  }
0x199d   :  { %v2236_v63 = vmul.f32 %v2234_v60, %v2189_v39 }
0x199f   :  { %v2239_v7 = vmul.f32 %v2237_v57, %v2236_v63 }
0x19a1   :  { %v2242_v4 = vadd.f32 %v2240_v61, %v2239_v7  ;;  %v3755_v61 = vld [vmem:[#allocation6 + $0xa0] sm:$0xff] }
0x19a3   :  { %v2249_v8 = vpack.c.bf16 %v2242_v4, %v2241_v2 }
0x19a5   :  { %2298 = vrot.lane.b32.xlu1 %v2249_v8, %s4045_s30  ;;  %2326 = vrot.lane.b32.xlu0 %v2249_v8, %s4049_s28  ;;  %v2254_v10 = vsel %vm5267_vm11, %v2249_v8, 0 }
0x19a6   :  { %2263 = vmatpush.bf16.xpose.msrb.mxu2 %v2254_v10 }
0x19ad   :  { %3555 = vmatmul.msk.bf16.vlgmr.msrb.gmra.mxu2 %vm5268_vm14, %v5046_v41 }
0x1a17   :  { %v2299_v19 = vpop.permute.xlu1 %2298  ;;  %v2327_v21 = vpop.permute.xlu0 %2326 }
0x1a18   :  { %v2332_v13 = vsel %vm5269_vm15, %v2327_v21, 0  ;;  %2311 = vmatpush.bf16.msrb.mxu0 %v2299_v19  ;;  %vm5272_vm15 = vmmov %vm5271_vm0  ;;  %v3757_v19 = vld [vmem:[#allocation6 + $0xb0] sm:$0xff] }
0x1a19   :  { %2341 = vmatpush.bf16.xpose.msra.mxu1 %v2332_v13  ;;  %v3832_v13 = vld [vmem:[%s5214_s5 + $0x24] ss:$0 sm:$0xff] }
0x1a1c   :  { %2420 = vmatpush.bf16.msra.mxu0 %v3756_v22 }
0x1a20   :  { %3557 = vmatmul.msk.bf16.vlgmr.msra.gmra.mxu1 %vm5270_vm4, %v2325_v17  ;;  %2421 = vmatpush.bf16.msra.mxu0 %v3755_v61  ;;  %v3758_v17 = vld [vmem:[#allocation6 + $0xb8] sm:$0xff] }
0x1a21   :  { %2448 = vmatpush.bf16.msrb.mxu1 %v3754_v37  ;;  %2489 = vmatpush.bf16.msra.mxu3 %v3758_v17 }
0x1a25   :  { %2449 = vmatpush.bf16.msrb.mxu1 %v3753_v5  ;;  %2490 = vmatpush.bf16.msra.mxu3 %v3757_v19  ;;  %v3764_v19 = vld [vmem:[#allocation6 + $0xe8] sm:$0xff] }
0x1a29   :  { %2655 = vmatpush.bf16.msra.mxu1 %v3764_v19 }
0x1a30   :  { %v2265_v14 = vpop.f32.mrf.mxu2 }
0x1a31   :  { %v2269_v31 = vmul.f32 0.17677669, %v2265_v14 }
0x1a33   :  { %v2270_v46 = vsel %vm2247_vm8, %v2269_v31, -1e+09  ;;  %v3759_v31 = vld [vmem:[#allocation6 + $0xc0] sm:$0xff] }
0x1a34   :  { %v2272_v3 = vsel %vm2271_vm9, %v2270_v46, -inf }
0x1a38   :  { %v2267_v62 = vpop.f32.mrf.mxu2 }
0x1a9d   :  { %v2343_v41 = vpop.f32.mrf.mxu1 }
0x1a9e   :  { %v2347_v32 = vmul.f32 0.17677669, %v2343_v41 }
0x1aa0   :  { %v2348_v42 = vsel %vm2247_vm8, %v2347_v32, -1e+09  ;;  %vm5276_vm8 = vcmask 254976  }
0x1aa1   :  { %v2349_v24 = vsel %vm2271_vm9, %v2348_v42, -inf }
0x1aa2   :  { %2350 = vmax.xlane.f32.xlu2 %v2349_v24  ;;  %v3760_v24 = vld [vmem:[#allocation6 + $0xc8] sm:$0xff] }
0x1aa5   :  { %v2345_v26 = vpop.f32.mrf.mxu1 }
0x1aa6   :  { %v3578_v26 = vld [vmem:[%s5214_s5 + $0x2c] sm:$0x7] }
0x1aaa   :  { %2273 = vmax.xlane.f32.xlu2 %v2272_v3 }
0x1b15   :  { %v2351_v53 = vpop.xlane.xlu2 %2350 }
0x1b16   :  { %v2352_v54 = vsub.f32 %v2348_v42, %v2351_v53 }
0x1b18   :  { %v2353_v52 = vmul.f32 1.442695, %v2352_v54 }
0x1b1a   :  { %3945 = vpow2.f32 %v2353_v52 }
0x1b1d   :  { %v2274_v50 = vpop.xlane.xlu2 %2273 }
0x1b1e   :  { %v2275_v43 = vsub.f32 %v2270_v46, %v2274_v50  ;;  %v2467_v46 = vperm.slane %v3578_v26, 0 }
0x1b20   :  { %v3946_v55 = vpop.eup %3945  ;;  %v2276_v15 = vmul.f32 1.442695, %v2275_v43  ;;  %v3588_v43 = vld [vmem:[%s5214_s5 + $0x30] sm:$0x7] }
0x1b21   :  { %v2355_v27 = vsel %vm2271_vm9, %v3946_v55, 0.0 }
0x1b22   :  { %3947 = vpow2.f32 %v2276_v15  ;;  %2356 = vadd.xlane.f32.xlu0 %v2355_v27 }
0x1b28   :  { %v3948_v16 = vpop.eup %3947 }
0x1b29   :  { %v2278_v9 = vsel %vm2271_vm9, %v3948_v16, 0.0  ;;  %vm5277_vm9 = vmmov %vm5276_vm8 }
0x1b2a   :  { %2279 = vadd.xlane.f32.xlu2 %v2278_v9 }
0x1b42   :  { %2374 = vrot.lane.b32.xlu2 %v2249_v8, %s4063_s11 }
0x1b95   :  { %v2357_v1 = vpop.xlane.xlu0 %2356 }
0x1b96   :  { %3949 = vrcp.f32 %v2357_v1  ;;  %v2369_v39 = vand.u32 2147483648, %v2357_v1  ;;  %v2367_v20 = vand.u32 2147483647, %v2357_v1  ;;  %vm2363_vm2 = vweird.f32 %v2357_v1 }
0x1b98   :  { %v2370_v12 = vor.u32 1.1754944e-38, %v2369_v39  ;;  %vm2368_vm3 = vcmp.eq.f32.partialorder %v2367_v20, 8.507059e+37  ;;  %v3770_v20 = vld [vmem:[#allocation6 + $0x118] sm:$0xff] }
0x1b9c   :  { %v3950_v30 = vpop.eup %3949 }
0x1b9d   :  { %v2359_v11 = vmul.f32 %v3950_v30, %v2357_v1  ;;  %v2280_v44 = vpop.xlane.xlu2 %2279  ;;  %vm2364_vm1 = vweird.f32 %v3950_v30 }
0x1b9e   :  { %3951 = vrcp.f32 %v2280_v44  ;;  %vm2365_vm10 = vmor %vm2363_vm2, %vm2364_vm1  ;;  %v2292_v28 = vand.u32 2147483648, %v2280_v44  ;;  %v2290_v45 = vand.u32 2147483647, %v2280_v44  ;;  %vm2286_vm12 = vweird.f32 %v2280_v44 }
0x1b9f   :  { %v2360_v33 = vsub.f32 1.0, %v2359_v11 }
0x1ba0   :  { %v2293_v0 = vor.u32 1.1754944e-38, %v2292_v28  ;;  %vm2291_vm14 = vcmp.eq.f32.partialorder %v2290_v45, 8.507059e+37 }
0x1ba1   :  { %v2361_v18 = vmul.f32 %v3950_v30, %v2360_v33  ;;  %v3761_v33 = vld [vmem:[#allocation6 + $0xd0] sm:$0xff] }
0x1ba3   :  { %v2362_v34 = vadd.f32 %v3950_v30, %v2361_v18 }
0x1ba4   :  { %v3952_v23 = vpop.eup %3951 }
0x1ba5   :  { %v2366_v25 = vsel %vm2365_vm10, %v3950_v30, %v2362_v34  ;;  %v2282_v35 = vmul.f32 %v3952_v23, %v2280_v44  ;;  %v2375_v59 = vpop.permute.xlu2 %2374  ;;  %vm2287_vm13 = vweird.f32 %v3952_v23  ;;  %v3762_v44 = vld [vmem:[#allocation6 + $0xd8] sm:$0xff] }
0x1ba6   :  { %v2371_v40 = vsel %vm2368_vm3, %v2370_v12, %v2366_v25  ;;  %2387 = vmatpush.bf16.msra.mxu2 %v2375_v59  ;;  %vm2288_vm11 = vmor %vm2286_vm12, %vm2287_vm13 }
0x1ba7   :  { %v2372_v47 = vmul.f32 %v3946_v55, %v2371_v40  ;;  %v2283_v48 = vsub.f32 1.0, %v2282_v35  ;;  %v2505_v55 = vperm.slane %v3588_v43, 0  ;;  %vm5278_vm3 = vmmov %vm5270_vm4 }
0x1ba8   :  { %vm5279_vm13 = vmmov %vm5278_vm3 }
0x1ba9   :  { %v2284_v51 = vmul.f32 %v3952_v23, %v2283_v48  ;;  %v2373_v6 = vpack.c.bf16 %v2372_v47, %v2372_v47  ;;  %v2556_v48 = vperm.slane %v3588_v43, 1  ;;  %vm5280_vm12 = vmmov %vm5276_vm8 }
0x1baa   :  { %2527 = vmatpush.bf16.msrb.mxu2 %v3760_v24 }
0x1bab   :  { %v2285_v49 = vadd.f32 %v3952_v23, %v2284_v51  ;;  %3558 = vmatmul.msk.bf16.vlgmr.msra.gmra.mxu2 %vm5271_vm0, %v2373_v6  ;;  %v2558_v51 = vperm.slane %v3588_v43, 2  ;;  %vm5281_vm0 = vmmov %vm5276_vm8 }
0x1bad   :  { %v2289_v57 = vsel %vm2288_vm11, %v3952_v23, %v2285_v49  ;;  %v3769_v23 = vld [vmem:[#allocation6 + $0x110] sm:$0xff] }
0x1bae   :  { %v2294_v56 = vsel %vm2291_vm14, %v2293_v0, %v2289_v57  ;;  %2528 = vmatpush.bf16.msrb.mxu2 %v3759_v31 }
0x1baf   :  { %v2295_v58 = vmul.f32 %v3948_v16, %v2294_v56  ;;  %v3598_v56 = vld [vmem:[%s5214_s5 + $0x34] sm:$0x7] }
0x1bb0   :  { %v2620_v26 = vperm.slane %v3598_v56, 1 }
0x1bb1   :  { %v2296_v60 = vpack.c.bf16 %v2295_v58, %v2295_v58  ;;  %v2569_v58 = vperm.slane %v3598_v56, 0 }
0x1bb3   :  { %3556 = vmatmul.msk.bf16.vlgmr.msrb.gmra.mxu0 %vm5272_vm15, %v2296_v60 }
0x1bb4   :  { %2591 = vmatpush.bf16.msrb.mxu0 %v3762_v44 }
0x1bb8   :  { %2592 = vmatpush.bf16.msrb.mxu0 %v3761_v33 }
0x1c2e   :  { %v2389_v63 = vpop.f32.mrf.mxu2 }
0x1c2f   :  { %v2398_v7 = vpack.c.bf16 %v2389_v63, %v2389_v63 }
0x1c30   :  { %v2313_v2 = vpop.f32.mrf.mxu0 }
0x1c31   :  { %v2322_v4 = vpack.c.bf16 %v2313_v2, %v2313_v2  ;;  %3567 = vmatmul.msk.bf16.vlgmr.msra.gmra.mxu0 %vm5270_vm4, %v2398_v7  ;;  %vm5282_vm4 = vmmov %vm5278_vm3 }
0x1c32   :  { %2816 = vmatpush.bf16.msra.mxu0 %v3770_v20 }
0x1c33   :  { %3576 = vmatmul.msk.bf16.vlgmr.msrb.gmra.mxu1 %vm5273_vm5, %v2322_v4  ;;  %vm5283_vm5 = vmmov %vm5281_vm0 }
0x1c36   :  { %v2391_v8 = vpop.f32.mrf.mxu2  ;;  %2817 = vmatpush.bf16.msra.mxu0 %v3769_v23  ;;  %v3765_v23 = vld [vmem:[#allocation6 + $0xf0] sm:$0xff] }
0x1c38   :  { %v2315_v10 = vpop.f32.mrf.mxu0 }
0x1cae   :  { %v2423_v21 = vpop.f32.mrf.mxu0 }
0x1cb0   :  { %v2451_v14 = vpop.f32.mrf.mxu1 }
0x1cb1   :  { %v2452_v62 = vadd.f32 %v2451_v14, %v2423_v21  ;;  %v3763_v21 = vld [vmem:[#allocation6 + $0xe0] sm:$0xff] }
0x1cb2   :  { %2656 = vmatpush.bf16.msra.mxu1 %v3763_v21 }
0x1cb3   :  { %v2458_v38 = vadd.f32 %v3832_v13, %v2452_v62 }
0x1cb5   :  { %v2466_v41 = vpack.c.bf16 %v2458_v38, %v2458_v38 }
0x1cb6   :  { %v2425_v32 = vpop.f32.mrf.mxu0 }
0x1cb7   :  { %3587 = vmatmul.msk.bf16.vlgmr.msra.gmra.mxu3 %vm5274_vm6, %v2466_v41  ;;  %vm5284_vm6 = vmmov %vm5281_vm0 }
0x1cb8   :  { %v2453_v42 = vpop.f32.mrf.mxu1 }
0x1d3a   :  { %v2492_v3 = vpop.f32.mrf.mxu3 }
0x1d3b   :  { %v2493_v53 = vadd.f32 %v2492_v3, %v2467_v46  ;;  %v2622_v3 = vperm.slane %v3598_v56, 2 }
0x1d3d   :  { %v2496_v54 = vmax.f32 %v2493_v53, 0.0 }
0x1d3f   :  { %v2504_v52 = vpack.c.bf16 %v2496_v54, %v2496_v54 }
0x1d41   :  { %3597 = vmatmul.msk.bf16.vlgmr.msrb.gmra.mxu2 %vm5275_vm7, %v2504_v52  ;;  %vm5285_vm7 = vmmov %vm5281_vm0 }
0x1d42   :  { %v2494_v50 = vpop.f32.mrf.mxu3 }
0x1dc4   :  { %v2530_v15 = vpop.f32.mrf.mxu2 }
0x1dc5   :  { %v2531_v27 = vadd.f32 %v2530_v15, %v2505_v55  ;;  %v3608_v55 = vld [vmem:[%s5214_s5 + $0x38] sm:$0x7] }
0x1dc6   :  { %v2633_v15 = vperm.slane %v3608_v55, 0  ;;  %v2684_v56 = vperm.slane %v3608_v55, 1 }
0x1dc7   :  { %v2534_v16 = vsel %vm5276_vm8, %v2531_v27, 0.0  ;;  %vm5286_vm8 = vmmov %vm5281_vm0 }
0x1dc8   :  { %2535 = vadd.xlane.f32.xlu1 %v2534_v16 }
0x1dcc   :  { %v2532_v9 = vpop.f32.mrf.mxu2 }
0x1e3b   :  { %v2536_v22 = vpop.xlane.xlu1 %2535 }
0x1e3c   :  { %v2537_v37 = vmul.f32 %v2536_v22, %v4247_v36 }
0x1e3e   :  { %v2538_v1 = vsub.f32 %v2531_v27, %v2537_v37 }
0x1e40   :  { %v2539_v30 = vmul.f32 %v2538_v1, %v2538_v1 }
0x1e42   :  { %v2540_v11 = vsel %vm5277_vm9, %v2539_v30, 0.0 }
0x1e43   :  { %2541 = vadd.xlane.f32.xlu2 %v2540_v11  ;;  %v5137_v11 = vld [vmem:[%s5214_s5 + $0x44] sm:$0x7] }
0x1e44   :  { %v2797_v33 = vperm.slane %v5137_v11, 0 }
0x1eb6   :  { %v2542_v39 = vpop.xlane.xlu2 %2541 }
0x1eb7   :  { %v2543_v18 = vmul.f32 %v2542_v39, %v4247_v36 }
0x1eb9   :  { %v2544_v34 = vadd.f32 1e-05, %v2543_v18 }
0x1ebb   :  { %3953 = vrsqrt.f32 %v2544_v34  ;;  %vm2551_vm2 = vweird.f32 %v2544_v34 }
0x1ec1   :  { %v3954_v12 = vpop.eup %3953 }
0x1ec2   :  { %v2546_v25 = vmul.f32 %v3954_v12, %v2544_v34  ;;  %vm2552_vm1 = vweird.f32 %v3954_v12  ;;  %v3766_v34 = vld [vmem:[#allocation6 + $0xf8] sm:$0xff] }
0x1ec3   :  { %vm2553_vm10 = vmor %vm2551_vm2, %vm2552_vm1  ;;  %2719 = vmatpush.bf16.msrb.mxu3 %v3766_v34  ;;  %v3768_v34 = vld [vmem:[#allocation6 + $0x108] sm:$0xff] }
0x1ec4   :  { %v2547_v35 = vmul.f32 %v3954_v12, %v2546_v25  ;;  %2783 = vmatpush.bf16.msra.mxu2 %v3768_v34 }
0x1ec6   :  { %v2548_v59 = vmul.f32 0.5, %v2547_v35 }
0x1ec7   :  { %2720 = vmatpush.bf16.msrb.mxu3 %v3765_v23  ;;  %v3767_v23 = vld [vmem:[#allocation6 + $0x100] sm:$0xff] }
0x1ec8   :  { %v2549_v40 = vsub.f32 1.5, %v2548_v59  ;;  %2784 = vmatpush.bf16.msra.mxu2 %v3767_v23 }
0x1eca   :  { %v2550_v47 = vmul.f32 %v3954_v12, %v2549_v40 }
0x1ecc   :  { %v2554_v28 = vsel %vm2553_vm10, %v3954_v12, %v2550_v47  ;;  %vm5287_vm10 = vmmov %vm5278_vm3 }
0x1ecd   :  { %v2555_v45 = vmul.f32 %v2554_v28, %v2538_v1 }
0x1ecf   :  { %v2557_v6 = vmul.f32 %v2556_v48, %v2555_v45 }
0x1ed1   :  { %v2559_v49 = vadd.f32 %v2558_v51, %v2557_v6 }
0x1ed3   :  { %v2560_v0 = vmax.f32 %v2559_v49, 0.0 }
0x1ed5   :  { %v2568_v57 = vpack.c.bf16 %v2560_v0, %v2560_v0 }
0x1ed7   :  { %3607 = vmatmul.msk.bf16.vlgmr.msrb.gmra.mxu0 %vm5278_vm3, %v2568_v57 }
0x1ee7   :  { %3647 = vmatmul.msk.bf16.vlgmr.msra.gmra.mxu0 %vm5279_vm13, %v4600_v29 }
0x1f54   :  { %v2594_v60 = vpop.f32.mrf.mxu0 }
0x1f55   :  { %v2595_v61 = vadd.f32 %v2594_v60, %v2569_v58  ;;  %v2686_v60 = vperm.slane %v3608_v55, 2 }
0x1f57   :  { %v2598_v5 = vsel %vm5280_vm12, %v2595_v61, 0.0 }
0x1f58   :  { %2599 = vadd.xlane.f32.xlu0 %v2598_v5 }
0x1f5c   :  { %v2596_v63 = vpop.f32.mrf.mxu0 }
0x1f64   :  { %v2819_v7 = vpop.f32.mrf.mxu0 }
0x1f65   :  { %v2820_v18 = vadd.f32 %v2819_v7, %v2797_v33 }
0x1f67   :  { %v2823_v20 = vsel %vm5285_vm7, %v2820_v18, 0.0 }
0x1f6c   :  { %v2821_v2 = vpop.f32.mrf.mxu0 }
0x1fcb   :  { %v2600_v4 = vpop.xlane.xlu0 %2599 }
0x1fcc   :  { %v2601_v8 = vmul.f32 %v2600_v4, %v4247_v36  ;;  %v3772_v4 = vld [vmem:[#allocation6 + $0x128] sm:$0xff] }
0x1fcd   :  { %2880 = vmatpush.bf16.msrb.mxu1 %v3772_v4 }
0x1fce   :  { %v2602_v10 = vsub.f32 %v2595_v61, %v2601_v8  ;;  %v3771_v8 = vld [vmem:[#allocation6 + $0x120] sm:$0xff] }
0x1fd0   :  { %v2603_v17 = vmul.f32 %v2602_v10, %v2602_v10 }
0x1fd1   :  { %2881 = vmatpush.bf16.msrb.mxu1 %v3771_v8 }
0x1fd2   :  { %v2604_v29 = vsel %vm5281_vm0, %v2603_v17, 0.0  ;;  %vm5288_vm0 = vmmov %vm5282_vm4 }
0x1fd3   :  { %2605 = vadd.xlane.f32.xlu0 %v2604_v29  ;;  %vm5292_vm7 = vmmov %vm5288_vm0 }
0x2046   :  { %v2606_v13 = vpop.xlane.xlu0 %2605 }
0x2047   :  { %v2607_v14 = vmul.f32 %v2606_v13, %v4247_v36 }
0x2049   :  { %v2608_v62 = vadd.f32 1e-05, %v2607_v14 }
0x204b   :  { %3955 = vrsqrt.f32 %v2608_v62  ;;  %vm2615_vm14 = vweird.f32 %v2608_v62 }
0x2051   :  { %v3956_v38 = vpop.eup %3955 }
0x2052   :  { %v2610_v41 = vmul.f32 %v3956_v38, %v2608_v62  ;;  %vm2616_vm11 = vweird.f32 %v3956_v38 }
0x2053   :  { %vm2617_vm15 = vmor %vm2615_vm14, %vm2616_vm11 }
0x2054   :  { %v2611_v32 = vmul.f32 %v3956_v38, %v2610_v41  ;;  %v2845_v41 = vperm.slane %v5137_v11, 1  ;;  %vm5289_vm11 = vmmov %vm5283_vm5 }
0x2055   :  { %vm5290_vm14 = vmmov %vm5283_vm5 }
0x2056   :  { %v2612_v42 = vmul.f32 0.5, %v2611_v32 }
0x2058   :  { %v2613_v24 = vsub.f32 1.5, %v2612_v42  ;;  %v2847_v42 = vperm.slane %v5137_v11, 2 }
0x205a   :  { %v2614_v31 = vmul.f32 %v3956_v38, %v2613_v24 }
0x205c   :  { %v2618_v46 = vsel %vm2617_vm15, %v3956_v38, %v2614_v31  ;;  %vm5291_vm15 = vmmov %vm5288_vm0 }
0x205d   :  { %v2619_v53 = vmul.f32 %v2618_v46, %v2602_v10 }
0x205f   :  { %v2621_v54 = vmul.f32 %v2620_v26, %v2619_v53  ;;  %v3618_v26 = vld [vmem:[%s5214_s5 + $0x3c] sm:$0x7] }
0x2060   :  { %v2697_v53 = vperm.slane %v3618_v26, 0 }
0x2061   :  { %v2623_v52 = vadd.f32 %v2622_v3, %v2621_v54 }
0x2063   :  { %v2624_v50 = vmax.f32 %v2623_v52, 0.0 }
0x2065   :  { %v2632_v43 = vpack.c.bf16 %v2624_v50, %v2624_v50 }
0x2067   :  { %3617 = vmatmul.msk.bf16.vlgmr.msra.gmra.mxu1 %vm5282_vm4, %v2632_v43 }
0x20e4   :  { %v2658_v27 = vpop.f32.mrf.mxu1 }
0x20e5   :  { %v2659_v16 = vadd.f32 %v2658_v27, %v2633_v15  ;;  %v3776_v15 = vld [vmem:[#allocation6 + $0x148] sm:$0xff]  ;;  %v3775_v27 = vld [vmem:[#allocation6 + $0x140] sm:$0xff] }
0x20e6   :  { %2923 = vmatpush.bf16.msra.mxu3 %v3776_v15 }
0x20e7   :  { %v2662_v9 = vsel %vm5283_vm5, %v2659_v16, 0.0 }
0x20e8   :  { %2663 = vadd.xlane.f32.xlu0 %v2662_v9  ;;  %v3648_v9 = vld [vmem:[%s5214_s5 + $0x48] sm:$0x7] }
0x20ea   :  { %2924 = vmatpush.bf16.msra.mxu3 %v3775_v27 }
0x20ec   :  { %v2660_v22 = vpop.f32.mrf.mxu1 }
0x215b   :  { %v2664_v37 = vpop.xlane.xlu0 %2663 }
0x215c   :  { %v2665_v1 = vmul.f32 %v2664_v37, %v4247_v36 }
0x215e   :  { %v2666_v30 = vsub.f32 %v2659_v16, %v2665_v1  ;;  %v2858_v1 = vperm.slane %v3648_v9, 0 }
0x2160   :  { %v2667_v44 = vmul.f32 %v2666_v30, %v2666_v30 }
0x2162   :  { %v2668_v39 = vsel %vm5284_vm6, %v2667_v44, 0.0 }
0x2163   :  { %2669 = vadd.xlane.f32.xlu1 %v2668_v39 }
0x216b   :  { %2824 = vadd.xlane.f32.xlu1 %v2823_v20 }
0x21d6   :  { %v2670_v12 = vpop.xlane.xlu1 %2669 }
0x21d7   :  { %v2671_v25 = vmul.f32 %v2670_v12, %v4247_v36 }
0x21d9   :  { %v2672_v35 = vadd.f32 1e-05, %v2671_v25 }
0x21db   :  { %3957 = vrsqrt.f32 %v2672_v35  ;;  %vm2679_vm1 = vweird.f32 %v2672_v35 }
0x21de   :  { %v2825_v59 = vpop.xlane.xlu1 %2824 }
0x21df   :  { %v2826_v40 = vmul.f32 %v2825_v59, %v4247_v36 }
0x21e1   :  { %v3958_v47 = vpop.eup %3957  ;;  %v2827_v48 = vsub.f32 %v2820_v18, %v2826_v40 }
0x21e2   :  { %v2674_v28 = vmul.f32 %v3958_v47, %v2672_v35  ;;  %vm2680_vm9 = vweird.f32 %v3958_v47  ;;  %v3774_v35 = vld [vmem:[#allocation6 + $0x138] sm:$0xff] }
0x21e3   :  { %v2828_v51 = vmul.f32 %v2827_v48, %v2827_v48  ;;  %vm2681_vm2 = vmor %vm2679_vm1, %vm2680_vm9  ;;  %2951 = vmatpush.bf16.msrb.mxu2 %v3774_v35 }
0x21e4   :  { %v2675_v45 = vmul.f32 %v3958_v47, %v2674_v28  ;;  %vm5294_vm9 = vmmov %vm5289_vm11 }
0x21e5   :  { %v2829_v6 = vsel %vm5286_vm8, %v2828_v51, 0.0  ;;  %vm5293_vm8 = vmmov %vm5288_vm0 }
0x21e6   :  { %v2676_v49 = vmul.f32 0.5, %v2675_v45  ;;  %2830 = vadd.xlane.f32.xlu2 %v2829_v6  ;;  %v2748_v6 = vperm.slane %v3618_v26, 1  ;;  %vm5295_vm1 = vmmov %vm5294_vm9 }
0x21e8   :  { %v2677_v0 = vsub.f32 1.5, %v2676_v49 }
0x21ea   :  { %v2678_v57 = vmul.f32 %v3958_v47, %v2677_v0 }
0x21ec   :  { %v2682_v58 = vsel %vm2681_vm2, %v3958_v47, %v2678_v57  ;;  %v2750_v57 = vperm.slane %v3618_v26, 2 }
0x21ed   :  { %v2683_v61 = vmul.f32 %v2682_v58, %v2666_v30 }
0x21ef   :  { %v2685_v5 = vmul.f32 %v2684_v56, %v2683_v61 }
0x21f1   :  { %v2687_v63 = vadd.f32 %v2686_v60, %v2685_v5 }
0x21f3   :  { %v2688_v7 = vmax.f32 %v2687_v63, 0.0 }
0x21f5   :  { %v2696_v2 = vpack.c.bf16 %v2688_v7, %v2688_v7  ;;  %v3773_v7 = vld [vmem:[#allocation6 + $0x130] sm:$0xff] }
0x21f6   :  { %2952 = vmatpush.bf16.msrb.mxu2 %v3773_v7 }
0x21f7   :  { %3627 = vmatmul.msk.bf16.vlgmr.msrb.gmra.mxu3 %vm5287_vm10, %v2696_v2  ;;  %v3628_v2 = vld [vmem:[%s5214_s5 + $0x40] sm:$0x7] }
0x21f8   :  { %v2761_v4 = vperm.slane %v3628_v2, 0 }
0x2259   :  { %v2831_v10 = vpop.xlane.xlu2 %2830 }
0x225a   :  { %v2832_v17 = vmul.f32 %v2831_v10, %v4247_v36 }
0x225c   :  { %v2833_v29 = vadd.f32 1e-05, %v2832_v17 }
0x225e   :  { %3959 = vrsqrt.f32 %v2833_v29  ;;  %vm2840_vm13 = vweird.f32 %v2833_v29 }
0x2264   :  { %v3960_v19 = vpop.eup %3959 }
0x2265   :  { %v2835_v21 = vmul.f32 %v3960_v19, %v2833_v29  ;;  %vm2841_vm3 = vweird.f32 %v3960_v19 }
0x2266   :  { %vm2842_vm12 = vmor %vm2840_vm13, %vm2841_vm3 }
0x2267   :  { %v2836_v13 = vmul.f32 %v3960_v19, %v2835_v21  ;;  %vm5296_vm13 = vmmov %vm5288_vm0 }
0x2269   :  { %v2837_v14 = vmul.f32 0.5, %v2836_v13 }
0x226b   :  { %v2838_v62 = vsub.f32 1.5, %v2837_v14 }
0x226d   :  { %v2839_v38 = vmul.f32 %v3960_v19, %v2838_v62 }
0x226f   :  { %v2843_v32 = vsel %vm2842_vm12, %v3960_v19, %v2839_v38  ;;  %v3658_v19 = vld [vmem:[%s5214_s5 + $0x4c] sm:$0x7]  ;;  %vm5297_vm12 = vmmov %vm5295_vm1 }
0x2270   :  { %v2844_v24 = vmul.f32 %v2843_v32, %v2827_v48  ;;  %v2958_v21 = vperm.slane %v3658_v19, 0  ;;  %v2982_v9 = vperm.slane %v3658_v19, 1 }
0x2272   :  { %v2846_v31 = vmul.f32 %v2845_v41, %v2844_v24 }
0x2274   :  { %v2848_v46 = vadd.f32 %v2847_v42, %v2846_v31 }
0x2276   :  { %v2849_v3 = vmax.f32 %v2848_v46, 0.0  ;;  %v3778_v46 = vld [vmem:[#allocation6 + $0x158] sm:$0xff] }
0x2277   :  { %3017 = vmatpush.bf16.msrb.mxu0 %v3778_v46 }
0x2278   :  { %v2857_v54 = vpack.c.bf16 %v2849_v3, %v2849_v3  ;;  %v3777_v3 = vld [vmem:[#allocation6 + $0x150] sm:$0xff] }
0x227a   :  { %v2722_v52 = vpop.f32.mrf.mxu3  ;;  %3657 = vmatmul.msk.bf16.vlgmr.msrb.gmra.mxu1 %vm5288_vm0, %v2857_v54  ;;  %vm5298_vm0 = vmmov %vm5295_vm1 }
0x227b   :  { %v2723_v50 = vadd.f32 %v2722_v52, %v2697_v53  ;;  %3018 = vmatpush.bf16.msrb.mxu0 %v3777_v3 }
0x227d   :  { %v2726_v43 = vsel %vm5289_vm11, %v2723_v50, 0.0 }
0x227e   :  { %2727 = vadd.xlane.f32.xlu0 %v2726_v43 }
0x2282   :  { %v2724_v55 = vpop.f32.mrf.mxu3 }
0x22f1   :  { %v2728_v16 = vpop.xlane.xlu0 %2727 }
0x22f2   :  { %v2729_v22 = vmul.f32 %v2728_v16, %v4247_v36 }
0x22f4   :  { %v2730_v37 = vsub.f32 %v2723_v50, %v2729_v22 }
0x22f6   :  { %v2731_v30 = vmul.f32 %v2730_v37, %v2730_v37 }
0x22f7   :  { %v2883_v11 = vpop.f32.mrf.mxu1 }
0x22f8   :  { %v2884_v44 = vadd.f32 %v2883_v11, %v2858_v1  ;;  %v2732_v33 = vsel %vm5290_vm14, %v2731_v30, 0.0 }
0x22f9   :  { %2733 = vadd.xlane.f32.xlu0 %v2732_v33 }
0x22fa   :  { %v2887_v39 = vmax.f32 %v2884_v44, 0.0 }
0x22fc   :  { %v2901_v18 = vpack.c.bf16 %v2887_v39, %v2887_v39  ;;  %v3677_v39 = vld [vmem:[%s5214_s5 + $0x54] sm:$0x7] }
0x22fe   :  { %3667 = vmatmul.msk.bf16.vlgmr.msra.gmra.mxu3 %vm5291_vm15, %v2901_v18  ;;  %v2995_v18 = vperm.slane %v3677_v39, 0 }
0x22ff   :  { %v2885_v20 = vpop.f32.mrf.mxu1 }
0x236c   :  { %v2734_v12 = vpop.xlane.xlu0 %2733 }
0x236d   :  { %v2735_v25 = vmul.f32 %v2734_v12, %v4247_v36 }
0x236f   :  { %v2736_v59 = vadd.f32 1e-05, %v2735_v25 }
0x2371   :  { %3961 = vrsqrt.f32 %v2736_v59  ;;  %vm2743_vm5 = vweird.f32 %v2736_v59 }
0x2377   :  { %v3962_v40 = vpop.eup %3961 }
0x2378   :  { %v2738_v47 = vmul.f32 %v3962_v40, %v2736_v59  ;;  %vm2744_vm4 = vweird.f32 %v3962_v40 }
0x2379   :  { %vm2745_vm6 = vmor %vm2743_vm5, %vm2744_vm4 }
0x237a   :  { %v2739_v48 = vmul.f32 %v3962_v40, %v2738_v47  ;;  %vm5299_vm4 = vmmov %vm5292_vm7 }
0x237b   :  { %vm5300_vm5 = vmmov %vm5298_vm0 }
0x237c   :  { %v2740_v28 = vmul.f32 0.5, %v2739_v48  ;;  %v3780_v48 = vld [vmem:[#allocation6 + $0x168] sm:$0xff] }
0x237d   :  { %3081 = vmatpush.bf16.msra.mxu1 %v3780_v48 }
0x237e   :  { %v2741_v51 = vsub.f32 1.5, %v2740_v28  ;;  %v3779_v28 = vld [vmem:[#allocation6 + $0x160] sm:$0xff] }
0x2380   :  { %v2742_v45 = vmul.f32 %v3962_v40, %v2741_v51 }
0x2381   :  { %v2926_v49 = vpop.f32.mrf.mxu3  ;;  %3082 = vmatpush.bf16.msra.mxu1 %v3779_v28 }
0x2382   :  { %v2746_v0 = vsel %vm2745_vm6, %v3962_v40, %v2742_v45  ;;  %vm5301_vm6 = vmmov %vm5298_vm0 }
0x2383   :  { %v2747_v56 = vmul.f32 %v2746_v0, %v2730_v37  ;;  %v2984_v37 = vperm.slane %v3658_v19, 2 }
0x2385   :  { %v2749_v58 = vmul.f32 %v2748_v6, %v2747_v56 }
0x2387   :  { %v2751_v60 = vadd.f32 %v2750_v57, %v2749_v58 }
0x2389   :  { %v2928_v61 = vpop.f32.mrf.mxu3  ;;  %v2752_v5 = vmax.f32 %v2751_v60, 0.0 }
0x238a   :  { %v3046_v61 = vperm.slane %v3677_v39, 1 }
0x238b   :  { %v2760_v63 = vpack.c.bf16 %v2752_v5, %v2752_v5 }
0x238d   :  { %3637 = vmatmul.msk.bf16.vlgmr.msra.gmra.mxu2 %vm5292_vm7, %v2760_v63  ;;  %v3048_v63 = vperm.slane %v3677_v39, 2 }
0x2410   :  { %v2786_v8 = vpop.f32.mrf.mxu2 }
0x2411   :  { %v2787_v10 = vadd.f32 %v2786_v8, %v2761_v4 }
0x2413   :  { %v2895_v17 = vpack.c.bf16 %v2787_v10, %v2787_v10 }
0x2415   :  { %3676 = vmatmul.msk.bf16.vlgmr.msrb.gmra.mxu2 %vm5293_vm8, %v2895_v17  ;;  %v3687_v17 = vld [vmem:[%s5214_s5 + $0x58] sm:$0x7] }
0x2418   :  { %v2788_v29 = vpop.f32.mrf.mxu2 }
0x2419   :  { %v3059_v29 = vperm.slane %v3687_v17, 0 }
0x2498   :  { %v2954_v13 = vpop.f32.mrf.mxu2 }
0x2499   :  { %v2955_v14 = vadd.f32 %v2954_v13, %v2926_v49 }
0x249b   :  { %v2959_v62 = vadd.f32 %v2958_v21, %v2955_v14 }
0x249d   :  { %v2960_v38 = vsel %vm5294_vm9, %v2959_v62, 0.0 }
0x249e   :  { %2961 = vadd.xlane.f32.xlu1 %v2960_v38 }
0x24a0   :  { %v2956_v41 = vpop.f32.mrf.mxu2 }
0x2511   :  { %v2962_v32 = vpop.xlane.xlu1 %2961 }
0x2512   :  { %v2963_v42 = vmul.f32 %v2962_v32, %v4247_v36 }
0x2514   :  { %v2964_v24 = vsub.f32 %v2959_v62, %v2963_v42 }
0x2516   :  { %v2965_v31 = vmul.f32 %v2964_v24, %v2964_v24 }
0x2518   :  { %v2966_v26 = vsel %vm5295_vm1, %v2965_v31, 0.0  ;;  %v3781_v31 = vld [vmem:[#allocation6 + $0x170] sm:$0xff]  ;;  %vm5302_vm1 = vmmov %vm5299_vm4 }
0x2519   :  { %2967 = vadd.xlane.f32.xlu0 %v2966_v26 }
0x258c   :  { %v2968_v53 = vpop.xlane.xlu0 %2967 }
0x258d   :  { %v2969_v54 = vmul.f32 %v2968_v53, %v4247_v36 }
0x258f   :  { %v2970_v52 = vadd.f32 1e-05, %v2969_v54 }
0x2591   :  { %3963 = vrsqrt.f32 %v2970_v52  ;;  %vm2977_vm10 = vweird.f32 %v2970_v52 }
0x2597   :  { %v3964_v50 = vpop.eup %3963 }
0x2598   :  { %v2972_v43 = vmul.f32 %v3964_v50, %v2970_v52  ;;  %vm2978_vm2 = vweird.f32 %v3964_v50 }
0x2599   :  { %vm2979_vm3 = vmor %vm2977_vm10, %vm2978_vm2 }
0x259a   :  { %v2973_v55 = vmul.f32 %v3964_v50, %v2972_v43  ;;  %vm5303_vm2 = vmmov %vm5298_vm0 }
0x259b   :  { %vm5304_vm10 = vmmov %vm5298_vm0 }
0x259c   :  { %v2974_v15 = vmul.f32 0.5, %v2973_v55 }
0x259e   :  { %v2975_v27 = vsub.f32 1.5, %v2974_v15  ;;  %v3110_v15 = vperm.slane %v3687_v17, 1 }
0x25a0   :  { %v2976_v16 = vmul.f32 %v3964_v50, %v2975_v27 }
0x25a2   :  { %v2980_v22 = vsel %vm2979_vm3, %v3964_v50, %v2976_v16  ;;  %v3112_v16 = vperm.slane %v3687_v17, 2 }
0x25a3   :  { %v2981_v1 = vmul.f32 %v2980_v22, %v2964_v24  ;;  %v3782_v24 = vld [vmem:[#allocation6 + $0x178] sm:$0xff] }
0x25a4   :  { %3145 = vmatpush.bf16.msrb.mxu3 %v3782_v24 }
0x25a5   :  { %v2983_v30 = vmul.f32 %v2982_v9, %v2981_v1 }
0x25a7   :  { %v2985_v11 = vadd.f32 %v2984_v37, %v2983_v30 }
0x25a8   :  { %3146 = vmatpush.bf16.msrb.mxu3 %v3781_v31 }
0x25a9   :  { %v2986_v44 = vmax.f32 %v2985_v11, 0.0  ;;  %v3697_v11 = vld [vmem:[%s5214_s5 + $0x5c] sm:$0x7] }
0x25ab   :  { %v2994_v33 = vpack.c.bf16 %v2986_v44, %v2986_v44  ;;  %v3123_v44 = vperm.slane %v3697_v11, 0 }
0x25ad   :  { %3686 = vmatmul.msk.bf16.vlgmr.msrb.gmra.mxu0 %vm5296_vm13, %v2994_v33 }
0x262a   :  { %v3020_v20 = vpop.f32.mrf.mxu0 }
0x262b   :  { %v3021_v34 = vadd.f32 %v3020_v20, %v2995_v18 }
0x262d   :  { %v3024_v23 = vsel %vm5297_vm12, %v3021_v34, 0.0 }
0x262e   :  { %3025 = vadd.xlane.f32.xlu2 %v3024_v23 }
0x2632   :  { %v3022_v12 = vpop.f32.mrf.mxu0 }
0x26a1   :  { %v3026_v25 = vpop.xlane.xlu2 %3025 }
0x26a2   :  { %v3027_v35 = vmul.f32 %v3026_v25, %v4247_v36 }
0x26a4   :  { %v3028_v59 = vsub.f32 %v3021_v34, %v3027_v35 }
0x26a6   :  { %v3029_v40 = vmul.f32 %v3028_v59, %v3028_v59 }
0x26a8   :  { %v3030_v47 = vsel %vm5298_vm0, %v3029_v40, 0.0  ;;  %v3783_v40 = vld [vmem:[#allocation6 + $0x180] sm:$0xff]  ;;  %vm5305_vm0 = vmmov %vm5302_vm1 }
0x26a9   :  { %3031 = vadd.xlane.f32.xlu1 %v3030_v47 }
0x271c   :  { %v3032_v51 = vpop.xlane.xlu1 %3031 }
0x271d   :  { %v3033_v45 = vmul.f32 %v3032_v51, %v4247_v36 }
0x271f   :  { %v3034_v6 = vadd.f32 1e-05, %v3033_v45 }
0x2721   :  { %3965 = vrsqrt.f32 %v3034_v6  ;;  %vm3041_vm14 = vweird.f32 %v3034_v6 }
0x2727   :  { %v3966_v49 = vpop.eup %3965 }
0x2728   :  { %v3036_v0 = vmul.f32 %v3966_v49, %v3034_v6  ;;  %vm3042_vm11 = vweird.f32 %v3966_v49 }
0x2729   :  { %vm3043_vm15 = vmor %vm3041_vm14, %vm3042_vm11 }
0x272a   :  { %v3037_v57 = vmul.f32 %v3966_v49, %v3036_v0  ;;  %vm5306_vm11 = vmmov %vm5303_vm2 }
0x272b   :  { %vm5307_vm14 = vmmov %vm5303_vm2 }
0x272c   :  { %v3038_v56 = vmul.f32 0.5, %v3037_v57 }
0x272e   :  { %v3039_v58 = vsub.f32 1.5, %v3038_v56  ;;  %v3174_v56 = vperm.slane %v3697_v11, 1 }
0x2730   :  { %v3040_v60 = vmul.f32 %v3966_v49, %v3039_v58 }
0x2732   :  { %v3044_v5 = vsel %vm3043_vm15, %v3966_v49, %v3040_v60  ;;  %v3176_v60 = vperm.slane %v3697_v11, 2 }
0x2733   :  { %v3045_v7 = vmul.f32 %v3044_v5, %v3028_v59  ;;  %v3784_v59 = vld [vmem:[#allocation6 + $0x188] sm:$0xff] }
0x2734   :  { %3209 = vmatpush.bf16.msra.mxu2 %v3784_v59 }
0x2735   :  { %v3047_v2 = vmul.f32 %v3046_v61, %v3045_v7 }
0x2737   :  { %v3049_v4 = vadd.f32 %v3048_v63, %v3047_v2 }
0x2738   :  { %3210 = vmatpush.bf16.msra.mxu2 %v3783_v40 }
0x2739   :  { %v3050_v8 = vmax.f32 %v3049_v4, 0.0  ;;  %v3707_v4 = vld [vmem:[%s5214_s5 + $0x60] sm:$0x7]  ;;  %s4064_s5 = smov [#allocation7]  }
0x273a   :  { %s3249_s11 = sshll.u32 %s4064_s5, 4  ;;  %s3250_s11 = int_to_ptr.vmem [resolvable:$true] %s3249_s11 }
0x273b   :  { %v3058_v10 = vpack.c.bf16 %v3050_v8, %v3050_v8  ;;  %v3187_v8 = vperm.slane %v3707_v4, 0 }
0x273d   :  { %3696 = vmatmul.msk.bf16.vlgmr.msra.gmra.mxu1 %vm5299_vm4, %v3058_v10 }
0x27ba   :  { %v3084_v19 = vpop.f32.mrf.mxu1 }
0x27bb   :  { %v3085_v21 = vadd.f32 %v3084_v19, %v3059_v29 }
0x27bd   :  { %v3088_v13 = vsel %vm5300_vm5, %v3085_v21, 0.0 }
0x27be   :  { %3089 = vadd.xlane.f32.xlu0 %v3088_v13 }
0x27c2   :  { %v3086_v14 = vpop.f32.mrf.mxu1 }
0x2831   :  { %v3090_v62 = vpop.xlane.xlu0 %3089 }
0x2832   :  { %v3091_v38 = vmul.f32 %v3090_v62, %v4247_v36 }
0x2834   :  { %v3092_v41 = vsub.f32 %v3085_v21, %v3091_v38 }
0x2836   :  { %v3093_v32 = vmul.f32 %v3092_v41, %v3092_v41 }
0x2838   :  { %v3094_v42 = vsel %vm5301_vm6, %v3093_v32, 0.0  ;;  %vm5308_vm6 = vmmov %vm5303_vm2 }
0x2839   :  { %3095 = vadd.xlane.f32.xlu2 %v3094_v42 }
0x28ac   :  { %v3096_v26 = vpop.xlane.xlu2 %3095 }
0x28ad   :  { %v3097_v46 = vmul.f32 %v3096_v26, %v4247_v36 }
0x28af   :  { %v3098_v3 = vadd.f32 1e-05, %v3097_v46 }
0x28b1   :  { %3967 = vrsqrt.f32 %v3098_v3  ;;  %vm3105_vm8 = vweird.f32 %v3098_v3 }
0x28b7   :  { %v3968_v53 = vpop.eup %3967 }
0x28b8   :  { %v3100_v54 = vmul.f32 %v3968_v53, %v3098_v3  ;;  %vm3106_vm7 = vweird.f32 %v3968_v53 }
0x28b9   :  { %vm3107_vm9 = vmor %vm3105_vm8, %vm3106_vm7 }
0x28ba   :  { %v3101_v52 = vmul.f32 %v3968_v53, %v3100_v54  ;;  %v3238_v54 = vperm.slane %v3707_v4, 1 }
0x28bc   :  { %v3102_v50 = vmul.f32 0.5, %v3101_v52 }
0x28be   :  { %v3103_v43 = vsub.f32 1.5, %v3102_v50 }
0x28c0   :  { %v3104_v55 = vmul.f32 %v3968_v53, %v3103_v43  ;;  %v3240_v43 = vperm.slane %v3707_v4, 2 }
0x28c2   :  { %v3108_v27 = vsel %vm3107_vm9, %v3968_v53, %v3104_v55 }
0x28c3   :  { %v3109_v9 = vmul.f32 %v3108_v27, %v3092_v41 }
0x28c5   :  { %v3111_v22 = vmul.f32 %v3110_v15, %v3109_v9 }
0x28c7   :  { %v3113_v37 = vadd.f32 %v3112_v16, %v3111_v22 }
0x28c9   :  { %v3114_v1 = vmax.f32 %v3113_v37, 0.0 }
0x28cb   :  { %v3122_v30 = vpack.c.bf16 %v3114_v1, %v3114_v1 }
0x28cd   :  { %3706 = vmatmul.msk.bf16.vlgmr.msrb.gmra.mxu3 %vm5302_vm1, %v3122_v30 }
0x2950   :  { %v3148_v33 = vpop.f32.mrf.mxu3 }
0x2951   :  { %v3149_v39 = vadd.f32 %v3148_v33, %v3123_v44 }
0x2953   :  { %v3152_v18 = vsel %vm5303_vm2, %v3149_v39, 0.0 }
0x2954   :  { %3153 = vadd.xlane.f32.xlu1 %v3152_v18 }
0x2958   :  { %v3150_v20 = vpop.f32.mrf.mxu3 }
0x29c7   :  { %v3154_v34 = vpop.xlane.xlu1 %3153 }
0x29c8   :  { %v3155_v23 = vmul.f32 %v3154_v34, %v4247_v36 }
0x29ca   :  { %v3156_v12 = vsub.f32 %v3149_v39, %v3155_v23 }
0x29cc   :  { %v3157_v25 = vmul.f32 %v3156_v12, %v3156_v12 }
0x29ce   :  { %v3158_v35 = vsel %vm5304_vm10, %v3157_v25, 0.0 }
0x29cf   :  { %3159 = vadd.xlane.f32.xlu0 %v3158_v35 }
0x2a42   :  { %v3160_v47 = vpop.xlane.xlu0 %3159 }
0x2a43   :  { %v3161_v48 = vmul.f32 %v3160_v47, %v4247_v36 }
0x2a45   :  { %v3162_v28 = vadd.f32 1e-05, %v3161_v48 }
0x2a47   :  { %3969 = vrsqrt.f32 %v3162_v28  ;;  %vm3169_vm13 = vweird.f32 %v3162_v28 }
0x2a4d   :  { %v3970_v51 = vpop.eup %3969 }
0x2a4e   :  { %v3164_v45 = vmul.f32 %v3970_v51, %v3162_v28  ;;  %vm3170_vm3 = vweird.f32 %v3970_v51 }
0x2a4f   :  { %vm3171_vm12 = vmor %vm3169_vm13, %vm3170_vm3 }
0x2a50   :  { %v3165_v6 = vmul.f32 %v3970_v51, %v3164_v45 }
0x2a52   :  { %v3166_v49 = vmul.f32 0.5, %v3165_v6 }
0x2a54   :  { %v3167_v0 = vsub.f32 1.5, %v3166_v49 }
0x2a56   :  { %v3168_v57 = vmul.f32 %v3970_v51, %v3167_v0 }
0x2a58   :  { %v3172_v58 = vsel %vm3171_vm12, %v3970_v51, %v3168_v57 }
0x2a59   :  { %v3173_v61 = vmul.f32 %v3172_v58, %v3156_v12 }
0x2a5b   :  { %v3175_v5 = vmul.f32 %v3174_v56, %v3173_v61 }
0x2a5d   :  { %v3177_v63 = vadd.f32 %v3176_v60, %v3175_v5 }
0x2a5f   :  { %v3178_v7 = vmax.f32 %v3177_v63, 0.0 }
0x2a61   :  { %v3186_v2 = vpack.c.bf16 %v3178_v7, %v3178_v7 }
0x2a63   :  { %3716 = vmatmul.msk.bf16.vlgmr.msra.gmra.mxu2 %vm5305_vm0, %v3186_v2 }
0x2ae6   :  { %v3212_v10 = vpop.f32.mrf.mxu2 }
0x2ae7   :  { %v3213_v17 = vadd.f32 %v3212_v10, %v3187_v8 }
0x2ae9   :  { %v3216_v29 = vsel %vm5306_vm11, %v3213_v17, 0.0 }
0x2aea   :  { %3217 = vadd.xlane.f32.xlu2 %v3216_v29 }
0x2aee   :  { %v3214_v19 = vpop.f32.mrf.mxu2 }
0x2b5d   :  { %v3218_v21 = vpop.xlane.xlu2 %3217 }
0x2b5e   :  { %v3219_v13 = vmul.f32 %v3218_v21, %v4247_v36 }
0x2b60   :  { %v3220_v14 = vsub.f32 %v3213_v17, %v3219_v13 }
0x2b62   :  { %v3221_v62 = vmul.f32 %v3220_v14, %v3220_v14 }
0x2b64   :  { %v3222_v38 = vsel %vm5307_vm14, %v3221_v62, 0.0 }
0x2b65   :  { %3223 = vadd.xlane.f32.xlu1 %v3222_v38 }
0x2bd8   :  { %v3224_v41 = vpop.xlane.xlu1 %3223 }
0x2bd9   :  { %v3225_v32 = vmul.f32 %v3224_v41, %v4247_v36 }
0x2bdb   :  { %v3226_v42 = vadd.f32 1e-05, %v3225_v32 }
0x2bdd   :  { %3971 = vrsqrt.f32 %v3226_v42  ;;  %vm3233_vm4 = vweird.f32 %v3226_v42 }
0x2be3   :  { %v3972_v24 = vpop.eup %3971 }
0x2be4   :  { %v3228_v31 = vmul.f32 %v3972_v24, %v3226_v42  ;;  %vm3234_vm15 = vweird.f32 %v3972_v24 }
0x2be5   :  { %vm3235_vm5 = vmor %vm3233_vm4, %vm3234_vm15 }
0x2be6   :  { %v3229_v26 = vmul.f32 %v3972_v24, %v3228_v31 }
0x2be8   :  { %v3230_v46 = vmul.f32 0.5, %v3229_v26 }
0x2bea   :  { %v3231_v3 = vsub.f32 1.5, %v3230_v46 }
0x2bec   :  { %v3232_v53 = vmul.f32 %v3972_v24, %v3231_v3 }
0x2bee   :  { %v3236_v52 = vsel %vm3235_vm5, %v3972_v24, %v3232_v53 }
0x2bef   :  { %v3237_v50 = vmul.f32 %v3236_v52, %v3220_v14 }
0x2bf1   :  { %v3239_v55 = vmul.f32 %v3238_v54, %v3237_v50 }
0x2bf3   :  { %v3241_v36 = vadd.f32 %v3240_v43, %v3239_v55 }
0x2bf5   :  { %v3242_v15 = vmax.f32 %v3241_v36, 0.0 }
0x2bf7   :  { %3243 = vst.msk [vmem:[#allocation7] sm:$0x3] %vm5308_vm6, %v3242_v15 }
0x2bf8   :  { %3254 = dma.vmem_to_hbm [thread:$0]  %s3250_s11, 32, %s3252_s7, [#allocation4]  }
0x2bf9   :  { %4041 = dma.done.wait [#allocation4], 32  }
0x2bfa   :  { %4042 = vsyncadd [#allocation4], 4294967264 }
0x2bfb   :  { %3259 = vsyncpa [#allocation3], 1 }
0x2bfc   :  { %3260 = vsyncpa [#allocation4], 1 }
0x2bfd   :  { %3261 = vsyncpa [#allocation5], 1 }

</bundles_post_ra>
